<compile_context>
chip_gen: v7x
topology: tpu7x:2x2x1
jax: 0.10.0
libtpu: 0.0.40
codegen_flags: <defaults>
</compile_context>

<pallas_src>
import jax
import jax.numpy as jnp
from jax import lax
from jax.experimental import pallas as pl
from jax.experimental.pallas import tpu as pltpu


def _discriminator_kernel(
    src_emb_ref, tgt_emb_ref, valid_sb_ref, valid_col_ref,
    w_ih_e_ref, w_hh_e_ref, b_e_ref,
    w_x_d_ref, w_feed_d_ref, w_hh_d_ref, b_d_ref,
    w_attn_h_ref, w_ao_ctx_ref,
    w_fc_ref, b_fc_ref,
    x_out_ref, attn_out_ref,
    enc_scr, dec_scr, xg_e_scr, xg_d_scr):

  S, B, E = src_emb_ref.shape
  T = tgt_emb_ref.shape[0]
  H = w_hh_e_ref.shape[0]
  G = 4 * H

  f32 = jnp.float32
  bf16 = jnp.bfloat16
  unroll_enc = bool(S <= 16)   # cap unroll for longer sequences
  unroll_dec = bool(T <= 16)

  # Recurrent (hidden-to-hidden) weights, loaded once (bf16 operands).
  w_hh_e = w_hh_e_ref[...]
  w_feed_d = w_feed_d_ref[...]
  w_hh_d = w_hh_d_ref[...]
  w_attn_h = w_attn_h_ref[...]        # (H, 2H): [input_proj | output_proj_h]
  w_ao_ctx = w_ao_ctx_ref[...]
  valid_sb = valid_sb_ref[...]        # (S, B) f32, 1=valid, 0=pad

  # ---- Hoisted input-to-hidden matmuls (one big MXU matmul per loop) ----
  # Stored bf16: they are only added to the f32 h@W_hh term pre-nonlinearity.
  src_flat = src_emb_ref[...].reshape(S * B, E)               # bf16
  xg_e_scr[...] = (jnp.dot(src_flat, w_ih_e_ref[...],
                           preferred_element_type=f32)
                   + b_e_ref[...]).reshape(S, B, G).astype(bf16)
  tgt_flat = tgt_emb_ref[...].reshape(T * B, E)               # bf16
  xg_d_scr[...] = (jnp.dot(tgt_flat, w_x_d_ref[...],
                           preferred_element_type=f32)
                   + b_d_ref[...]).reshape(T, B, G).astype(bf16)

  def gates_to_hc(gates, c):
    # PyTorch gate order: i, f, g, o (bias already folded into gates).
    # One full-width (B, 4H) sigmoid pass; tanh only on the g slice.
    sg = jax.nn.sigmoid(gates)
    i = sg[:, 0 * H:1 * H]
    f = sg[:, 1 * H:2 * H]
    g = jnp.tanh(gates[:, 2 * H:3 * H])
    o = sg[:, 3 * H:4 * H]
    c_new = f * c + i * g
    h_new = o * jnp.tanh(c_new)
    return h_new, c_new

  # -------- encoder LSTM (packed-sequence semantics, state in f32) --------
  def enc_step(s, carry):
    h, c = carry
    m = valid_col_ref[s]                                      # (B, 1) tile load
    gates = xg_e_scr[s] + jnp.dot(h.astype(bf16), w_hh_e,
                                  preferred_element_type=f32)
    h_new, c_new = gates_to_hc(gates, c)
    enc_scr[s] = m * h_new                                    # pad outputs -> 0
    # state freeze past `lengths`: h + m*(h_new - h) (m in {0,1})
    return (h + m * (h_new - h), c + m * (c_new - c))

  h0 = jnp.zeros((B, H), f32)
  c0 = jnp.zeros((B, H), f32)
  h_e, c_e = lax.fori_loop(0, S, enc_step, (h0, c0), unroll=unroll_enc)

  enc = enc_scr[...]                                          # (S, B, H) f32
  neg = jnp.float32(-1e30)   # finite "-inf": avoids NaN if a row is all-masked

  # ------- decoder: LSTMCell + input feeding + dot-product attention -------
  def dec_step(t, carry):
    h, c, feed = carry
    gates = (xg_d_scr[t]
             + jnp.dot(feed.astype(bf16), w_feed_d, preferred_element_type=f32)
             + jnp.dot(h.astype(bf16), w_hh_d, preferred_element_type=f32))
    h_new, c_new = gates_to_hc(gates, c)

    # Fused shared-LHS matmul: [input_proj(h) | output_proj_h(h)] in one shot.
    qh = jnp.dot(h_new.astype(bf16), w_attn_h, preferred_element_type=f32)
    q = qh[:, :H]                                             # (B, H)
    h_proj = qh[:, H:]                                        # (B, H)

    # AttentionLayer: scores = (enc * q).sum(-1), masked softmax over S.
    scores = jnp.sum(enc * q[None, :, :], axis=-1)            # (S, B)
    scores = jnp.where(valid_sb > 0.5, scores, neg)           # mask pads
    m_s = jnp.max(scores, axis=0, keepdims=True)              # (1, B)
    p = jnp.exp(scores - m_s)                                 # (S, B)
    l = jnp.sum(p, axis=0, keepdims=True)                     # (1, B)
    attn = p * pl.reciprocal(l, approx=True)                  # softmax (EUP)
    ctx = jnp.sum(attn[:, :, None] * enc, axis=0)             # (B, H)

    out = jnp.tanh(
        jnp.dot(ctx.astype(bf16), w_ao_ctx, preferred_element_type=f32)
        + h_proj)

    dec_scr[t] = out
    attn_out_ref[t] = attn.T                                  # (B, S) lane-major
    return (h_new, c_new, out)

  feed0 = jnp.zeros((B, H), f32)
  lax.fori_loop(0, T, dec_step, (h_e, c_e, feed0), unroll=unroll_dec)

  # ---------------- fc_out: Linear(H, 1), one shot outside the loop --------
  w_fc_row = w_fc_ref[...]                                    # (1, H) f32
  logits = jnp.sum(dec_scr[...] * w_fc_row[None, :, :], axis=-1)   # (T, B)
  x_out_ref[...] = (logits + b_fc_ref[...]).T                 # (B, T)


def maskgan_discriminator_forward(params, srcs, lengths, samples):
  """srcs: (B, S) int32, lengths: (B,) int32, samples: (B, T) int32.
  Returns (x: (B, T, 1) f32, attn_scores: (B, T, S) f32)."""
  B, S = srcs.shape
  T = samples.shape[1]
  H = params["w_hh_e"].shape[0]
  E = params["enc_emb"].shape[1]
  f32, bf16 = jnp.float32, jnp.bfloat16

  # Pad batch to sublane width (>= 8). TODO(synk): at production batch, tile
  # B toward 64-128 and add a parallel grid axis (v7x: 2 TensorCores).
  B_pad = max(8, ((B + 7) // 8) * 8)
  pad_b = B_pad - B

  # glue: embedding gathers (nn.Embedding) directly in time-major order
  # (no extra transpose pass), then batch pad.
  src_emb = jnp.pad(params["enc_emb"][srcs.T],
                    ((0, 0), (0, pad_b), (0, 0))).astype(bf16)   # (S, B_pad, E)
  tgt_emb = jnp.pad(params["dec_emb"][samples.T],
                    ((0, 0), (0, pad_b), (0, 0))).astype(bf16)   # (T, B_pad, E)

  # right-padded source: position s valid iff s < lengths[b]; padded batch
  # rows get a full-length mask so the attention softmax stays well defined.
  valid = (jnp.arange(S)[:, None] < lengths[None, :]).astype(f32)   # (S, B)
  valid = jnp.pad(valid, ((0, 0), (0, pad_b)), constant_values=1.0)
  valid_col = valid[:, :, None]                                # (S, B_pad, 1)

  # bf16 matmul operands (f32 accumulate in-kernel); split/fused concat weights.
  # NOTE: b_e / b_d are the pre-summed (b_ih + b_hh) LSTM biases.
  w_ih_e = params["w_ih_e"].astype(bf16)
  w_hh_e = params["w_hh_e"].astype(bf16)
  b_e = params["b_e"].astype(f32)
  w_x_d = params["w_ih_d"][:E].astype(bf16)
  w_feed_d = params["w_ih_d"][E:].astype(bf16)
  w_hh_d = params["w_hh_d"].astype(bf16)
  b_d = params["b_d"].astype(f32)
  # Fused shared-LHS RHS: [input_proj | output_proj_h]  -> (H, 2H)
  w_attn_h = jnp.concatenate(
      [params["w_attn_in"], params["w_attn_out"][H:]], axis=1).astype(bf16)
  w_ao_ctx = params["w_attn_out"][:H].astype(bf16)
  w_fc = params["w_fc"].astype(f32)                           # (1, H)
  b_fc = params["b_fc"].astype(f32)                           # (1, 1)

  vmem = pl.BlockSpec(memory_space=pltpu.MemorySpace.VMEM)
  G = 4 * H
  x_bt, attn_tbs = pl.pallas_call(
      _discriminator_kernel,
      out_shape=(jax.ShapeDtypeStruct((B_pad, T), f32),
                 jax.ShapeDtypeStruct((T, B_pad, S), f32)),
      in_specs=[vmem] * 15,
      out_specs=(vmem, vmem),
      scratch_shapes=[
          pltpu.VMEM((S, B_pad, H), f32),    # encoder outputs
          pltpu.VMEM((T, B_pad, H), f32),    # decoder outputs
          pltpu.VMEM((S, B_pad, G), bf16),   # hoisted encoder gate inputs
          pltpu.VMEM((T, B_pad, G), bf16),   # hoisted decoder gate inputs
      ],
      compiler_params=pltpu.CompilerParams(
          vmem_limit_bytes=32 * 1024 * 1024),
  )(src_emb, tgt_emb, valid, valid_col,
    w_ih_e, w_hh_e, b_e,
    w_x_d, w_feed_d, w_hh_d, b_d,
    w_attn_h, w_ao_ctx,
    w_fc, b_fc)

  x = x_bt[:B][:, :, None]                                    # (B, T, 1)
  attn_scores = jnp.transpose(attn_tbs, (1, 0, 2))[:B]        # (B, T, S)
  return x, attn_scores


def init_params(key, vocab, emb_dim, hid_dim, pad_idx):
  ks = jax.random.split(key, 12)

  def u(k, shape, scale=0.1):
    return jax.random.uniform(k, shape, jnp.float32, -1.0, 1.0) * scale

  enc_emb = u(ks[0], (vocab, emb_dim)).at[pad_idx].set(0.0)  # padding_idx row
  dec_emb = u(ks[1], (vocab, emb_dim))
  return dict(
      enc_emb=enc_emb,
      dec_emb=dec_emb,
      w_ih_e=u(ks[2], (emb_dim, 4 * hid_dim)),
      w_hh_e=u(ks[3], (hid_dim, 4 * hid_dim)),
      b_e=u(ks[4], (1, 4 * hid_dim)),               # = b_ih + b_hh (pre-summed)
      w_ih_d=u(ks[5], (emb_dim + hid_dim, 4 * hid_dim)),  # input-feeding input
      w_hh_d=u(ks[6], (hid_dim, 4 * hid_dim)),
      b_d=u(ks[7], (1, 4 * hid_dim)),               # = b_ih + b_hh (pre-summed)
      w_attn_in=u(ks[8], (hid_dim, hid_dim)),       # Attention input_proj (no bias)
      w_attn_out=u(ks[9], (2 * hid_dim, hid_dim)),  # Attention output_proj (no bias)
      w_fc=u(ks[10], (1, hid_dim)),                 # decoder.fc_out = Linear(H, 1)
      b_fc=u(ks[11], (1, 1)),
  )


if __name__ == "__main__":
  V, E, H = 50, 32, 32        # vocab, enc_emb_dim == dec_emb_dim, hidden dim
  B, S, T = 2, 8, 8           # batch, src_len, sample_len
  PAD = 1

  key = jax.random.PRNGKey(0)
  kp, ksrc, ktgt = jax.random.split(key, 3)
  params = init_params(kp, V, E, H, PAD)

  lengths = jnp.array([S, S - 2], dtype=jnp.int32)
  srcs = jax.random.randint(ksrc, (B, S), 2, V, dtype=jnp.int32)
  srcs = jnp.where(jnp.arange(S)[None, :] < lengths[:, None], srcs, PAD)
  samples = jax.random.randint(ktgt, (B, T), 2, V, dtype=jnp.int32)

  x, attn = jax.jit(maskgan_discriminator_forward)(params, srcs, lengths, samples)
  jax.block_until_ready((x, attn))
  assert x.shape == (B, T, 1) and x.dtype == jnp.float32
  assert attn.shape == (B, T, S) and attn.dtype == jnp.float32
  assert bool(jnp.all(jnp.isfinite(x))) and bool(jnp.all(jnp.isfinite(attn)))
  # attention rows over valid positions should sum to ~1 (approx reciprocal)
  assert bool(jnp.all(jnp.abs(jnp.sum(attn, axis=-1) - 1.0) < 1e-2))
  print("KERNEL_OK")
</pallas_src>

<mosaic_0001>
module attributes {stable_mosaic.version = 11 : i64} {
  func.func @_discriminator_kernel(%arg0: memref<8x8x32xbf16, #tpu.memory_space<vmem>>, %arg1: memref<8x8x32xbf16, #tpu.memory_space<vmem>>, %arg2: memref<8x8xf32, #tpu.memory_space<vmem>>, %arg3: memref<8x8x1xf32, #tpu.memory_space<vmem>>, %arg4: memref<32x128xbf16, #tpu.memory_space<vmem>>, %arg5: memref<32x128xbf16, #tpu.memory_space<vmem>>, %arg6: memref<1x128xf32, #tpu.memory_space<vmem>>, %arg7: memref<32x128xbf16, #tpu.memory_space<vmem>>, %arg8: memref<32x128xbf16, #tpu.memory_space<vmem>>, %arg9: memref<32x128xbf16, #tpu.memory_space<vmem>>, %arg10: memref<1x128xf32, #tpu.memory_space<vmem>>, %arg11: memref<32x64xbf16, #tpu.memory_space<vmem>>, %arg12: memref<32x32xbf16, #tpu.memory_space<vmem>>, %arg13: memref<1x32xf32, #tpu.memory_space<vmem>>, %arg14: memref<1x1xf32, #tpu.memory_space<vmem>>, %arg15: memref<8x8xf32, #tpu.memory_space<vmem>>, %arg16: memref<8x8x8xf32, #tpu.memory_space<vmem>>, %arg17: memref<8x8x32xf32, #tpu.memory_space<vmem>>, %arg18: memref<8x8x32xf32, #tpu.memory_space<vmem>>, %arg19: memref<8x8x128xbf16, #tpu.memory_space<vmem>>, %arg20: memref<8x8x128xbf16, #tpu.memory_space<vmem>>) attributes {dimension_semantics = [], scalar_prefetch = 0 : i64, scratch_operands = 4 : i64, tpu.core_type = #tpu.core_type<tc>} {
    %c0 = arith.constant 0 : index
    %c0_0 = arith.constant 0 : index
    %0 = vector.load %arg5[%c0, %c0_0] : memref<32x128xbf16, #tpu.memory_space<vmem>>, vector<32x128xbf16>
    %c0_1 = arith.constant 0 : index
    %c0_2 = arith.constant 0 : index
    %1 = vector.load %arg8[%c0_1, %c0_2] : memref<32x128xbf16, #tpu.memory_space<vmem>>, vector<32x128xbf16>
    %c0_3 = arith.constant 0 : index
    %c0_4 = arith.constant 0 : index
    %2 = vector.load %arg9[%c0_3, %c0_4] : memref<32x128xbf16, #tpu.memory_space<vmem>>, vector<32x128xbf16>
    %c0_5 = arith.constant 0 : index
    %c0_6 = arith.constant 0 : index
    %3 = vector.load %arg11[%c0_5, %c0_6] : memref<32x64xbf16, #tpu.memory_space<vmem>>, vector<32x64xbf16>
    %c0_7 = arith.constant 0 : index
    %c0_8 = arith.constant 0 : index
    %4 = vector.load %arg12[%c0_7, %c0_8] : memref<32x32xbf16, #tpu.memory_space<vmem>>, vector<32x32xbf16>
    %c0_9 = arith.constant 0 : index
    %c0_10 = arith.constant 0 : index
    %5 = vector.load %arg2[%c0_9, %c0_10] : memref<8x8xf32, #tpu.memory_space<vmem>>, vector<8x8xf32>
    %c0_11 = arith.constant 0 : index
    %c0_12 = arith.constant 0 : index
    %c0_13 = arith.constant 0 : index
    %6 = vector.load %arg0[%c0_11, %c0_12, %c0_13] : memref<8x8x32xbf16, #tpu.memory_space<vmem>>, vector<8x8x32xbf16>
    %7 = vector.shape_cast %6 : vector<8x8x32xbf16> to vector<64x32xbf16>
    %c0_14 = arith.constant 0 : index
    %c0_15 = arith.constant 0 : index
    %8 = vector.load %arg4[%c0_14, %c0_15] : memref<32x128xbf16, #tpu.memory_space<vmem>>, vector<32x128xbf16>
    %cst = arith.constant dense<0.000000e+00> : vector<64x128xf32>
    %9 = tpu.matmul %7, %8, %cst {dimension_numbers = #tpu.dot_dimension_numbers<[1], [0], [0], [1], [0, 0, 1, 1], [], []>} : vector<64x32xbf16>, vector<32x128xbf16>, vector<64x128xf32> -> vector<64x128xf32>
    %c0_16 = arith.constant 0 : index
    %c0_17 = arith.constant 0 : index
    %10 = vector.load %arg6[%c0_16, %c0_17] : memref<1x128xf32, #tpu.memory_space<vmem>>, vector<1x128xf32>
    %11 = vector.broadcast %10 : vector<1x128xf32> to vector<64x128xf32>
    %12 = arith.addf %9, %11 : vector<64x128xf32>
    %13 = vector.shape_cast %12 : vector<64x128xf32> to vector<8x8x128xf32>
    %14 = arith.truncf %13 : vector<8x8x128xf32> to vector<8x8x128xbf16>
    %c0_18 = arith.constant 0 : index
    %c0_19 = arith.constant 0 : index
    %c0_20 = arith.constant 0 : index
    %15 = vector.load %arg19[%c0_18, %c0_19, %c0_20] : memref<8x8x128xbf16, #tpu.memory_space<vmem>>, vector<8x8x128xbf16>
    tpu.vector_store %arg19[%c0_18, %c0_19, %c0_20], %14 {strides = array<i32>} : memref<8x8x128xbf16, #tpu.memory_space<vmem>>, vector<8x8x128xbf16>,
    %c0_21 = arith.constant 0 : index
    %c0_22 = arith.constant 0 : index
    %c0_23 = arith.constant 0 : index
    %16 = vector.load %arg1[%c0_21, %c0_22, %c0_23] : memref<8x8x32xbf16, #tpu.memory_space<vmem>>, vector<8x8x32xbf16>
    %17 = vector.shape_cast %16 : vector<8x8x32xbf16> to vector<64x32xbf16>
    %c0_24 = arith.constant 0 : index
    %c0_25 = arith.constant 0 : index
    %18 = vector.load %arg7[%c0_24, %c0_25] : memref<32x128xbf16, #tpu.memory_space<vmem>>, vector<32x128xbf16>
    %cst_26 = arith.constant dense<0.000000e+00> : vector<64x128xf32>
    %19 = tpu.matmul %17, %18, %cst_26 {dimension_numbers = #tpu.dot_dimension_numbers<[1], [0], [0], [1], [0, 0, 1, 1], [], []>} : vector<64x32xbf16>, vector<32x128xbf16>, vector<64x128xf32> -> vector<64x128xf32>
    %c0_27 = arith.constant 0 : index
    %c0_28 = arith.constant 0 : index
    %20 = vector.load %arg10[%c0_27, %c0_28] : memref<1x128xf32, #tpu.memory_space<vmem>>, vector<1x128xf32>
    %21 = vector.broadcast %20 : vector<1x128xf32> to vector<64x128xf32>
    %22 = arith.addf %19, %21 : vector<64x128xf32>
    %23 = vector.shape_cast %22 : vector<64x128xf32> to vector<8x8x128xf32>
    %24 = arith.truncf %23 : vector<8x8x128xf32> to vector<8x8x128xbf16>
    %c0_29 = arith.constant 0 : index
    %c0_30 = arith.constant 0 : index
    %c0_31 = arith.constant 0 : index
    %25 = vector.load %arg20[%c0_29, %c0_30, %c0_31] : memref<8x8x128xbf16, #tpu.memory_space<vmem>>, vector<8x8x128xbf16>
    tpu.vector_store %arg20[%c0_29, %c0_30, %c0_31], %24 {strides = array<i32>} : memref<8x8x128xbf16, #tpu.memory_space<vmem>>, vector<8x8x128xbf16>,
    %cst_32 = arith.constant 0.000000e+00 : f32
    %26 = vector.broadcast %cst_32 : f32 to vector<8x32xf32>
    %cst_33 = arith.constant 0.000000e+00 : f32
    %27 = vector.broadcast %cst_33 : f32 to vector<8x32xf32>
    %c0_i32 = arith.constant 0 : i32
    %28 = arith.index_cast %c0_i32 : i32 to index
    %c0_34 = arith.constant 0 : index
    %c0_35 = arith.constant 0 : index
    %29 = vector.load %arg3[%28, %c0_34, %c0_35] : memref<8x8x1xf32, #tpu.memory_space<vmem>>, vector<1x8x1xf32>
    %30 = vector.shape_cast %29 : vector<1x8x1xf32> to vector<8x1xf32>
    %31 = arith.index_cast %c0_i32 : i32 to index
    %c0_36 = arith.constant 0 : index
    %c0_37 = arith.constant 0 : index
    %32 = vector.load %arg19[%31, %c0_36, %c0_37] : memref<8x8x128xbf16, #tpu.memory_space<vmem>>, vector<1x8x128xbf16>
    %33 = vector.shape_cast %32 : vector<1x8x128xbf16> to vector<8x128xbf16>
    %34 = arith.truncf %26 : vector<8x32xf32> to vector<8x32xbf16>
    %cst_38 = arith.constant dense<0.000000e+00> : vector<8x128xf32>
    %35 = tpu.matmul %34, %0, %cst_38 {dimension_numbers = #tpu.dot_dimension_numbers<[1], [0], [0], [1], [0, 0, 1, 1], [], []>} : vector<8x32xbf16>, vector<32x128xbf16>, vector<8x128xf32> -> vector<8x128xf32>
    %36 = arith.extf %33 : vector<8x128xbf16> to vector<8x128xf32>
    %37 = arith.addf %36, %35 : vector<8x128xf32>
    %38 = arith.negf %37 : vector<8x128xf32>
    %39 = math.exp %38 : vector<8x128xf32>
    %cst_39 = arith.constant 1.000000e+00 : f32
    %40 = vector.broadcast %cst_39 : f32 to vector<8x128xf32>
    %41 = arith.addf %40, %39 : vector<8x128xf32>
    %42 = arith.divf %40, %41 : vector<8x128xf32>
    %43 = vector.extract_strided_slice %42 {offsets = [0, 0], sizes = [8, 32], strides = [1, 1]} : vector<8x128xf32> to vector<8x32xf32>
    %44 = vector.extract_strided_slice %42 {offsets = [0, 32], sizes = [8, 32], strides = [1, 1]} : vector<8x128xf32> to vector<8x32xf32>
    %45 = vector.extract_strided_slice %37 {offsets = [0, 64], sizes = [8, 32], strides = [1, 1]} : vector<8x128xf32> to vector<8x32xf32>
    %46 = math.tanh %45 : vector<8x32xf32>
    %47 = vector.extract_strided_slice %42 {offsets = [0, 96], sizes = [8, 32], strides = [1, 1]} : vector<8x128xf32> to vector<8x32xf32>
    %48 = arith.mulf %44, %27 : vector<8x32xf32>
    %49 = arith.mulf %43, %46 : vector<8x32xf32>
    %50 = arith.addf %48, %49 : vector<8x32xf32>
    %51 = math.tanh %50 : vector<8x32xf32>
    %52 = arith.mulf %47, %51 : vector<8x32xf32>
    %53 = vector.broadcast %30 : vector<8x1xf32> to vector<8x32xf32>
    %54 = arith.mulf %53, %52 : vector<8x32xf32>
    %55 = arith.index_cast %c0_i32 : i32 to index
    %c0_40 = arith.constant 0 : index
    %c0_41 = arith.constant 0 : index
    %56 = vector.load %arg17[%55, %c0_40, %c0_41] : memref<8x8x32xf32, #tpu.memory_space<vmem>>, vector<1x8x32xf32>
    %57 = vector.shape_cast %56 : vector<1x8x32xf32> to vector<8x32xf32>
    %58 = vector.shape_cast %54 : vector<8x32xf32> to vector<1x8x32xf32>
    tpu.vector_store %arg17[%55, %c0_40, %c0_41], %58 {strides = array<i32>} : memref<8x8x32xf32, #tpu.memory_space<vmem>>, vector<1x8x32xf32>,
    %59 = arith.subf %52, %26 : vector<8x32xf32>
    %60 = vector.broadcast %30 : vector<8x1xf32> to vector<8x32xf32>
    %61 = arith.mulf %60, %59 : vector<8x32xf32>
    %62 = arith.addf %26, %61 : vector<8x32xf32>
    %63 = arith.subf %50, %27 : vector<8x32xf32>
    %64 = vector.broadcast %30 : vector<8x1xf32> to vector<8x32xf32>
    %65 = arith.mulf %64, %63 : vector<8x32xf32>
    %66 = arith.addf %27, %65 : vector<8x32xf32>
    %c1_i32 = arith.constant 1 : i32
    %67 = arith.index_cast %c1_i32 : i32 to index
    %c0_42 = arith.constant 0 : index
    %c0_43 = arith.constant 0 : index
    %68 = vector.load %arg3[%67, %c0_42, %c0_43] : memref<8x8x1xf32, #tpu.memory_space<vmem>>, vector<1x8x1xf32>
    %69 = vector.shape_cast %68 : vector<1x8x1xf32> to vector<8x1xf32>
    %70 = arith.index_cast %c1_i32 : i32 to index
    %c0_44 = arith.constant 0 : index
    %c0_45 = arith.constant 0 : index
    %71 = vector.load %arg19[%70, %c0_44, %c0_45] : memref<8x8x128xbf16, #tpu.memory_space<vmem>>, vector<1x8x128xbf16>
    %72 = vector.shape_cast %71 : vector<1x8x128xbf16> to vector<8x128xbf16>
    %73 = arith.truncf %62 : vector<8x32xf32> to vector<8x32xbf16>
    %cst_46 = arith.constant dense<0.000000e+00> : vector<8x128xf32>
    %74 = tpu.matmul %73, %0, %cst_46 {dimension_numbers = #tpu.dot_dimension_numbers<[1], [0], [0], [1], [0, 0, 1, 1], [], []>} : vector<8x32xbf16>, vector<32x128xbf16>, vector<8x128xf32> -> vector<8x128xf32>
    %75 = arith.extf %72 : vector<8x128xbf16> to vector<8x128xf32>
    %76 = arith.addf %75, %74 : vector<8x128xf32>
    %77 = arith.negf %76 : vector<8x128xf32>
    %78 = math.exp %77 : vector<8x128xf32>
    %cst_47 = arith.constant 1.000000e+00 : f32
    %79 = vector.broadcast %cst_47 : f32 to vector<8x128xf32>
    %80 = arith.addf %79, %78 : vector<8x128xf32>
    %81 = arith.divf %79, %80 : vector<8x128xf32>
    %82 = vector.extract_strided_slice %81 {offsets = [0, 0], sizes = [8, 32], strides = [1, 1]} : vector<8x128xf32> to vector<8x32xf32>
    %83 = vector.extract_strided_slice %81 {offsets = [0, 32], sizes = [8, 32], strides = [1, 1]} : vector<8x128xf32> to vector<8x32xf32>
    %84 = vector.extract_strided_slice %76 {offsets = [0, 64], sizes = [8, 32], strides = [1, 1]} : vector<8x128xf32> to vector<8x32xf32>
    %85 = math.tanh %84 : vector<8x32xf32>
    %86 = vector.extract_strided_slice %81 {offsets = [0, 96], sizes = [8, 32], strides = [1, 1]} : vector<8x128xf32> to vector<8x32xf32>
    %87 = arith.mulf %83, %66 : vector<8x32xf32>
    %88 = arith.mulf %82, %85 : vector<8x32xf32>
    %89 = arith.addf %87, %88 : vector<8x32xf32>
    %90 = math.tanh %89 : vector<8x32xf32>
    %91 = arith.mulf %86, %90 : vector<8x32xf32>
    %92 = vector.broadcast %69 : vector<8x1xf32> to vector<8x32xf32>
    %93 = arith.mulf %92, %91 : vector<8x32xf32>
    %94 = arith.index_cast %c1_i32 : i32 to index
    %c0_48 = arith.constant 0 : index
    %c0_49 = arith.constant 0 : index
    %95 = vector.load %arg17[%94, %c0_48, %c0_49] : memref<8x8x32xf32, #tpu.memory_space<vmem>>, vector<1x8x32xf32>
    %96 = vector.shape_cast %95 : vector<1x8x32xf32> to vector<8x32xf32>
    %97 = vector.shape_cast %93 : vector<8x32xf32> to vector<1x8x32xf32>
    tpu.vector_store %arg17[%94, %c0_48, %c0_49], %97 {strides = array<i32>} : memref<8x8x32xf32, #tpu.memory_space<vmem>>, vector<1x8x32xf32>,
    %98 = arith.subf %91, %62 : vector<8x32xf32>
    %99 = vector.broadcast %69 : vector<8x1xf32> to vector<8x32xf32>
    %100 = arith.mulf %99, %98 : vector<8x32xf32>
    %101 = arith.addf %62, %100 : vector<8x32xf32>
    %102 = arith.subf %89, %66 : vector<8x32xf32>
    %103 = vector.broadcast %69 : vector<8x1xf32> to vector<8x32xf32>
    %104 = arith.mulf %103, %102 : vector<8x32xf32>
    %105 = arith.addf %66, %104 : vector<8x32xf32>
    %c2_i32 = arith.constant 2 : i32
    %106 = arith.index_cast %c2_i32 : i32 to index
    %c0_50 = arith.constant 0 : index
    %c0_51 = arith.constant 0 : index
    %107 = vector.load %arg3[%106, %c0_50, %c0_51] : memref<8x8x1xf32, #tpu.memory_space<vmem>>, vector<1x8x1xf32>
    %108 = vector.shape_cast %107 : vector<1x8x1xf32> to vector<8x1xf32>
    %109 = arith.index_cast %c2_i32 : i32 to index
    %c0_52 = arith.constant 0 : index
    %c0_53 = arith.constant 0 : index
    %110 = vector.load %arg19[%109, %c0_52, %c0_53] : memref<8x8x128xbf16, #tpu.memory_space<vmem>>, vector<1x8x128xbf16>
    %111 = vector.shape_cast %110 : vector<1x8x128xbf16> to vector<8x128xbf16>
    %112 = arith.truncf %101 : vector<8x32xf32> to vector<8x32xbf16>
    %cst_54 = arith.constant dense<0.000000e+00> : vector<8x128xf32>
    %113 = tpu.matmul %112, %0, %cst_54 {dimension_numbers = #tpu.dot_dimension_numbers<[1], [0], [0], [1], [0, 0, 1, 1], [], []>} : vector<8x32xbf16>, vector<32x128xbf16>, vector<8x128xf32> -> vector<8x128xf32>
    %114 = arith.extf %111 : vector<8x128xbf16> to vector<8x128xf32>
    %115 = arith.addf %114, %113 : vector<8x128xf32>
    %116 = arith.negf %115 : vector<8x128xf32>
    %117 = math.exp %116 : vector<8x128xf32>
    %cst_55 = arith.constant 1.000000e+00 : f32
    %118 = vector.broadcast %cst_55 : f32 to vector<8x128xf32>
    %119 = arith.addf %118, %117 : vector<8x128xf32>
    %120 = arith.divf %118, %119 : vector<8x128xf32>
    %121 = vector.extract_strided_slice %120 {offsets = [0, 0], sizes = [8, 32], strides = [1, 1]} : vector<8x128xf32> to vector<8x32xf32>
    %122 = vector.extract_strided_slice %120 {offsets = [0, 32], sizes = [8, 32], strides = [1, 1]} : vector<8x128xf32> to vector<8x32xf32>
    %123 = vector.extract_strided_slice %115 {offsets = [0, 64], sizes = [8, 32], strides = [1, 1]} : vector<8x128xf32> to vector<8x32xf32>
    %124 = math.tanh %123 : vector<8x32xf32>
    %125 = vector.extract_strided_slice %120 {offsets = [0, 96], sizes = [8, 32], strides = [1, 1]} : vector<8x128xf32> to vector<8x32xf32>
    %126 = arith.mulf %122, %105 : vector<8x32xf32>
    %127 = arith.mulf %121, %124 : vector<8x32xf32>
    %128 = arith.addf %126, %127 : vector<8x32xf32>
    %129 = math.tanh %128 : vector<8x32xf32>
    %130 = arith.mulf %125, %129 : vector<8x32xf32>
    %131 = vector.broadcast %108 : vector<8x1xf32> to vector<8x32xf32>
    %132 = arith.mulf %131, %130 : vector<8x32xf32>
    %133 = arith.index_cast %c2_i32 : i32 to index
    %c0_56 = arith.constant 0 : index
    %c0_57 = arith.constant 0 : index
    %134 = vector.load %arg17[%133, %c0_56, %c0_57] : memref<8x8x32xf32, #tpu.memory_space<vmem>>, vector<1x8x32xf32>
    %135 = vector.shape_cast %134 : vector<1x8x32xf32> to vector<8x32xf32>
    %136 = vector.shape_cast %132 : vector<8x32xf32> to vector<1x8x32xf32>
    tpu.vector_store %arg17[%133, %c0_56, %c0_57], %136 {strides = array<i32>} : memref<8x8x32xf32, #tpu.memory_space<vmem>>, vector<1x8x32xf32>,
    %137 = arith.subf %130, %101 : vector<8x32xf32>
    %138 = vector.broadcast %108 : vector<8x1xf32> to vector<8x32xf32>
    %139 = arith.mulf %138, %137 : vector<8x32xf32>
    %140 = arith.addf %101, %139 : vector<8x32xf32>
    %141 = arith.subf %128, %105 : vector<8x32xf32>
    %142 = vector.broadcast %108 : vector<8x1xf32> to vector<8x32xf32>
    %143 = arith.mulf %142, %141 : vector<8x32xf32>
    %144 = arith.addf %105, %143 : vector<8x32xf32>
    %c3_i32 = arith.constant 3 : i32
    %145 = arith.index_cast %c3_i32 : i32 to index
    %c0_58 = arith.constant 0 : index
    %c0_59 = arith.constant 0 : index
    %146 = vector.load %arg3[%145, %c0_58, %c0_59] : memref<8x8x1xf32, #tpu.memory_space<vmem>>, vector<1x8x1xf32>
    %147 = vector.shape_cast %146 : vector<1x8x1xf32> to vector<8x1xf32>
    %148 = arith.index_cast %c3_i32 : i32 to index
    %c0_60 = arith.constant 0 : index
    %c0_61 = arith.constant 0 : index
    %149 = vector.load %arg19[%148, %c0_60, %c0_61] : memref<8x8x128xbf16, #tpu.memory_space<vmem>>, vector<1x8x128xbf16>
    %150 = vector.shape_cast %149 : vector<1x8x128xbf16> to vector<8x128xbf16>
    %151 = arith.truncf %140 : vector<8x32xf32> to vector<8x32xbf16>
    %cst_62 = arith.constant dense<0.000000e+00> : vector<8x128xf32>
    %152 = tpu.matmul %151, %0, %cst_62 {dimension_numbers = #tpu.dot_dimension_numbers<[1], [0], [0], [1], [0, 0, 1, 1], [], []>} : vector<8x32xbf16>, vector<32x128xbf16>, vector<8x128xf32> -> vector<8x128xf32>
    %153 = arith.extf %150 : vector<8x128xbf16> to vector<8x128xf32>
    %154 = arith.addf %153, %152 : vector<8x128xf32>
    %155 = arith.negf %154 : vector<8x128xf32>
    %156 = math.exp %155 : vector<8x128xf32>
    %cst_63 = arith.constant 1.000000e+00 : f32
    %157 = vector.broadcast %cst_63 : f32 to vector<8x128xf32>
    %158 = arith.addf %157, %156 : vector<8x128xf32>
    %159 = arith.divf %157, %158 : vector<8x128xf32>
    %160 = vector.extract_strided_slice %159 {offsets = [0, 0], sizes = [8, 32], strides = [1, 1]} : vector<8x128xf32> to vector<8x32xf32>
    %161 = vector.extract_strided_slice %159 {offsets = [0, 32], sizes = [8, 32], strides = [1, 1]} : vector<8x128xf32> to vector<8x32xf32>
    %162 = vector.extract_strided_slice %154 {offsets = [0, 64], sizes = [8, 32], strides = [1, 1]} : vector<8x128xf32> to vector<8x32xf32>
    %163 = math.tanh %162 : vector<8x32xf32>
    %164 = vector.extract_strided_slice %159 {offsets = [0, 96], sizes = [8, 32], strides = [1, 1]} : vector<8x128xf32> to vector<8x32xf32>
    %165 = arith.mulf %161, %144 : vector<8x32xf32>
    %166 = arith.mulf %160, %163 : vector<8x32xf32>
    %167 = arith.addf %165, %166 : vector<8x32xf32>
    %168 = math.tanh %167 : vector<8x32xf32>
    %169 = arith.mulf %164, %168 : vector<8x32xf32>
    %170 = vector.broadcast %147 : vector<8x1xf32> to vector<8x32xf32>
    %171 = arith.mulf %170, %169 : vector<8x32xf32>
    %172 = arith.index_cast %c3_i32 : i32 to index
    %c0_64 = arith.constant 0 : index
    %c0_65 = arith.constant 0 : index
    %173 = vector.load %arg17[%172, %c0_64, %c0_65] : memref<8x8x32xf32, #tpu.memory_space<vmem>>, vector<1x8x32xf32>
    %174 = vector.shape_cast %173 : vector<1x8x32xf32> to vector<8x32xf32>
    %175 = vector.shape_cast %171 : vector<8x32xf32> to vector<1x8x32xf32>
    tpu.vector_store %arg17[%172, %c0_64, %c0_65], %175 {strides = array<i32>} : memref<8x8x32xf32, #tpu.memory_space<vmem>>, vector<1x8x32xf32>,
    %176 = arith.subf %169, %140 : vector<8x32xf32>
    %177 = vector.broadcast %147 : vector<8x1xf32> to vector<8x32xf32>
    %178 = arith.mulf %177, %176 : vector<8x32xf32>
    %179 = arith.addf %140, %178 : vector<8x32xf32>
    %180 = arith.subf %167, %144 : vector<8x32xf32>
    %181 = vector.broadcast %147 : vector<8x1xf32> to vector<8x32xf32>
    %182 = arith.mulf %181, %180 : vector<8x32xf32>
    %183 = arith.addf %144, %182 : vector<8x32xf32>
    %c4_i32 = arith.constant 4 : i32
    %184 = arith.index_cast %c4_i32 : i32 to index
    %c0_66 = arith.constant 0 : index
    %c0_67 = arith.constant 0 : index
    %185 = vector.load %arg3[%184, %c0_66, %c0_67] : memref<8x8x1xf32, #tpu.memory_space<vmem>>, vector<1x8x1xf32>
    %186 = vector.shape_cast %185 : vector<1x8x1xf32> to vector<8x1xf32>
    %187 = arith.index_cast %c4_i32 : i32 to index
    %c0_68 = arith.constant 0 : index
    %c0_69 = arith.constant 0 : index
    %188 = vector.load %arg19[%187, %c0_68, %c0_69] : memref<8x8x128xbf16, #tpu.memory_space<vmem>>, vector<1x8x128xbf16>
    %189 = vector.shape_cast %188 : vector<1x8x128xbf16> to vector<8x128xbf16>
    %190 = arith.truncf %179 : vector<8x32xf32> to vector<8x32xbf16>
    %cst_70 = arith.constant dense<0.000000e+00> : vector<8x128xf32>
    %191 = tpu.matmul %190, %0, %cst_70 {dimension_numbers = #tpu.dot_dimension_numbers<[1], [0], [0], [1], [0, 0, 1, 1], [], []>} : vector<8x32xbf16>, vector<32x128xbf16>, vector<8x128xf32> -> vector<8x128xf32>
    %192 = arith.extf %189 : vector<8x128xbf16> to vector<8x128xf32>
    %193 = arith.addf %192, %191 : vector<8x128xf32>
    %194 = arith.negf %193 : vector<8x128xf32>
    %195 = math.exp %194 : vector<8x128xf32>
    %cst_71 = arith.constant 1.000000e+00 : f32
    %196 = vector.broadcast %cst_71 : f32 to vector<8x128xf32>
    %197 = arith.addf %196, %195 : vector<8x128xf32>
    %198 = arith.divf %196, %197 : vector<8x128xf32>
    %199 = vector.extract_strided_slice %198 {offsets = [0, 0], sizes = [8, 32], strides = [1, 1]} : vector<8x128xf32> to vector<8x32xf32>
    %200 = vector.extract_strided_slice %198 {offsets = [0, 32], sizes = [8, 32], strides = [1, 1]} : vector<8x128xf32> to vector<8x32xf32>
    %201 = vector.extract_strided_slice %193 {offsets = [0, 64], sizes = [8, 32], strides = [1, 1]} : vector<8x128xf32> to vector<8x32xf32>
    %202 = math.tanh %201 : vector<8x32xf32>
    %203 = vector.extract_strided_slice %198 {offsets = [0, 96], sizes = [8, 32], strides = [1, 1]} : vector<8x128xf32> to vector<8x32xf32>
    %204 = arith.mulf %200, %183 : vector<8x32xf32>
    %205 = arith.mulf %199, %202 : vector<8x32xf32>
    %206 = arith.addf %204, %205 : vector<8x32xf32>
    %207 = math.tanh %206 : vector<8x32xf32>
    %208 = arith.mulf %203, %207 : vector<8x32xf32>
    %209 = vector.broadcast %186 : vector<8x1xf32> to vector<8x32xf32>
    %210 = arith.mulf %209, %208 : vector<8x32xf32>
    %211 = arith.index_cast %c4_i32 : i32 to index
    %c0_72 = arith.constant 0 : index
    %c0_73 = arith.constant 0 : index
    %212 = vector.load %arg17[%211, %c0_72, %c0_73] : memref<8x8x32xf32, #tpu.memory_space<vmem>>, vector<1x8x32xf32>
    %213 = vector.shape_cast %212 : vector<1x8x32xf32> to vector<8x32xf32>
    %214 = vector.shape_cast %210 : vector<8x32xf32> to vector<1x8x32xf32>
    tpu.vector_store %arg17[%211, %c0_72, %c0_73], %214 {strides = array<i32>} : memref<8x8x32xf32, #tpu.memory_space<vmem>>, vector<1x8x32xf32>,
    %215 = arith.subf %208, %179 : vector<8x32xf32>
    %216 = vector.broadcast %186 : vector<8x1xf32> to vector<8x32xf32>
    %217 = arith.mulf %216, %215 : vector<8x32xf32>
    %218 = arith.addf %179, %217 : vector<8x32xf32>
    %219 = arith.subf %206, %183 : vector<8x32xf32>
    %220 = vector.broadcast %186 : vector<8x1xf32> to vector<8x32xf32>
    %221 = arith.mulf %220, %219 : vector<8x32xf32>
    %222 = arith.addf %183, %221 : vector<8x32xf32>
    %c5_i32 = arith.constant 5 : i32
    %223 = arith.index_cast %c5_i32 : i32 to index
    %c0_74 = arith.constant 0 : index
    %c0_75 = arith.constant 0 : index
    %224 = vector.load %arg3[%223, %c0_74, %c0_75] : memref<8x8x1xf32, #tpu.memory_space<vmem>>, vector<1x8x1xf32>
    %225 = vector.shape_cast %224 : vector<1x8x1xf32> to vector<8x1xf32>
    %226 = arith.index_cast %c5_i32 : i32 to index
    %c0_76 = arith.constant 0 : index
    %c0_77 = arith.constant 0 : index
    %227 = vector.load %arg19[%226, %c0_76, %c0_77] : memref<8x8x128xbf16, #tpu.memory_space<vmem>>, vector<1x8x128xbf16>
    %228 = vector.shape_cast %227 : vector<1x8x128xbf16> to vector<8x128xbf16>
    %229 = arith.truncf %218 : vector<8x32xf32> to vector<8x32xbf16>
    %cst_78 = arith.constant dense<0.000000e+00> : vector<8x128xf32>
    %230 = tpu.matmul %229, %0, %cst_78 {dimension_numbers = #tpu.dot_dimension_numbers<[1], [0], [0], [1], [0, 0, 1, 1], [], []>} : vector<8x32xbf16>, vector<32x128xbf16>, vector<8x128xf32> -> vector<8x128xf32>
    %231 = arith.extf %228 : vector<8x128xbf16> to vector<8x128xf32>
    %232 = arith.addf %231, %230 : vector<8x128xf32>
    %233 = arith.negf %232 : vector<8x128xf32>
    %234 = math.exp %233 : vector<8x128xf32>
    %cst_79 = arith.constant 1.000000e+00 : f32
    %235 = vector.broadcast %cst_79 : f32 to vector<8x128xf32>
    %236 = arith.addf %235, %234 : vector<8x128xf32>
    %237 = arith.divf %235, %236 : vector<8x128xf32>
    %238 = vector.extract_strided_slice %237 {offsets = [0, 0], sizes = [8, 32], strides = [1, 1]} : vector<8x128xf32> to vector<8x32xf32>
    %239 = vector.extract_strided_slice %237 {offsets = [0, 32], sizes = [8, 32], strides = [1, 1]} : vector<8x128xf32> to vector<8x32xf32>
    %240 = vector.extract_strided_slice %232 {offsets = [0, 64], sizes = [8, 32], strides = [1, 1]} : vector<8x128xf32> to vector<8x32xf32>
    %241 = math.tanh %240 : vector<8x32xf32>
    %242 = vector.extract_strided_slice %237 {offsets = [0, 96], sizes = [8, 32], strides = [1, 1]} : vector<8x128xf32> to vector<8x32xf32>
    %243 = arith.mulf %239, %222 : vector<8x32xf32>
    %244 = arith.mulf %238, %241 : vector<8x32xf32>
    %245 = arith.addf %243, %244 : vector<8x32xf32>
    %246 = math.tanh %245 : vector<8x32xf32>
    %247 = arith.mulf %242, %246 : vector<8x32xf32>
    %248 = vector.broadcast %225 : vector<8x1xf32> to vector<8x32xf32>
    %249 = arith.mulf %248, %247 : vector<8x32xf32>
    %250 = arith.index_cast %c5_i32 : i32 to index
    %c0_80 = arith.constant 0 : index
    %c0_81 = arith.constant 0 : index
    %251 = vector.load %arg17[%250, %c0_80, %c0_81] : memref<8x8x32xf32, #tpu.memory_space<vmem>>, vector<1x8x32xf32>
    %252 = vector.shape_cast %251 : vector<1x8x32xf32> to vector<8x32xf32>
    %253 = vector.shape_cast %249 : vector<8x32xf32> to vector<1x8x32xf32>
    tpu.vector_store %arg17[%250, %c0_80, %c0_81], %253 {strides = array<i32>} : memref<8x8x32xf32, #tpu.memory_space<vmem>>, vector<1x8x32xf32>,
    %254 = arith.subf %247, %218 : vector<8x32xf32>
    %255 = vector.broadcast %225 : vector<8x1xf32> to vector<8x32xf32>
    %256 = arith.mulf %255, %254 : vector<8x32xf32>
    %257 = arith.addf %218, %256 : vector<8x32xf32>
    %258 = arith.subf %245, %222 : vector<8x32xf32>
    %259 = vector.broadcast %225 : vector<8x1xf32> to vector<8x32xf32>
    %260 = arith.mulf %259, %258 : vector<8x32xf32>
    %261 = arith.addf %222, %260 : vector<8x32xf32>
    %c6_i32 = arith.constant 6 : i32
    %262 = arith.index_cast %c6_i32 : i32 to index
    %c0_82 = arith.constant 0 : index
    %c0_83 = arith.constant 0 : index
    %263 = vector.load %arg3[%262, %c0_82, %c0_83] : memref<8x8x1xf32, #tpu.memory_space<vmem>>, vector<1x8x1xf32>
    %264 = vector.shape_cast %263 : vector<1x8x1xf32> to vector<8x1xf32>
    %265 = arith.index_cast %c6_i32 : i32 to index
    %c0_84 = arith.constant 0 : index
    %c0_85 = arith.constant 0 : index
    %266 = vector.load %arg19[%265, %c0_84, %c0_85] : memref<8x8x128xbf16, #tpu.memory_space<vmem>>, vector<1x8x128xbf16>
    %267 = vector.shape_cast %266 : vector<1x8x128xbf16> to vector<8x128xbf16>
    %268 = arith.truncf %257 : vector<8x32xf32> to vector<8x32xbf16>
    %cst_86 = arith.constant dense<0.000000e+00> : vector<8x128xf32>
    %269 = tpu.matmul %268, %0, %cst_86 {dimension_numbers = #tpu.dot_dimension_numbers<[1], [0], [0], [1], [0, 0, 1, 1], [], []>} : vector<8x32xbf16>, vector<32x128xbf16>, vector<8x128xf32> -> vector<8x128xf32>
    %270 = arith.extf %267 : vector<8x128xbf16> to vector<8x128xf32>
    %271 = arith.addf %270, %269 : vector<8x128xf32>
    %272 = arith.negf %271 : vector<8x128xf32>
    %273 = math.exp %272 : vector<8x128xf32>
    %cst_87 = arith.constant 1.000000e+00 : f32
    %274 = vector.broadcast %cst_87 : f32 to vector<8x128xf32>
    %275 = arith.addf %274, %273 : vector<8x128xf32>
    %276 = arith.divf %274, %275 : vector<8x128xf32>
    %277 = vector.extract_strided_slice %276 {offsets = [0, 0], sizes = [8, 32], strides = [1, 1]} : vector<8x128xf32> to vector<8x32xf32>
    %278 = vector.extract_strided_slice %276 {offsets = [0, 32], sizes = [8, 32], strides = [1, 1]} : vector<8x128xf32> to vector<8x32xf32>
    %279 = vector.extract_strided_slice %271 {offsets = [0, 64], sizes = [8, 32], strides = [1, 1]} : vector<8x128xf32> to vector<8x32xf32>
    %280 = math.tanh %279 : vector<8x32xf32>
    %281 = vector.extract_strided_slice %276 {offsets = [0, 96], sizes = [8, 32], strides = [1, 1]} : vector<8x128xf32> to vector<8x32xf32>
    %282 = arith.mulf %278, %261 : vector<8x32xf32>
    %283 = arith.mulf %277, %280 : vector<8x32xf32>
    %284 = arith.addf %282, %283 : vector<8x32xf32>
    %285 = math.tanh %284 : vector<8x32xf32>
    %286 = arith.mulf %281, %285 : vector<8x32xf32>
    %287 = vector.broadcast %264 : vector<8x1xf32> to vector<8x32xf32>
    %288 = arith.mulf %287, %286 : vector<8x32xf32>
    %289 = arith.index_cast %c6_i32 : i32 to index
    %c0_88 = arith.constant 0 : index
    %c0_89 = arith.constant 0 : index
    %290 = vector.load %arg17[%289, %c0_88, %c0_89] : memref<8x8x32xf32, #tpu.memory_space<vmem>>, vector<1x8x32xf32>
    %291 = vector.shape_cast %290 : vector<1x8x32xf32> to vector<8x32xf32>
    %292 = vector.shape_cast %288 : vector<8x32xf32> to vector<1x8x32xf32>
    tpu.vector_store %arg17[%289, %c0_88, %c0_89], %292 {strides = array<i32>} : memref<8x8x32xf32, #tpu.memory_space<vmem>>, vector<1x8x32xf32>,
    %293 = arith.subf %286, %257 : vector<8x32xf32>
    %294 = vector.broadcast %264 : vector<8x1xf32> to vector<8x32xf32>
    %295 = arith.mulf %294, %293 : vector<8x32xf32>
    %296 = arith.addf %257, %295 : vector<8x32xf32>
    %297 = arith.subf %284, %261 : vector<8x32xf32>
    %298 = vector.broadcast %264 : vector<8x1xf32> to vector<8x32xf32>
    %299 = arith.mulf %298, %297 : vector<8x32xf32>
    %300 = arith.addf %261, %299 : vector<8x32xf32>
    %c7_i32 = arith.constant 7 : i32
    %301 = arith.index_cast %c7_i32 : i32 to index
    %c0_90 = arith.constant 0 : index
    %c0_91 = arith.constant 0 : index
    %302 = vector.load %arg3[%301, %c0_90, %c0_91] : memref<8x8x1xf32, #tpu.memory_space<vmem>>, vector<1x8x1xf32>
    %303 = vector.shape_cast %302 : vector<1x8x1xf32> to vector<8x1xf32>
    %304 = arith.index_cast %c7_i32 : i32 to index
    %c0_92 = arith.constant 0 : index
    %c0_93 = arith.constant 0 : index
    %305 = vector.load %arg19[%304, %c0_92, %c0_93] : memref<8x8x128xbf16, #tpu.memory_space<vmem>>, vector<1x8x128xbf16>
    %306 = vector.shape_cast %305 : vector<1x8x128xbf16> to vector<8x128xbf16>
    %307 = arith.truncf %296 : vector<8x32xf32> to vector<8x32xbf16>
    %cst_94 = arith.constant dense<0.000000e+00> : vector<8x128xf32>
    %308 = tpu.matmul %307, %0, %cst_94 {dimension_numbers = #tpu.dot_dimension_numbers<[1], [0], [0], [1], [0, 0, 1, 1], [], []>} : vector<8x32xbf16>, vector<32x128xbf16>, vector<8x128xf32> -> vector<8x128xf32>
    %309 = arith.extf %306 : vector<8x128xbf16> to vector<8x128xf32>
    %310 = arith.addf %309, %308 : vector<8x128xf32>
    %311 = arith.negf %310 : vector<8x128xf32>
    %312 = math.exp %311 : vector<8x128xf32>
    %cst_95 = arith.constant 1.000000e+00 : f32
    %313 = vector.broadcast %cst_95 : f32 to vector<8x128xf32>
    %314 = arith.addf %313, %312 : vector<8x128xf32>
    %315 = arith.divf %313, %314 : vector<8x128xf32>
    %316 = vector.extract_strided_slice %315 {offsets = [0, 0], sizes = [8, 32], strides = [1, 1]} : vector<8x128xf32> to vector<8x32xf32>
    %317 = vector.extract_strided_slice %315 {offsets = [0, 32], sizes = [8, 32], strides = [1, 1]} : vector<8x128xf32> to vector<8x32xf32>
    %318 = vector.extract_strided_slice %310 {offsets = [0, 64], sizes = [8, 32], strides = [1, 1]} : vector<8x128xf32> to vector<8x32xf32>
    %319 = math.tanh %318 : vector<8x32xf32>
    %320 = vector.extract_strided_slice %315 {offsets = [0, 96], sizes = [8, 32], strides = [1, 1]} : vector<8x128xf32> to vector<8x32xf32>
    %321 = arith.mulf %317, %300 : vector<8x32xf32>
    %322 = arith.mulf %316, %319 : vector<8x32xf32>
    %323 = arith.addf %321, %322 : vector<8x32xf32>
    %324 = math.tanh %323 : vector<8x32xf32>
    %325 = arith.mulf %320, %324 : vector<8x32xf32>
    %326 = vector.broadcast %303 : vector<8x1xf32> to vector<8x32xf32>
    %327 = arith.mulf %326, %325 : vector<8x32xf32>
    %328 = arith.index_cast %c7_i32 : i32 to index
    %c0_96 = arith.constant 0 : index
    %c0_97 = arith.constant 0 : index
    %329 = vector.load %arg17[%328, %c0_96, %c0_97] : memref<8x8x32xf32, #tpu.memory_space<vmem>>, vector<1x8x32xf32>
    %330 = vector.shape_cast %329 : vector<1x8x32xf32> to vector<8x32xf32>
    %331 = vector.shape_cast %327 : vector<8x32xf32> to vector<1x8x32xf32>
    tpu.vector_store %arg17[%328, %c0_96, %c0_97], %331 {strides = array<i32>} : memref<8x8x32xf32, #tpu.memory_space<vmem>>, vector<1x8x32xf32>,
    %332 = arith.subf %325, %296 : vector<8x32xf32>
    %333 = vector.broadcast %303 : vector<8x1xf32> to vector<8x32xf32>
    %334 = arith.mulf %333, %332 : vector<8x32xf32>
    %335 = arith.addf %296, %334 : vector<8x32xf32>
    %336 = arith.subf %323, %300 : vector<8x32xf32>
    %337 = vector.broadcast %303 : vector<8x1xf32> to vector<8x32xf32>
    %338 = arith.mulf %337, %336 : vector<8x32xf32>
    %339 = arith.addf %300, %338 : vector<8x32xf32>
    %c8_i32 = arith.constant 8 : i32
    %c0_98 = arith.constant 0 : index
    %c0_99 = arith.constant 0 : index
    %c0_100 = arith.constant 0 : index
    %340 = vector.load %arg17[%c0_98, %c0_99, %c0_100] : memref<8x8x32xf32, #tpu.memory_space<vmem>>, vector<8x8x32xf32>
    %cst_101 = arith.constant 0.000000e+00 : f32
    %341 = vector.broadcast %cst_101 : f32 to vector<8x32xf32>
    %cst_102 = arith.constant -1.000000e+30 : f32
    %c0_i32_103 = arith.constant 0 : i32
    %342 = arith.index_cast %c0_i32_103 : i32 to index
    %c0_104 = arith.constant 0 : index
    %c0_105 = arith.constant 0 : index
    %343 = vector.load %arg20[%342, %c0_104, %c0_105] : memref<8x8x128xbf16, #tpu.memory_space<vmem>>, vector<1x8x128xbf16>
    %344 = vector.shape_cast %343 : vector<1x8x128xbf16> to vector<8x128xbf16>
    %345 = arith.truncf %341 : vector<8x32xf32> to vector<8x32xbf16>
    %cst_106 = arith.constant dense<0.000000e+00> : vector<8x128xf32>
    %346 = tpu.matmul %345, %1, %cst_106 {dimension_numbers = #tpu.dot_dimension_numbers<[1], [0], [0], [1], [0, 0, 1, 1], [], []>} : vector<8x32xbf16>, vector<32x128xbf16>, vector<8x128xf32> -> vector<8x128xf32>
    %347 = arith.extf %344 : vector<8x128xbf16> to vector<8x128xf32>
    %348 = arith.addf %347, %346 : vector<8x128xf32>
    %349 = arith.truncf %335 : vector<8x32xf32> to vector<8x32xbf16>
    %cst_107 = arith.constant dense<0.000000e+00> : vector<8x128xf32>
    %350 = tpu.matmul %349, %2, %cst_107 {dimension_numbers = #tpu.dot_dimension_numbers<[1], [0], [0], [1], [0, 0, 1, 1], [], []>} : vector<8x32xbf16>, vector<32x128xbf16>, vector<8x128xf32> -> vector<8x128xf32>
    %351 = arith.addf %348, %350 : vector<8x128xf32>
    %352 = arith.negf %351 : vector<8x128xf32>
    %353 = math.exp %352 : vector<8x128xf32>
    %cst_108 = arith.constant 1.000000e+00 : f32
    %354 = vector.broadcast %cst_108 : f32 to vector<8x128xf32>
    %355 = arith.addf %354, %353 : vector<8x128xf32>
    %356 = arith.divf %354, %355 : vector<8x128xf32>
    %357 = vector.extract_strided_slice %356 {offsets = [0, 0], sizes = [8, 32], strides = [1, 1]} : vector<8x128xf32> to vector<8x32xf32>
    %358 = vector.extract_strided_slice %356 {offsets = [0, 32], sizes = [8, 32], strides = [1, 1]} : vector<8x128xf32> to vector<8x32xf32>
    %359 = vector.extract_strided_slice %351 {offsets = [0, 64], sizes = [8, 32], strides = [1, 1]} : vector<8x128xf32> to vector<8x32xf32>
    %360 = math.tanh %359 : vector<8x32xf32>
    %361 = vector.extract_strided_slice %356 {offsets = [0, 96], sizes = [8, 32], strides = [1, 1]} : vector<8x128xf32> to vector<8x32xf32>
    %362 = arith.mulf %358, %339 : vector<8x32xf32>
    %363 = arith.mulf %357, %360 : vector<8x32xf32>
    %364 = arith.addf %362, %363 : vector<8x32xf32>
    %365 = math.tanh %364 : vector<8x32xf32>
    %366 = arith.mulf %361, %365 : vector<8x32xf32>
    %367 = arith.truncf %366 : vector<8x32xf32> to vector<8x32xbf16>
    %cst_109 = arith.constant dense<0.000000e+00> : vector<8x64xf32>
    %368 = tpu.matmul %367, %3, %cst_109 {dimension_numbers = #tpu.dot_dimension_numbers<[1], [0], [0], [1], [0, 0, 1, 1], [], []>} : vector<8x32xbf16>, vector<32x64xbf16>, vector<8x64xf32> -> vector<8x64xf32>
    %369 = vector.extract_strided_slice %368 {offsets = [0, 0], sizes = [8, 32], strides = [1, 1]} : vector<8x64xf32> to vector<8x32xf32>
    %370 = vector.extract_strided_slice %368 {offsets = [0, 32], sizes = [8, 32], strides = [1, 1]} : vector<8x64xf32> to vector<8x32xf32>
    %371 = vector.shape_cast %369 : vector<8x32xf32> to vector<1x8x32xf32>
    %372 = vector.broadcast %371 : vector<1x8x32xf32> to vector<8x8x32xf32>
    %373 = arith.mulf %340, %372 : vector<8x8x32xf32>
    %cst_110 = arith.constant dense<0.000000e+00> : vector<8x8xf32>
    %374 = vector.multi_reduction <add>, %373, %cst_110 [2] : vector<8x8x32xf32> to vector<8x8xf32>
    %cst_111 = arith.constant 5.000000e-01 : f32
    %375 = vector.broadcast %cst_111 : f32 to vector<8x8xf32>
    %376 = arith.cmpf ogt, %5, %375 : vector<8x8xf32>
    %377 = vector.broadcast %cst_102 : f32 to vector<8x8xf32>
    %378 = arith.select %376, %374, %377 : vector<8x8xi1>, vector<8x8xf32>
    %cst_112 = arith.constant dense<0xFF800000> : vector<8xf32>
    %379 = vector.multi_reduction <maximumf>, %378, %cst_112 [0] : vector<8x8xf32> to vector<8xf32>
    %380 = vector.shape_cast %379 : vector<8xf32> to vector<1x8xf32>
    %381 = vector.broadcast %380 : vector<1x8xf32> to vector<8x8xf32>
    %382 = arith.subf %378, %381 : vector<8x8xf32>
    %383 = math.exp %382 : vector<8x8xf32>
    %cst_113 = arith.constant dense<0.000000e+00> : vector<8xf32>
    %384 = vector.multi_reduction <add>, %383, %cst_113 [0] : vector<8x8xf32> to vector<8xf32>
    %385 = vector.shape_cast %384 : vector<8xf32> to vector<1x8xf32>
    %386 = tpu.reciprocal %385 {approx = true} : vector<1x8xf32> -> vector<1x8xf32>
    %387 = vector.broadcast %386 : vector<1x8xf32> to vector<8x8xf32>
    %388 = arith.mulf %383, %387 : vector<8x8xf32>
    %389 = vector.shape_cast %388 : vector<8x8xf32> to vector<8x8x1xf32>
    %390 = vector.broadcast %389 : vector<8x8x1xf32> to vector<8x8x32xf32>
    %391 = arith.mulf %390, %340 : vector<8x8x32xf32>
    %cst_114 = arith.constant dense<0.000000e+00> : vector<8x32xf32>
    %392 = vector.multi_reduction <add>, %391, %cst_114 [0] : vector<8x8x32xf32> to vector<8x32xf32>
    %393 = arith.truncf %392 : vector<8x32xf32> to vector<8x32xbf16>
    %cst_115 = arith.constant dense<0.000000e+00> : vector<8x32xf32>
    %394 = tpu.matmul %393, %4, %cst_115 {dimension_numbers = #tpu.dot_dimension_numbers<[1], [0], [0], [1], [0, 0, 1, 1], [], []>} : vector<8x32xbf16>, vector<32x32xbf16>, vector<8x32xf32> -> vector<8x32xf32>
    %395 = arith.addf %394, %370 : vector<8x32xf32>
    %396 = math.tanh %395 : vector<8x32xf32>
    %397 = arith.index_cast %c0_i32_103 : i32 to index
    %c0_116 = arith.constant 0 : index
    %c0_117 = arith.constant 0 : index
    %398 = vector.load %arg18[%397, %c0_116, %c0_117] : memref<8x8x32xf32, #tpu.memory_space<vmem>>, vector<1x8x32xf32>
    %399 = vector.shape_cast %398 : vector<1x8x32xf32> to vector<8x32xf32>
    %400 = vector.shape_cast %396 : vector<8x32xf32> to vector<1x8x32xf32>
    tpu.vector_store %arg18[%397, %c0_116, %c0_117], %400 {strides = array<i32>} : memref<8x8x32xf32, #tpu.memory_space<vmem>>, vector<1x8x32xf32>,
    %401 = tpu.transpose %388, [1, 0] : vector<8x8xf32> -> vector<8x8xf32>
    %402 = arith.index_cast %c0_i32_103 : i32 to index
    %c0_118 = arith.constant 0 : index
    %c0_119 = arith.constant 0 : index
    %403 = vector.load %arg16[%402, %c0_118, %c0_119] : memref<8x8x8xf32, #tpu.memory_space<vmem>>, vector<1x8x8xf32>
    %404 = vector.shape_cast %403 : vector<1x8x8xf32> to vector<8x8xf32>
    %405 = vector.shape_cast %401 : vector<8x8xf32> to vector<1x8x8xf32>
    tpu.vector_store %arg16[%402, %c0_118, %c0_119], %405 {strides = array<i32>} : memref<8x8x8xf32, #tpu.memory_space<vmem>>, vector<1x8x8xf32>,
    %c1_i32_120 = arith.constant 1 : i32
    %406 = arith.index_cast %c1_i32_120 : i32 to index
    %c0_121 = arith.constant 0 : index
    %c0_122 = arith.constant 0 : index
    %407 = vector.load %arg20[%406, %c0_121, %c0_122] : memref<8x8x128xbf16, #tpu.memory_space<vmem>>, vector<1x8x128xbf16>
    %408 = vector.shape_cast %407 : vector<1x8x128xbf16> to vector<8x128xbf16>
    %409 = arith.truncf %396 : vector<8x32xf32> to vector<8x32xbf16>
    %cst_123 = arith.constant dense<0.000000e+00> : vector<8x128xf32>
    %410 = tpu.matmul %409, %1, %cst_123 {dimension_numbers = #tpu.dot_dimension_numbers<[1], [0], [0], [1], [0, 0, 1, 1], [], []>} : vector<8x32xbf16>, vector<32x128xbf16>, vector<8x128xf32> -> vector<8x128xf32>
    %411 = arith.extf %408 : vector<8x128xbf16> to vector<8x128xf32>
    %412 = arith.addf %411, %410 : vector<8x128xf32>
    %413 = arith.truncf %366 : vector<8x32xf32> to vector<8x32xbf16>
    %cst_124 = arith.constant dense<0.000000e+00> : vector<8x128xf32>
    %414 = tpu.matmul %413, %2, %cst_124 {dimension_numbers = #tpu.dot_dimension_numbers<[1], [0], [0], [1], [0, 0, 1, 1], [], []>} : vector<8x32xbf16>, vector<32x128xbf16>, vector<8x128xf32> -> vector<8x128xf32>
    %415 = arith.addf %412, %414 : vector<8x128xf32>
    %416 = arith.negf %415 : vector<8x128xf32>
    %417 = math.exp %416 : vector<8x128xf32>
    %cst_125 = arith.constant 1.000000e+00 : f32
    %418 = vector.broadcast %cst_125 : f32 to vector<8x128xf32>
    %419 = arith.addf %418, %417 : vector<8x128xf32>
    %420 = arith.divf %418, %419 : vector<8x128xf32>
    %421 = vector.extract_strided_slice %420 {offsets = [0, 0], sizes = [8, 32], strides = [1, 1]} : vector<8x128xf32> to vector<8x32xf32>
    %422 = vector.extract_strided_slice %420 {offsets = [0, 32], sizes = [8, 32], strides = [1, 1]} : vector<8x128xf32> to vector<8x32xf32>
    %423 = vector.extract_strided_slice %415 {offsets = [0, 64], sizes = [8, 32], strides = [1, 1]} : vector<8x128xf32> to vector<8x32xf32>
    %424 = math.tanh %423 : vector<8x32xf32>
    %425 = vector.extract_strided_slice %420 {offsets = [0, 96], sizes = [8, 32], strides = [1, 1]} : vector<8x128xf32> to vector<8x32xf32>
    %426 = arith.mulf %422, %364 : vector<8x32xf32>
    %427 = arith.mulf %421, %424 : vector<8x32xf32>
    %428 = arith.addf %426, %427 : vector<8x32xf32>
    %429 = math.tanh %428 : vector<8x32xf32>
    %430 = arith.mulf %425, %429 : vector<8x32xf32>
    %431 = arith.truncf %430 : vector<8x32xf32> to vector<8x32xbf16>
    %cst_126 = arith.constant dense<0.000000e+00> : vector<8x64xf32>
    %432 = tpu.matmul %431, %3, %cst_126 {dimension_numbers = #tpu.dot_dimension_numbers<[1], [0], [0], [1], [0, 0, 1, 1], [], []>} : vector<8x32xbf16>, vector<32x64xbf16>, vector<8x64xf32> -> vector<8x64xf32>
    %433 = vector.extract_strided_slice %432 {offsets = [0, 0], sizes = [8, 32], strides = [1, 1]} : vector<8x64xf32> to vector<8x32xf32>
    %434 = vector.extract_strided_slice %432 {offsets = [0, 32], sizes = [8, 32], strides = [1, 1]} : vector<8x64xf32> to vector<8x32xf32>
    %435 = vector.shape_cast %433 : vector<8x32xf32> to vector<1x8x32xf32>
    %436 = vector.broadcast %435 : vector<1x8x32xf32> to vector<8x8x32xf32>
    %437 = arith.mulf %340, %436 : vector<8x8x32xf32>
    %cst_127 = arith.constant dense<0.000000e+00> : vector<8x8xf32>
    %438 = vector.multi_reduction <add>, %437, %cst_127 [2] : vector<8x8x32xf32> to vector<8x8xf32>
    %cst_128 = arith.constant 5.000000e-01 : f32
    %439 = vector.broadcast %cst_128 : f32 to vector<8x8xf32>
    %440 = arith.cmpf ogt, %5, %439 : vector<8x8xf32>
    %441 = vector.broadcast %cst_102 : f32 to vector<8x8xf32>
    %442 = arith.select %440, %438, %441 : vector<8x8xi1>, vector<8x8xf32>
    %cst_129 = arith.constant dense<0xFF800000> : vector<8xf32>
    %443 = vector.multi_reduction <maximumf>, %442, %cst_129 [0] : vector<8x8xf32> to vector<8xf32>
    %444 = vector.shape_cast %443 : vector<8xf32> to vector<1x8xf32>
    %445 = vector.broadcast %444 : vector<1x8xf32> to vector<8x8xf32>
    %446 = arith.subf %442, %445 : vector<8x8xf32>
    %447 = math.exp %446 : vector<8x8xf32>
    %cst_130 = arith.constant dense<0.000000e+00> : vector<8xf32>
    %448 = vector.multi_reduction <add>, %447, %cst_130 [0] : vector<8x8xf32> to vector<8xf32>
    %449 = vector.shape_cast %448 : vector<8xf32> to vector<1x8xf32>
    %450 = tpu.reciprocal %449 {approx = true} : vector<1x8xf32> -> vector<1x8xf32>
    %451 = vector.broadcast %450 : vector<1x8xf32> to vector<8x8xf32>
    %452 = arith.mulf %447, %451 : vector<8x8xf32>
    %453 = vector.shape_cast %452 : vector<8x8xf32> to vector<8x8x1xf32>
    %454 = vector.broadcast %453 : vector<8x8x1xf32> to vector<8x8x32xf32>
    %455 = arith.mulf %454, %340 : vector<8x8x32xf32>
    %cst_131 = arith.constant dense<0.000000e+00> : vector<8x32xf32>
    %456 = vector.multi_reduction <add>, %455, %cst_131 [0] : vector<8x8x32xf32> to vector<8x32xf32>
    %457 = arith.truncf %456 : vector<8x32xf32> to vector<8x32xbf16>
    %cst_132 = arith.constant dense<0.000000e+00> : vector<8x32xf32>
    %458 = tpu.matmul %457, %4, %cst_132 {dimension_numbers = #tpu.dot_dimension_numbers<[1], [0], [0], [1], [0, 0, 1, 1], [], []>} : vector<8x32xbf16>, vector<32x32xbf16>, vector<8x32xf32> -> vector<8x32xf32>
    %459 = arith.addf %458, %434 : vector<8x32xf32>
    %460 = math.tanh %459 : vector<8x32xf32>
    %461 = arith.index_cast %c1_i32_120 : i32 to index
    %c0_133 = arith.constant 0 : index
    %c0_134 = arith.constant 0 : index
    %462 = vector.load %arg18[%461, %c0_133, %c0_134] : memref<8x8x32xf32, #tpu.memory_space<vmem>>, vector<1x8x32xf32>
    %463 = vector.shape_cast %462 : vector<1x8x32xf32> to vector<8x32xf32>
    %464 = vector.shape_cast %460 : vector<8x32xf32> to vector<1x8x32xf32>
    tpu.vector_store %arg18[%461, %c0_133, %c0_134], %464 {strides = array<i32>} : memref<8x8x32xf32, #tpu.memory_space<vmem>>, vector<1x8x32xf32>,
    %465 = tpu.transpose %452, [1, 0] : vector<8x8xf32> -> vector<8x8xf32>
    %466 = arith.index_cast %c1_i32_120 : i32 to index
    %c0_135 = arith.constant 0 : index
    %c0_136 = arith.constant 0 : index
    %467 = vector.load %arg16[%466, %c0_135, %c0_136] : memref<8x8x8xf32, #tpu.memory_space<vmem>>, vector<1x8x8xf32>
    %468 = vector.shape_cast %467 : vector<1x8x8xf32> to vector<8x8xf32>
    %469 = vector.shape_cast %465 : vector<8x8xf32> to vector<1x8x8xf32>
    tpu.vector_store %arg16[%466, %c0_135, %c0_136], %469 {strides = array<i32>} : memref<8x8x8xf32, #tpu.memory_space<vmem>>, vector<1x8x8xf32>,
    %c2_i32_137 = arith.constant 2 : i32
    %470 = arith.index_cast %c2_i32_137 : i32 to index
    %c0_138 = arith.constant 0 : index
    %c0_139 = arith.constant 0 : index
    %471 = vector.load %arg20[%470, %c0_138, %c0_139] : memref<8x8x128xbf16, #tpu.memory_space<vmem>>, vector<1x8x128xbf16>
    %472 = vector.shape_cast %471 : vector<1x8x128xbf16> to vector<8x128xbf16>
    %473 = arith.truncf %460 : vector<8x32xf32> to vector<8x32xbf16>
    %cst_140 = arith.constant dense<0.000000e+00> : vector<8x128xf32>
    %474 = tpu.matmul %473, %1, %cst_140 {dimension_numbers = #tpu.dot_dimension_numbers<[1], [0], [0], [1], [0, 0, 1, 1], [], []>} : vector<8x32xbf16>, vector<32x128xbf16>, vector<8x128xf32> -> vector<8x128xf32>
    %475 = arith.extf %472 : vector<8x128xbf16> to vector<8x128xf32>
    %476 = arith.addf %475, %474 : vector<8x128xf32>
    %477 = arith.truncf %430 : vector<8x32xf32> to vector<8x32xbf16>
    %cst_141 = arith.constant dense<0.000000e+00> : vector<8x128xf32>
    %478 = tpu.matmul %477, %2, %cst_141 {dimension_numbers = #tpu.dot_dimension_numbers<[1], [0], [0], [1], [0, 0, 1, 1], [], []>} : vector<8x32xbf16>, vector<32x128xbf16>, vector<8x128xf32> -> vector<8x128xf32>
    %479 = arith.addf %476, %478 : vector<8x128xf32>
    %480 = arith.negf %479 : vector<8x128xf32>
    %481 = math.exp %480 : vector<8x128xf32>
    %cst_142 = arith.constant 1.000000e+00 : f32
    %482 = vector.broadcast %cst_142 : f32 to vector<8x128xf32>
    %483 = arith.addf %482, %481 : vector<8x128xf32>
    %484 = arith.divf %482, %483 : vector<8x128xf32>
    %485 = vector.extract_strided_slice %484 {offsets = [0, 0], sizes = [8, 32], strides = [1, 1]} : vector<8x128xf32> to vector<8x32xf32>
    %486 = vector.extract_strided_slice %484 {offsets = [0, 32], sizes = [8, 32], strides = [1, 1]} : vector<8x128xf32> to vector<8x32xf32>
    %487 = vector.extract_strided_slice %479 {offsets = [0, 64], sizes = [8, 32], strides = [1, 1]} : vector<8x128xf32> to vector<8x32xf32>
    %488 = math.tanh %487 : vector<8x32xf32>
    %489 = vector.extract_strided_slice %484 {offsets = [0, 96], sizes = [8, 32], strides = [1, 1]} : vector<8x128xf32> to vector<8x32xf32>
    %490 = arith.mulf %486, %428 : vector<8x32xf32>
    %491 = arith.mulf %485, %488 : vector<8x32xf32>
    %492 = arith.addf %490, %491 : vector<8x32xf32>
    %493 = math.tanh %492 : vector<8x32xf32>
    %494 = arith.mulf %489, %493 : vector<8x32xf32>
    %495 = arith.truncf %494 : vector<8x32xf32> to vector<8x32xbf16>
    %cst_143 = arith.constant dense<0.000000e+00> : vector<8x64xf32>
    %496 = tpu.matmul %495, %3, %cst_143 {dimension_numbers = #tpu.dot_dimension_numbers<[1], [0], [0], [1], [0, 0, 1, 1], [], []>} : vector<8x32xbf16>, vector<32x64xbf16>, vector<8x64xf32> -> vector<8x64xf32>
    %497 = vector.extract_strided_slice %496 {offsets = [0, 0], sizes = [8, 32], strides = [1, 1]} : vector<8x64xf32> to vector<8x32xf32>
    %498 = vector.extract_strided_slice %496 {offsets = [0, 32], sizes = [8, 32], strides = [1, 1]} : vector<8x64xf32> to vector<8x32xf32>
    %499 = vector.shape_cast %497 : vector<8x32xf32> to vector<1x8x32xf32>
    %500 = vector.broadcast %499 : vector<1x8x32xf32> to vector<8x8x32xf32>
    %501 = arith.mulf %340, %500 : vector<8x8x32xf32>
    %cst_144 = arith.constant dense<0.000000e+00> : vector<8x8xf32>
    %502 = vector.multi_reduction <add>, %501, %cst_144 [2] : vector<8x8x32xf32> to vector<8x8xf32>
    %cst_145 = arith.constant 5.000000e-01 : f32
    %503 = vector.broadcast %cst_145 : f32 to vector<8x8xf32>
    %504 = arith.cmpf ogt, %5, %503 : vector<8x8xf32>
    %505 = vector.broadcast %cst_102 : f32 to vector<8x8xf32>
    %506 = arith.select %504, %502, %505 : vector<8x8xi1>, vector<8x8xf32>
    %cst_146 = arith.constant dense<0xFF800000> : vector<8xf32>
    %507 = vector.multi_reduction <maximumf>, %506, %cst_146 [0] : vector<8x8xf32> to vector<8xf32>
    %508 = vector.shape_cast %507 : vector<8xf32> to vector<1x8xf32>
    %509 = vector.broadcast %508 : vector<1x8xf32> to vector<8x8xf32>
    %510 = arith.subf %506, %509 : vector<8x8xf32>
    %511 = math.exp %510 : vector<8x8xf32>
    %cst_147 = arith.constant dense<0.000000e+00> : vector<8xf32>
    %512 = vector.multi_reduction <add>, %511, %cst_147 [0] : vector<8x8xf32> to vector<8xf32>
    %513 = vector.shape_cast %512 : vector<8xf32> to vector<1x8xf32>
    %514 = tpu.reciprocal %513 {approx = true} : vector<1x8xf32> -> vector<1x8xf32>
    %515 = vector.broadcast %514 : vector<1x8xf32> to vector<8x8xf32>
    %516 = arith.mulf %511, %515 : vector<8x8xf32>
    %517 = vector.shape_cast %516 : vector<8x8xf32> to vector<8x8x1xf32>
    %518 = vector.broadcast %517 : vector<8x8x1xf32> to vector<8x8x32xf32>
    %519 = arith.mulf %518, %340 : vector<8x8x32xf32>
    %cst_148 = arith.constant dense<0.000000e+00> : vector<8x32xf32>
    %520 = vector.multi_reduction <add>, %519, %cst_148 [0] : vector<8x8x32xf32> to vector<8x32xf32>
    %521 = arith.truncf %520 : vector<8x32xf32> to vector<8x32xbf16>
    %cst_149 = arith.constant dense<0.000000e+00> : vector<8x32xf32>
    %522 = tpu.matmul %521, %4, %cst_149 {dimension_numbers = #tpu.dot_dimension_numbers<[1], [0], [0], [1], [0, 0, 1, 1], [], []>} : vector<8x32xbf16>, vector<32x32xbf16>, vector<8x32xf32> -> vector<8x32xf32>
    %523 = arith.addf %522, %498 : vector<8x32xf32>
    %524 = math.tanh %523 : vector<8x32xf32>
    %525 = arith.index_cast %c2_i32_137 : i32 to index
    %c0_150 = arith.constant 0 : index
    %c0_151 = arith.constant 0 : index
    %526 = vector.load %arg18[%525, %c0_150, %c0_151] : memref<8x8x32xf32, #tpu.memory_space<vmem>>, vector<1x8x32xf32>
    %527 = vector.shape_cast %526 : vector<1x8x32xf32> to vector<8x32xf32>
    %528 = vector.shape_cast %524 : vector<8x32xf32> to vector<1x8x32xf32>
    tpu.vector_store %arg18[%525, %c0_150, %c0_151], %528 {strides = array<i32>} : memref<8x8x32xf32, #tpu.memory_space<vmem>>, vector<1x8x32xf32>,
    %529 = tpu.transpose %516, [1, 0] : vector<8x8xf32> -> vector<8x8xf32>
    %530 = arith.index_cast %c2_i32_137 : i32 to index
    %c0_152 = arith.constant 0 : index
    %c0_153 = arith.constant 0 : index
    %531 = vector.load %arg16[%530, %c0_152, %c0_153] : memref<8x8x8xf32, #tpu.memory_space<vmem>>, vector<1x8x8xf32>
    %532 = vector.shape_cast %531 : vector<1x8x8xf32> to vector<8x8xf32>
    %533 = vector.shape_cast %529 : vector<8x8xf32> to vector<1x8x8xf32>
    tpu.vector_store %arg16[%530, %c0_152, %c0_153], %533 {strides = array<i32>} : memref<8x8x8xf32, #tpu.memory_space<vmem>>, vector<1x8x8xf32>,
    %c3_i32_154 = arith.constant 3 : i32
    %534 = arith.index_cast %c3_i32_154 : i32 to index
    %c0_155 = arith.constant 0 : index
    %c0_156 = arith.constant 0 : index
    %535 = vector.load %arg20[%534, %c0_155, %c0_156] : memref<8x8x128xbf16, #tpu.memory_space<vmem>>, vector<1x8x128xbf16>
    %536 = vector.shape_cast %535 : vector<1x8x128xbf16> to vector<8x128xbf16>
    %537 = arith.truncf %524 : vector<8x32xf32> to vector<8x32xbf16>
    %cst_157 = arith.constant dense<0.000000e+00> : vector<8x128xf32>
    %538 = tpu.matmul %537, %1, %cst_157 {dimension_numbers = #tpu.dot_dimension_numbers<[1], [0], [0], [1], [0, 0, 1, 1], [], []>} : vector<8x32xbf16>, vector<32x128xbf16>, vector<8x128xf32> -> vector<8x128xf32>
    %539 = arith.extf %536 : vector<8x128xbf16> to vector<8x128xf32>
    %540 = arith.addf %539, %538 : vector<8x128xf32>
    %541 = arith.truncf %494 : vector<8x32xf32> to vector<8x32xbf16>
    %cst_158 = arith.constant dense<0.000000e+00> : vector<8x128xf32>
    %542 = tpu.matmul %541, %2, %cst_158 {dimension_numbers = #tpu.dot_dimension_numbers<[1], [0], [0], [1], [0, 0, 1, 1], [], []>} : vector<8x32xbf16>, vector<32x128xbf16>, vector<8x128xf32> -> vector<8x128xf32>
    %543 = arith.addf %540, %542 : vector<8x128xf32>
    %544 = arith.negf %543 : vector<8x128xf32>
    %545 = math.exp %544 : vector<8x128xf32>
    %cst_159 = arith.constant 1.000000e+00 : f32
    %546 = vector.broadcast %cst_159 : f32 to vector<8x128xf32>
    %547 = arith.addf %546, %545 : vector<8x128xf32>
    %548 = arith.divf %546, %547 : vector<8x128xf32>
    %549 = vector.extract_strided_slice %548 {offsets = [0, 0], sizes = [8, 32], strides = [1, 1]} : vector<8x128xf32> to vector<8x32xf32>
    %550 = vector.extract_strided_slice %548 {offsets = [0, 32], sizes = [8, 32], strides = [1, 1]} : vector<8x128xf32> to vector<8x32xf32>
    %551 = vector.extract_strided_slice %543 {offsets = [0, 64], sizes = [8, 32], strides = [1, 1]} : vector<8x128xf32> to vector<8x32xf32>
    %552 = math.tanh %551 : vector<8x32xf32>
    %553 = vector.extract_strided_slice %548 {offsets = [0, 96], sizes = [8, 32], strides = [1, 1]} : vector<8x128xf32> to vector<8x32xf32>
    %554 = arith.mulf %550, %492 : vector<8x32xf32>
    %555 = arith.mulf %549, %552 : vector<8x32xf32>
    %556 = arith.addf %554, %555 : vector<8x32xf32>
    %557 = math.tanh %556 : vector<8x32xf32>
    %558 = arith.mulf %553, %557 : vector<8x32xf32>
    %559 = arith.truncf %558 : vector<8x32xf32> to vector<8x32xbf16>
    %cst_160 = arith.constant dense<0.000000e+00> : vector<8x64xf32>
    %560 = tpu.matmul %559, %3, %cst_160 {dimension_numbers = #tpu.dot_dimension_numbers<[1], [0], [0], [1], [0, 0, 1, 1], [], []>} : vector<8x32xbf16>, vector<32x64xbf16>, vector<8x64xf32> -> vector<8x64xf32>
    %561 = vector.extract_strided_slice %560 {offsets = [0, 0], sizes = [8, 32], strides = [1, 1]} : vector<8x64xf32> to vector<8x32xf32>
    %562 = vector.extract_strided_slice %560 {offsets = [0, 32], sizes = [8, 32], strides = [1, 1]} : vector<8x64xf32> to vector<8x32xf32>
    %563 = vector.shape_cast %561 : vector<8x32xf32> to vector<1x8x32xf32>
    %564 = vector.broadcast %563 : vector<1x8x32xf32> to vector<8x8x32xf32>
    %565 = arith.mulf %340, %564 : vector<8x8x32xf32>
    %cst_161 = arith.constant dense<0.000000e+00> : vector<8x8xf32>
    %566 = vector.multi_reduction <add>, %565, %cst_161 [2] : vector<8x8x32xf32> to vector<8x8xf32>
    %cst_162 = arith.constant 5.000000e-01 : f32
    %567 = vector.broadcast %cst_162 : f32 to vector<8x8xf32>
    %568 = arith.cmpf ogt, %5, %567 : vector<8x8xf32>
    %569 = vector.broadcast %cst_102 : f32 to vector<8x8xf32>
    %570 = arith.select %568, %566, %569 : vector<8x8xi1>, vector<8x8xf32>
    %cst_163 = arith.constant dense<0xFF800000> : vector<8xf32>
    %571 = vector.multi_reduction <maximumf>, %570, %cst_163 [0] : vector<8x8xf32> to vector<8xf32>
    %572 = vector.shape_cast %571 : vector<8xf32> to vector<1x8xf32>
    %573 = vector.broadcast %572 : vector<1x8xf32> to vector<8x8xf32>
    %574 = arith.subf %570, %573 : vector<8x8xf32>
    %575 = math.exp %574 : vector<8x8xf32>
    %cst_164 = arith.constant dense<0.000000e+00> : vector<8xf32>
    %576 = vector.multi_reduction <add>, %575, %cst_164 [0] : vector<8x8xf32> to vector<8xf32>
    %577 = vector.shape_cast %576 : vector<8xf32> to vector<1x8xf32>
    %578 = tpu.reciprocal %577 {approx = true} : vector<1x8xf32> -> vector<1x8xf32>
    %579 = vector.broadcast %578 : vector<1x8xf32> to vector<8x8xf32>
    %580 = arith.mulf %575, %579 : vector<8x8xf32>
    %581 = vector.shape_cast %580 : vector<8x8xf32> to vector<8x8x1xf32>
    %582 = vector.broadcast %581 : vector<8x8x1xf32> to vector<8x8x32xf32>
    %583 = arith.mulf %582, %340 : vector<8x8x32xf32>
    %cst_165 = arith.constant dense<0.000000e+00> : vector<8x32xf32>
    %584 = vector.multi_reduction <add>, %583, %cst_165 [0] : vector<8x8x32xf32> to vector<8x32xf32>
    %585 = arith.truncf %584 : vector<8x32xf32> to vector<8x32xbf16>
    %cst_166 = arith.constant dense<0.000000e+00> : vector<8x32xf32>
    %586 = tpu.matmul %585, %4, %cst_166 {dimension_numbers = #tpu.dot_dimension_numbers<[1], [0], [0], [1], [0, 0, 1, 1], [], []>} : vector<8x32xbf16>, vector<32x32xbf16>, vector<8x32xf32> -> vector<8x32xf32>
    %587 = arith.addf %586, %562 : vector<8x32xf32>
    %588 = math.tanh %587 : vector<8x32xf32>
    %589 = arith.index_cast %c3_i32_154 : i32 to index
    %c0_167 = arith.constant 0 : index
    %c0_168 = arith.constant 0 : index
    %590 = vector.load %arg18[%589, %c0_167, %c0_168] : memref<8x8x32xf32, #tpu.memory_space<vmem>>, vector<1x8x32xf32>
    %591 = vector.shape_cast %590 : vector<1x8x32xf32> to vector<8x32xf32>
    %592 = vector.shape_cast %588 : vector<8x32xf32> to vector<1x8x32xf32>
    tpu.vector_store %arg18[%589, %c0_167, %c0_168], %592 {strides = array<i32>} : memref<8x8x32xf32, #tpu.memory_space<vmem>>, vector<1x8x32xf32>,
    %593 = tpu.transpose %580, [1, 0] : vector<8x8xf32> -> vector<8x8xf32>
    %594 = arith.index_cast %c3_i32_154 : i32 to index
    %c0_169 = arith.constant 0 : index
    %c0_170 = arith.constant 0 : index
    %595 = vector.load %arg16[%594, %c0_169, %c0_170] : memref<8x8x8xf32, #tpu.memory_space<vmem>>, vector<1x8x8xf32>
    %596 = vector.shape_cast %595 : vector<1x8x8xf32> to vector<8x8xf32>
    %597 = vector.shape_cast %593 : vector<8x8xf32> to vector<1x8x8xf32>
    tpu.vector_store %arg16[%594, %c0_169, %c0_170], %597 {strides = array<i32>} : memref<8x8x8xf32, #tpu.memory_space<vmem>>, vector<1x8x8xf32>,
    %c4_i32_171 = arith.constant 4 : i32
    %598 = arith.index_cast %c4_i32_171 : i32 to index
    %c0_172 = arith.constant 0 : index
    %c0_173 = arith.constant 0 : index
    %599 = vector.load %arg20[%598, %c0_172, %c0_173] : memref<8x8x128xbf16, #tpu.memory_space<vmem>>, vector<1x8x128xbf16>
    %600 = vector.shape_cast %599 : vector<1x8x128xbf16> to vector<8x128xbf16>
    %601 = arith.truncf %588 : vector<8x32xf32> to vector<8x32xbf16>
    %cst_174 = arith.constant dense<0.000000e+00> : vector<8x128xf32>
    %602 = tpu.matmul %601, %1, %cst_174 {dimension_numbers = #tpu.dot_dimension_numbers<[1], [0], [0], [1], [0, 0, 1, 1], [], []>} : vector<8x32xbf16>, vector<32x128xbf16>, vector<8x128xf32> -> vector<8x128xf32>
    %603 = arith.extf %600 : vector<8x128xbf16> to vector<8x128xf32>
    %604 = arith.addf %603, %602 : vector<8x128xf32>
    %605 = arith.truncf %558 : vector<8x32xf32> to vector<8x32xbf16>
    %cst_175 = arith.constant dense<0.000000e+00> : vector<8x128xf32>
    %606 = tpu.matmul %605, %2, %cst_175 {dimension_numbers = #tpu.dot_dimension_numbers<[1], [0], [0], [1], [0, 0, 1, 1], [], []>} : vector<8x32xbf16>, vector<32x128xbf16>, vector<8x128xf32> -> vector<8x128xf32>
    %607 = arith.addf %604, %606 : vector<8x128xf32>
    %608 = arith.negf %607 : vector<8x128xf32>
    %609 = math.exp %608 : vector<8x128xf32>
    %cst_176 = arith.constant 1.000000e+00 : f32
    %610 = vector.broadcast %cst_176 : f32 to vector<8x128xf32>
    %611 = arith.addf %610, %609 : vector<8x128xf32>
    %612 = arith.divf %610, %611 : vector<8x128xf32>
    %613 = vector.extract_strided_slice %612 {offsets = [0, 0], sizes = [8, 32], strides = [1, 1]} : vector<8x128xf32> to vector<8x32xf32>
    %614 = vector.extract_strided_slice %612 {offsets = [0, 32], sizes = [8, 32], strides = [1, 1]} : vector<8x128xf32> to vector<8x32xf32>
    %615 = vector.extract_strided_slice %607 {offsets = [0, 64], sizes = [8, 32], strides = [1, 1]} : vector<8x128xf32> to vector<8x32xf32>
    %616 = math.tanh %615 : vector<8x32xf32>
    %617 = vector.extract_strided_slice %612 {offsets = [0, 96], sizes = [8, 32], strides = [1, 1]} : vector<8x128xf32> to vector<8x32xf32>
    %618 = arith.mulf %614, %556 : vector<8x32xf32>
    %619 = arith.mulf %613, %616 : vector<8x32xf32>
    %620 = arith.addf %618, %619 : vector<8x32xf32>
    %621 = math.tanh %620 : vector<8x32xf32>
    %622 = arith.mulf %617, %621 : vector<8x32xf32>
    %623 = arith.truncf %622 : vector<8x32xf32> to vector<8x32xbf16>
    %cst_177 = arith.constant dense<0.000000e+00> : vector<8x64xf32>
    %624 = tpu.matmul %623, %3, %cst_177 {dimension_numbers = #tpu.dot_dimension_numbers<[1], [0], [0], [1], [0, 0, 1, 1], [], []>} : vector<8x32xbf16>, vector<32x64xbf16>, vector<8x64xf32> -> vector<8x64xf32>
    %625 = vector.extract_strided_slice %624 {offsets = [0, 0], sizes = [8, 32], strides = [1, 1]} : vector<8x64xf32> to vector<8x32xf32>
    %626 = vector.extract_strided_slice %624 {offsets = [0, 32], sizes = [8, 32], strides = [1, 1]} : vector<8x64xf32> to vector<8x32xf32>
    %627 = vector.shape_cast %625 : vector<8x32xf32> to vector<1x8x32xf32>
    %628 = vector.broadcast %627 : vector<1x8x32xf32> to vector<8x8x32xf32>
    %629 = arith.mulf %340, %628 : vector<8x8x32xf32>
    %cst_178 = arith.constant dense<0.000000e+00> : vector<8x8xf32>
    %630 = vector.multi_reduction <add>, %629, %cst_178 [2] : vector<8x8x32xf32> to vector<8x8xf32>
    %cst_179 = arith.constant 5.000000e-01 : f32
    %631 = vector.broadcast %cst_179 : f32 to vector<8x8xf32>
    %632 = arith.cmpf ogt, %5, %631 : vector<8x8xf32>
    %633 = vector.broadcast %cst_102 : f32 to vector<8x8xf32>
    %634 = arith.select %632, %630, %633 : vector<8x8xi1>, vector<8x8xf32>
    %cst_180 = arith.constant dense<0xFF800000> : vector<8xf32>
    %635 = vector.multi_reduction <maximumf>, %634, %cst_180 [0] : vector<8x8xf32> to vector<8xf32>
    %636 = vector.shape_cast %635 : vector<8xf32> to vector<1x8xf32>
    %637 = vector.broadcast %636 : vector<1x8xf32> to vector<8x8xf32>
    %638 = arith.subf %634, %637 : vector<8x8xf32>
    %639 = math.exp %638 : vector<8x8xf32>
    %cst_181 = arith.constant dense<0.000000e+00> : vector<8xf32>
    %640 = vector.multi_reduction <add>, %639, %cst_181 [0] : vector<8x8xf32> to vector<8xf32>
    %641 = vector.shape_cast %640 : vector<8xf32> to vector<1x8xf32>
    %642 = tpu.reciprocal %641 {approx = true} : vector<1x8xf32> -> vector<1x8xf32>
    %643 = vector.broadcast %642 : vector<1x8xf32> to vector<8x8xf32>
    %644 = arith.mulf %639, %643 : vector<8x8xf32>
    %645 = vector.shape_cast %644 : vector<8x8xf32> to vector<8x8x1xf32>
    %646 = vector.broadcast %645 : vector<8x8x1xf32> to vector<8x8x32xf32>
    %647 = arith.mulf %646, %340 : vector<8x8x32xf32>
    %cst_182 = arith.constant dense<0.000000e+00> : vector<8x32xf32>
    %648 = vector.multi_reduction <add>, %647, %cst_182 [0] : vector<8x8x32xf32> to vector<8x32xf32>
    %649 = arith.truncf %648 : vector<8x32xf32> to vector<8x32xbf16>
    %cst_183 = arith.constant dense<0.000000e+00> : vector<8x32xf32>
    %650 = tpu.matmul %649, %4, %cst_183 {dimension_numbers = #tpu.dot_dimension_numbers<[1], [0], [0], [1], [0, 0, 1, 1], [], []>} : vector<8x32xbf16>, vector<32x32xbf16>, vector<8x32xf32> -> vector<8x32xf32>
    %651 = arith.addf %650, %626 : vector<8x32xf32>
    %652 = math.tanh %651 : vector<8x32xf32>
    %653 = arith.index_cast %c4_i32_171 : i32 to index
    %c0_184 = arith.constant 0 : index
    %c0_185 = arith.constant 0 : index
    %654 = vector.load %arg18[%653, %c0_184, %c0_185] : memref<8x8x32xf32, #tpu.memory_space<vmem>>, vector<1x8x32xf32>
    %655 = vector.shape_cast %654 : vector<1x8x32xf32> to vector<8x32xf32>
    %656 = vector.shape_cast %652 : vector<8x32xf32> to vector<1x8x32xf32>
    tpu.vector_store %arg18[%653, %c0_184, %c0_185], %656 {strides = array<i32>} : memref<8x8x32xf32, #tpu.memory_space<vmem>>, vector<1x8x32xf32>,
    %657 = tpu.transpose %644, [1, 0] : vector<8x8xf32> -> vector<8x8xf32>
    %658 = arith.index_cast %c4_i32_171 : i32 to index
    %c0_186 = arith.constant 0 : index
    %c0_187 = arith.constant 0 : index
    %659 = vector.load %arg16[%658, %c0_186, %c0_187] : memref<8x8x8xf32, #tpu.memory_space<vmem>>, vector<1x8x8xf32>
    %660 = vector.shape_cast %659 : vector<1x8x8xf32> to vector<8x8xf32>
    %661 = vector.shape_cast %657 : vector<8x8xf32> to vector<1x8x8xf32>
    tpu.vector_store %arg16[%658, %c0_186, %c0_187], %661 {strides = array<i32>} : memref<8x8x8xf32, #tpu.memory_space<vmem>>, vector<1x8x8xf32>,
    %c5_i32_188 = arith.constant 5 : i32
    %662 = arith.index_cast %c5_i32_188 : i32 to index
    %c0_189 = arith.constant 0 : index
    %c0_190 = arith.constant 0 : index
    %663 = vector.load %arg20[%662, %c0_189, %c0_190] : memref<8x8x128xbf16, #tpu.memory_space<vmem>>, vector<1x8x128xbf16>
    %664 = vector.shape_cast %663 : vector<1x8x128xbf16> to vector<8x128xbf16>
    %665 = arith.truncf %652 : vector<8x32xf32> to vector<8x32xbf16>
    %cst_191 = arith.constant dense<0.000000e+00> : vector<8x128xf32>
    %666 = tpu.matmul %665, %1, %cst_191 {dimension_numbers = #tpu.dot_dimension_numbers<[1], [0], [0], [1], [0, 0, 1, 1], [], []>} : vector<8x32xbf16>, vector<32x128xbf16>, vector<8x128xf32> -> vector<8x128xf32>
    %667 = arith.extf %664 : vector<8x128xbf16> to vector<8x128xf32>
    %668 = arith.addf %667, %666 : vector<8x128xf32>
    %669 = arith.truncf %622 : vector<8x32xf32> to vector<8x32xbf16>
    %cst_192 = arith.constant dense<0.000000e+00> : vector<8x128xf32>
    %670 = tpu.matmul %669, %2, %cst_192 {dimension_numbers = #tpu.dot_dimension_numbers<[1], [0], [0], [1], [0, 0, 1, 1], [], []>} : vector<8x32xbf16>, vector<32x128xbf16>, vector<8x128xf32> -> vector<8x128xf32>
    %671 = arith.addf %668, %670 : vector<8x128xf32>
    %672 = arith.negf %671 : vector<8x128xf32>
    %673 = math.exp %672 : vector<8x128xf32>
    %cst_193 = arith.constant 1.000000e+00 : f32
    %674 = vector.broadcast %cst_193 : f32 to vector<8x128xf32>
    %675 = arith.addf %674, %673 : vector<8x128xf32>
    %676 = arith.divf %674, %675 : vector<8x128xf32>
    %677 = vector.extract_strided_slice %676 {offsets = [0, 0], sizes = [8, 32], strides = [1, 1]} : vector<8x128xf32> to vector<8x32xf32>
    %678 = vector.extract_strided_slice %676 {offsets = [0, 32], sizes = [8, 32], strides = [1, 1]} : vector<8x128xf32> to vector<8x32xf32>
    %679 = vector.extract_strided_slice %671 {offsets = [0, 64], sizes = [8, 32], strides = [1, 1]} : vector<8x128xf32> to vector<8x32xf32>
    %680 = math.tanh %679 : vector<8x32xf32>
    %681 = vector.extract_strided_slice %676 {offsets = [0, 96], sizes = [8, 32], strides = [1, 1]} : vector<8x128xf32> to vector<8x32xf32>
    %682 = arith.mulf %678, %620 : vector<8x32xf32>
    %683 = arith.mulf %677, %680 : vector<8x32xf32>
    %684 = arith.addf %682, %683 : vector<8x32xf32>
    %685 = math.tanh %684 : vector<8x32xf32>
    %686 = arith.mulf %681, %685 : vector<8x32xf32>
    %687 = arith.truncf %686 : vector<8x32xf32> to vector<8x32xbf16>
    %cst_194 = arith.constant dense<0.000000e+00> : vector<8x64xf32>
    %688 = tpu.matmul %687, %3, %cst_194 {dimension_numbers = #tpu.dot_dimension_numbers<[1], [0], [0], [1], [0, 0, 1, 1], [], []>} : vector<8x32xbf16>, vector<32x64xbf16>, vector<8x64xf32> -> vector<8x64xf32>
    %689 = vector.extract_strided_slice %688 {offsets = [0, 0], sizes = [8, 32], strides = [1, 1]} : vector<8x64xf32> to vector<8x32xf32>
    %690 = vector.extract_strided_slice %688 {offsets = [0, 32], sizes = [8, 32], strides = [1, 1]} : vector<8x64xf32> to vector<8x32xf32>
    %691 = vector.shape_cast %689 : vector<8x32xf32> to vector<1x8x32xf32>
    %692 = vector.broadcast %691 : vector<1x8x32xf32> to vector<8x8x32xf32>
    %693 = arith.mulf %340, %692 : vector<8x8x32xf32>
    %cst_195 = arith.constant dense<0.000000e+00> : vector<8x8xf32>
    %694 = vector.multi_reduction <add>, %693, %cst_195 [2] : vector<8x8x32xf32> to vector<8x8xf32>
    %cst_196 = arith.constant 5.000000e-01 : f32
    %695 = vector.broadcast %cst_196 : f32 to vector<8x8xf32>
    %696 = arith.cmpf ogt, %5, %695 : vector<8x8xf32>
    %697 = vector.broadcast %cst_102 : f32 to vector<8x8xf32>
    %698 = arith.select %696, %694, %697 : vector<8x8xi1>, vector<8x8xf32>
    %cst_197 = arith.constant dense<0xFF800000> : vector<8xf32>
    %699 = vector.multi_reduction <maximumf>, %698, %cst_197 [0] : vector<8x8xf32> to vector<8xf32>
    %700 = vector.shape_cast %699 : vector<8xf32> to vector<1x8xf32>
    %701 = vector.broadcast %700 : vector<1x8xf32> to vector<8x8xf32>
    %702 = arith.subf %698, %701 : vector<8x8xf32>
    %703 = math.exp %702 : vector<8x8xf32>
    %cst_198 = arith.constant dense<0.000000e+00> : vector<8xf32>
    %704 = vector.multi_reduction <add>, %703, %cst_198 [0] : vector<8x8xf32> to vector<8xf32>
    %705 = vector.shape_cast %704 : vector<8xf32> to vector<1x8xf32>
    %706 = tpu.reciprocal %705 {approx = true} : vector<1x8xf32> -> vector<1x8xf32>
    %707 = vector.broadcast %706 : vector<1x8xf32> to vector<8x8xf32>
    %708 = arith.mulf %703, %707 : vector<8x8xf32>
    %709 = vector.shape_cast %708 : vector<8x8xf32> to vector<8x8x1xf32>
    %710 = vector.broadcast %709 : vector<8x8x1xf32> to vector<8x8x32xf32>
    %711 = arith.mulf %710, %340 : vector<8x8x32xf32>
    %cst_199 = arith.constant dense<0.000000e+00> : vector<8x32xf32>
    %712 = vector.multi_reduction <add>, %711, %cst_199 [0] : vector<8x8x32xf32> to vector<8x32xf32>
    %713 = arith.truncf %712 : vector<8x32xf32> to vector<8x32xbf16>
    %cst_200 = arith.constant dense<0.000000e+00> : vector<8x32xf32>
    %714 = tpu.matmul %713, %4, %cst_200 {dimension_numbers = #tpu.dot_dimension_numbers<[1], [0], [0], [1], [0, 0, 1, 1], [], []>} : vector<8x32xbf16>, vector<32x32xbf16>, vector<8x32xf32> -> vector<8x32xf32>
    %715 = arith.addf %714, %690 : vector<8x32xf32>
    %716 = math.tanh %715 : vector<8x32xf32>
    %717 = arith.index_cast %c5_i32_188 : i32 to index
    %c0_201 = arith.constant 0 : index
    %c0_202 = arith.constant 0 : index
    %718 = vector.load %arg18[%717, %c0_201, %c0_202] : memref<8x8x32xf32, #tpu.memory_space<vmem>>, vector<1x8x32xf32>
    %719 = vector.shape_cast %718 : vector<1x8x32xf32> to vector<8x32xf32>
    %720 = vector.shape_cast %716 : vector<8x32xf32> to vector<1x8x32xf32>
    tpu.vector_store %arg18[%717, %c0_201, %c0_202], %720 {strides = array<i32>} : memref<8x8x32xf32, #tpu.memory_space<vmem>>, vector<1x8x32xf32>,
    %721 = tpu.transpose %708, [1, 0] : vector<8x8xf32> -> vector<8x8xf32>
    %722 = arith.index_cast %c5_i32_188 : i32 to index
    %c0_203 = arith.constant 0 : index
    %c0_204 = arith.constant 0 : index
    %723 = vector.load %arg16[%722, %c0_203, %c0_204] : memref<8x8x8xf32, #tpu.memory_space<vmem>>, vector<1x8x8xf32>
    %724 = vector.shape_cast %723 : vector<1x8x8xf32> to vector<8x8xf32>
    %725 = vector.shape_cast %721 : vector<8x8xf32> to vector<1x8x8xf32>
    tpu.vector_store %arg16[%722, %c0_203, %c0_204], %725 {strides = array<i32>} : memref<8x8x8xf32, #tpu.memory_space<vmem>>, vector<1x8x8xf32>,
    %c6_i32_205 = arith.constant 6 : i32
    %726 = arith.index_cast %c6_i32_205 : i32 to index
    %c0_206 = arith.constant 0 : index
    %c0_207 = arith.constant 0 : index
    %727 = vector.load %arg20[%726, %c0_206, %c0_207] : memref<8x8x128xbf16, #tpu.memory_space<vmem>>, vector<1x8x128xbf16>
    %728 = vector.shape_cast %727 : vector<1x8x128xbf16> to vector<8x128xbf16>
    %729 = arith.truncf %716 : vector<8x32xf32> to vector<8x32xbf16>
    %cst_208 = arith.constant dense<0.000000e+00> : vector<8x128xf32>
    %730 = tpu.matmul %729, %1, %cst_208 {dimension_numbers = #tpu.dot_dimension_numbers<[1], [0], [0], [1], [0, 0, 1, 1], [], []>} : vector<8x32xbf16>, vector<32x128xbf16>, vector<8x128xf32> -> vector<8x128xf32>
    %731 = arith.extf %728 : vector<8x128xbf16> to vector<8x128xf32>
    %732 = arith.addf %731, %730 : vector<8x128xf32>
    %733 = arith.truncf %686 : vector<8x32xf32> to vector<8x32xbf16>
    %cst_209 = arith.constant dense<0.000000e+00> : vector<8x128xf32>
    %734 = tpu.matmul %733, %2, %cst_209 {dimension_numbers = #tpu.dot_dimension_numbers<[1], [0], [0], [1], [0, 0, 1, 1], [], []>} : vector<8x32xbf16>, vector<32x128xbf16>, vector<8x128xf32> -> vector<8x128xf32>
    %735 = arith.addf %732, %734 : vector<8x128xf32>
    %736 = arith.negf %735 : vector<8x128xf32>
    %737 = math.exp %736 : vector<8x128xf32>
    %cst_210 = arith.constant 1.000000e+00 : f32
    %738 = vector.broadcast %cst_210 : f32 to vector<8x128xf32>
    %739 = arith.addf %738, %737 : vector<8x128xf32>
    %740 = arith.divf %738, %739 : vector<8x128xf32>
    %741 = vector.extract_strided_slice %740 {offsets = [0, 0], sizes = [8, 32], strides = [1, 1]} : vector<8x128xf32> to vector<8x32xf32>
    %742 = vector.extract_strided_slice %740 {offsets = [0, 32], sizes = [8, 32], strides = [1, 1]} : vector<8x128xf32> to vector<8x32xf32>
    %743 = vector.extract_strided_slice %735 {offsets = [0, 64], sizes = [8, 32], strides = [1, 1]} : vector<8x128xf32> to vector<8x32xf32>
    %744 = math.tanh %743 : vector<8x32xf32>
    %745 = vector.extract_strided_slice %740 {offsets = [0, 96], sizes = [8, 32], strides = [1, 1]} : vector<8x128xf32> to vector<8x32xf32>
    %746 = arith.mulf %742, %684 : vector<8x32xf32>
    %747 = arith.mulf %741, %744 : vector<8x32xf32>
    %748 = arith.addf %746, %747 : vector<8x32xf32>
    %749 = math.tanh %748 : vector<8x32xf32>
    %750 = arith.mulf %745, %749 : vector<8x32xf32>
    %751 = arith.truncf %750 : vector<8x32xf32> to vector<8x32xbf16>
    %cst_211 = arith.constant dense<0.000000e+00> : vector<8x64xf32>
    %752 = tpu.matmul %751, %3, %cst_211 {dimension_numbers = #tpu.dot_dimension_numbers<[1], [0], [0], [1], [0, 0, 1, 1], [], []>} : vector<8x32xbf16>, vector<32x64xbf16>, vector<8x64xf32> -> vector<8x64xf32>
    %753 = vector.extract_strided_slice %752 {offsets = [0, 0], sizes = [8, 32], strides = [1, 1]} : vector<8x64xf32> to vector<8x32xf32>
    %754 = vector.extract_strided_slice %752 {offsets = [0, 32], sizes = [8, 32], strides = [1, 1]} : vector<8x64xf32> to vector<8x32xf32>
    %755 = vector.shape_cast %753 : vector<8x32xf32> to vector<1x8x32xf32>
    %756 = vector.broadcast %755 : vector<1x8x32xf32> to vector<8x8x32xf32>
    %757 = arith.mulf %340, %756 : vector<8x8x32xf32>
    %cst_212 = arith.constant dense<0.000000e+00> : vector<8x8xf32>
    %758 = vector.multi_reduction <add>, %757, %cst_212 [2] : vector<8x8x32xf32> to vector<8x8xf32>
    %cst_213 = arith.constant 5.000000e-01 : f32
    %759 = vector.broadcast %cst_213 : f32 to vector<8x8xf32>
    %760 = arith.cmpf ogt, %5, %759 : vector<8x8xf32>
    %761 = vector.broadcast %cst_102 : f32 to vector<8x8xf32>
    %762 = arith.select %760, %758, %761 : vector<8x8xi1>, vector<8x8xf32>
    %cst_214 = arith.constant dense<0xFF800000> : vector<8xf32>
    %763 = vector.multi_reduction <maximumf>, %762, %cst_214 [0] : vector<8x8xf32> to vector<8xf32>
    %764 = vector.shape_cast %763 : vector<8xf32> to vector<1x8xf32>
    %765 = vector.broadcast %764 : vector<1x8xf32> to vector<8x8xf32>
    %766 = arith.subf %762, %765 : vector<8x8xf32>
    %767 = math.exp %766 : vector<8x8xf32>
    %cst_215 = arith.constant dense<0.000000e+00> : vector<8xf32>
    %768 = vector.multi_reduction <add>, %767, %cst_215 [0] : vector<8x8xf32> to vector<8xf32>
    %769 = vector.shape_cast %768 : vector<8xf32> to vector<1x8xf32>
    %770 = tpu.reciprocal %769 {approx = true} : vector<1x8xf32> -> vector<1x8xf32>
    %771 = vector.broadcast %770 : vector<1x8xf32> to vector<8x8xf32>
    %772 = arith.mulf %767, %771 : vector<8x8xf32>
    %773 = vector.shape_cast %772 : vector<8x8xf32> to vector<8x8x1xf32>
    %774 = vector.broadcast %773 : vector<8x8x1xf32> to vector<8x8x32xf32>
    %775 = arith.mulf %774, %340 : vector<8x8x32xf32>
    %cst_216 = arith.constant dense<0.000000e+00> : vector<8x32xf32>
    %776 = vector.multi_reduction <add>, %775, %cst_216 [0] : vector<8x8x32xf32> to vector<8x32xf32>
    %777 = arith.truncf %776 : vector<8x32xf32> to vector<8x32xbf16>
    %cst_217 = arith.constant dense<0.000000e+00> : vector<8x32xf32>
    %778 = tpu.matmul %777, %4, %cst_217 {dimension_numbers = #tpu.dot_dimension_numbers<[1], [0], [0], [1], [0, 0, 1, 1], [], []>} : vector<8x32xbf16>, vector<32x32xbf16>, vector<8x32xf32> -> vector<8x32xf32>
    %779 = arith.addf %778, %754 : vector<8x32xf32>
    %780 = math.tanh %779 : vector<8x32xf32>
    %781 = arith.index_cast %c6_i32_205 : i32 to index
    %c0_218 = arith.constant 0 : index
    %c0_219 = arith.constant 0 : index
    %782 = vector.load %arg18[%781, %c0_218, %c0_219] : memref<8x8x32xf32, #tpu.memory_space<vmem>>, vector<1x8x32xf32>
    %783 = vector.shape_cast %782 : vector<1x8x32xf32> to vector<8x32xf32>
    %784 = vector.shape_cast %780 : vector<8x32xf32> to vector<1x8x32xf32>
    tpu.vector_store %arg18[%781, %c0_218, %c0_219], %784 {strides = array<i32>} : memref<8x8x32xf32, #tpu.memory_space<vmem>>, vector<1x8x32xf32>,
    %785 = tpu.transpose %772, [1, 0] : vector<8x8xf32> -> vector<8x8xf32>
    %786 = arith.index_cast %c6_i32_205 : i32 to index
    %c0_220 = arith.constant 0 : index
    %c0_221 = arith.constant 0 : index
    %787 = vector.load %arg16[%786, %c0_220, %c0_221] : memref<8x8x8xf32, #tpu.memory_space<vmem>>, vector<1x8x8xf32>
    %788 = vector.shape_cast %787 : vector<1x8x8xf32> to vector<8x8xf32>
    %789 = vector.shape_cast %785 : vector<8x8xf32> to vector<1x8x8xf32>
    tpu.vector_store %arg16[%786, %c0_220, %c0_221], %789 {strides = array<i32>} : memref<8x8x8xf32, #tpu.memory_space<vmem>>, vector<1x8x8xf32>,
    %c7_i32_222 = arith.constant 7 : i32
    %790 = arith.index_cast %c7_i32_222 : i32 to index
    %c0_223 = arith.constant 0 : index
    %c0_224 = arith.constant 0 : index
    %791 = vector.load %arg20[%790, %c0_223, %c0_224] : memref<8x8x128xbf16, #tpu.memory_space<vmem>>, vector<1x8x128xbf16>
    %792 = vector.shape_cast %791 : vector<1x8x128xbf16> to vector<8x128xbf16>
    %793 = arith.truncf %780 : vector<8x32xf32> to vector<8x32xbf16>
    %cst_225 = arith.constant dense<0.000000e+00> : vector<8x128xf32>
    %794 = tpu.matmul %793, %1, %cst_225 {dimension_numbers = #tpu.dot_dimension_numbers<[1], [0], [0], [1], [0, 0, 1, 1], [], []>} : vector<8x32xbf16>, vector<32x128xbf16>, vector<8x128xf32> -> vector<8x128xf32>
    %795 = arith.extf %792 : vector<8x128xbf16> to vector<8x128xf32>
    %796 = arith.addf %795, %794 : vector<8x128xf32>
    %797 = arith.truncf %750 : vector<8x32xf32> to vector<8x32xbf16>
    %cst_226 = arith.constant dense<0.000000e+00> : vector<8x128xf32>
    %798 = tpu.matmul %797, %2, %cst_226 {dimension_numbers = #tpu.dot_dimension_numbers<[1], [0], [0], [1], [0, 0, 1, 1], [], []>} : vector<8x32xbf16>, vector<32x128xbf16>, vector<8x128xf32> -> vector<8x128xf32>
    %799 = arith.addf %796, %798 : vector<8x128xf32>
    %800 = arith.negf %799 : vector<8x128xf32>
    %801 = math.exp %800 : vector<8x128xf32>
    %cst_227 = arith.constant 1.000000e+00 : f32
    %802 = vector.broadcast %cst_227 : f32 to vector<8x128xf32>
    %803 = arith.addf %802, %801 : vector<8x128xf32>
    %804 = arith.divf %802, %803 : vector<8x128xf32>
    %805 = vector.extract_strided_slice %804 {offsets = [0, 0], sizes = [8, 32], strides = [1, 1]} : vector<8x128xf32> to vector<8x32xf32>
    %806 = vector.extract_strided_slice %804 {offsets = [0, 32], sizes = [8, 32], strides = [1, 1]} : vector<8x128xf32> to vector<8x32xf32>
    %807 = vector.extract_strided_slice %799 {offsets = [0, 64], sizes = [8, 32], strides = [1, 1]} : vector<8x128xf32> to vector<8x32xf32>
    %808 = math.tanh %807 : vector<8x32xf32>
    %809 = vector.extract_strided_slice %804 {offsets = [0, 96], sizes = [8, 32], strides = [1, 1]} : vector<8x128xf32> to vector<8x32xf32>
    %810 = arith.mulf %806, %748 : vector<8x32xf32>
    %811 = arith.mulf %805, %808 : vector<8x32xf32>
    %812 = arith.addf %810, %811 : vector<8x32xf32>
    %813 = math.tanh %812 : vector<8x32xf32>
    %814 = arith.mulf %809, %813 : vector<8x32xf32>
    %815 = arith.truncf %814 : vector<8x32xf32> to vector<8x32xbf16>
    %cst_228 = arith.constant dense<0.000000e+00> : vector<8x64xf32>
    %816 = tpu.matmul %815, %3, %cst_228 {dimension_numbers = #tpu.dot_dimension_numbers<[1], [0], [0], [1], [0, 0, 1, 1], [], []>} : vector<8x32xbf16>, vector<32x64xbf16>, vector<8x64xf32> -> vector<8x64xf32>
    %817 = vector.extract_strided_slice %816 {offsets = [0, 0], sizes = [8, 32], strides = [1, 1]} : vector<8x64xf32> to vector<8x32xf32>
    %818 = vector.extract_strided_slice %816 {offsets = [0, 32], sizes = [8, 32], strides = [1, 1]} : vector<8x64xf32> to vector<8x32xf32>
    %819 = vector.shape_cast %817 : vector<8x32xf32> to vector<1x8x32xf32>
    %820 = vector.broadcast %819 : vector<1x8x32xf32> to vector<8x8x32xf32>
    %821 = arith.mulf %340, %820 : vector<8x8x32xf32>
    %cst_229 = arith.constant dense<0.000000e+00> : vector<8x8xf32>
    %822 = vector.multi_reduction <add>, %821, %cst_229 [2] : vector<8x8x32xf32> to vector<8x8xf32>
    %cst_230 = arith.constant 5.000000e-01 : f32
    %823 = vector.broadcast %cst_230 : f32 to vector<8x8xf32>
    %824 = arith.cmpf ogt, %5, %823 : vector<8x8xf32>
    %825 = vector.broadcast %cst_102 : f32 to vector<8x8xf32>
    %826 = arith.select %824, %822, %825 : vector<8x8xi1>, vector<8x8xf32>
    %cst_231 = arith.constant dense<0xFF800000> : vector<8xf32>
    %827 = vector.multi_reduction <maximumf>, %826, %cst_231 [0] : vector<8x8xf32> to vector<8xf32>
    %828 = vector.shape_cast %827 : vector<8xf32> to vector<1x8xf32>
    %829 = vector.broadcast %828 : vector<1x8xf32> to vector<8x8xf32>
    %830 = arith.subf %826, %829 : vector<8x8xf32>
    %831 = math.exp %830 : vector<8x8xf32>
    %cst_232 = arith.constant dense<0.000000e+00> : vector<8xf32>
    %832 = vector.multi_reduction <add>, %831, %cst_232 [0] : vector<8x8xf32> to vector<8xf32>
    %833 = vector.shape_cast %832 : vector<8xf32> to vector<1x8xf32>
    %834 = tpu.reciprocal %833 {approx = true} : vector<1x8xf32> -> vector<1x8xf32>
    %835 = vector.broadcast %834 : vector<1x8xf32> to vector<8x8xf32>
    %836 = arith.mulf %831, %835 : vector<8x8xf32>
    %837 = vector.shape_cast %836 : vector<8x8xf32> to vector<8x8x1xf32>
    %838 = vector.broadcast %837 : vector<8x8x1xf32> to vector<8x8x32xf32>
    %839 = arith.mulf %838, %340 : vector<8x8x32xf32>
    %cst_233 = arith.constant dense<0.000000e+00> : vector<8x32xf32>
    %840 = vector.multi_reduction <add>, %839, %cst_233 [0] : vector<8x8x32xf32> to vector<8x32xf32>
    %841 = arith.truncf %840 : vector<8x32xf32> to vector<8x32xbf16>
    %cst_234 = arith.constant dense<0.000000e+00> : vector<8x32xf32>
    %842 = tpu.matmul %841, %4, %cst_234 {dimension_numbers = #tpu.dot_dimension_numbers<[1], [0], [0], [1], [0, 0, 1, 1], [], []>} : vector<8x32xbf16>, vector<32x32xbf16>, vector<8x32xf32> -> vector<8x32xf32>
    %843 = arith.addf %842, %818 : vector<8x32xf32>
    %844 = math.tanh %843 : vector<8x32xf32>
    %845 = arith.index_cast %c7_i32_222 : i32 to index
    %c0_235 = arith.constant 0 : index
    %c0_236 = arith.constant 0 : index
    %846 = vector.load %arg18[%845, %c0_235, %c0_236] : memref<8x8x32xf32, #tpu.memory_space<vmem>>, vector<1x8x32xf32>
    %847 = vector.shape_cast %846 : vector<1x8x32xf32> to vector<8x32xf32>
    %848 = vector.shape_cast %844 : vector<8x32xf32> to vector<1x8x32xf32>
    tpu.vector_store %arg18[%845, %c0_235, %c0_236], %848 {strides = array<i32>} : memref<8x8x32xf32, #tpu.memory_space<vmem>>, vector<1x8x32xf32>,
    %849 = tpu.transpose %836, [1, 0] : vector<8x8xf32> -> vector<8x8xf32>
    %850 = arith.index_cast %c7_i32_222 : i32 to index
    %c0_237 = arith.constant 0 : index
    %c0_238 = arith.constant 0 : index
    %851 = vector.load %arg16[%850, %c0_237, %c0_238] : memref<8x8x8xf32, #tpu.memory_space<vmem>>, vector<1x8x8xf32>
    %852 = vector.shape_cast %851 : vector<1x8x8xf32> to vector<8x8xf32>
    %853 = vector.shape_cast %849 : vector<8x8xf32> to vector<1x8x8xf32>
    tpu.vector_store %arg16[%850, %c0_237, %c0_238], %853 {strides = array<i32>} : memref<8x8x8xf32, #tpu.memory_space<vmem>>, vector<1x8x8xf32>,
    %c8_i32_239 = arith.constant 8 : i32
    %c0_240 = arith.constant 0 : index
    %c0_241 = arith.constant 0 : index
    %854 = vector.load %arg13[%c0_240, %c0_241] : memref<1x32xf32, #tpu.memory_space<vmem>>, vector<1x32xf32>
    %c0_242 = arith.constant 0 : index
    %c0_243 = arith.constant 0 : index
    %c0_244 = arith.constant 0 : index
    %855 = vector.load %arg18[%c0_242, %c0_243, %c0_244] : memref<8x8x32xf32, #tpu.memory_space<vmem>>, vector<8x8x32xf32>
    %856 = vector.shape_cast %854 : vector<1x32xf32> to vector<1x1x32xf32>
    %857 = vector.broadcast %856 : vector<1x1x32xf32> to vector<8x8x32xf32>
    %858 = arith.mulf %855, %857 : vector<8x8x32xf32>
    %cst_245 = arith.constant dense<0.000000e+00> : vector<8x8xf32>
    %859 = vector.multi_reduction <add>, %858, %cst_245 [2] : vector<8x8x32xf32> to vector<8x8xf32>
    %c0_246 = arith.constant 0 : index
    %c0_247 = arith.constant 0 : index
    %860 = vector.load %arg14[%c0_246, %c0_247] : memref<1x1xf32, #tpu.memory_space<vmem>>, vector<1x1xf32>
    %861 = vector.broadcast %860 : vector<1x1xf32> to vector<8x8xf32>
    %862 = arith.addf %859, %861 : vector<8x8xf32>
    %863 = tpu.transpose %862, [1, 0] : vector<8x8xf32> -> vector<8x8xf32>
    %c0_248 = arith.constant 0 : index
    %c0_249 = arith.constant 0 : index
    %864 = vector.load %arg15[%c0_248, %c0_249] : memref<8x8xf32, #tpu.memory_space<vmem>>, vector<8x8xf32>
    tpu.vector_store %arg15[%c0_248, %c0_249], %863 {strides = array<i32>} : memref<8x8xf32, #tpu.memory_space<vmem>>, vector<8x8xf32>,
    return
  }
}

</mosaic_0001>

<bundles_post_ra>
// kernel: maskgan_discriminator_forward.1
= control target key start
LH: loop header
LB: loop body
LE: loop exit
PB: predicated region body
PF: predicated region fallthrough
CT: control target
= control target key end

     0   :  { %v5642_v1 = vmov 0   ;;  %vm127_vm0 = vcmask 261120   ;;  %v5643_v7 = vmov 0.0   ;;  %vm5644_vm1 = vmmov 0   ;;  %s5646_s25 = smov 32   ;;  %s5647_s17 = smov 96   ;;  %s7240_s4 = inlined_call_operand.vmem [shape: bf16[32,128], index: 4, kind: input, shape index: {}]   ;;  %s7241_s0 = inlined_call_operand.vmem [shape: bf16[8,8,32], index: 0, kind: input, shape index: {}]   ;;  %s7242_s5 = inlined_call_operand.vmem [shape: bf16[32,128], index: 5, kind: input, shape index: {}]   ;;  %s7243_s3 = inlined_call_operand.vmem [shape: f32[8,8,1], index: 3, kind: input, shape index: {}]   ;;  %s7244_s6 = inlined_call_operand.vmem [shape: f32[1,128], index: 6, kind: input, shape index: {}]   ;;  %s7245_s7 = inlined_call_operand.vmem [shape: bf16[32,128], index: 7, kind: input, shape index: {}]   ;;  %s7246_s1 = inlined_call_operand.vmem [shape: bf16[8,8,32], index: 1, kind: input, shape index: {}]   ;;  %s7247_s10 = inlined_call_operand.vmem [shape: f32[1,128], index: 10, kind: input, shape index: {}]   ;;  %s7248_s8 = inlined_call_operand.vmem [shape: bf16[32,128], index: 8, kind: input, shape index: {}]   ;;  %s7249_s9 = inlined_call_operand.vmem [shape: bf16[32,128], index: 9, kind: input, shape index: {}]   ;;  %s7250_s11 = inlined_call_operand.vmem [shape: bf16[32,64], index: 11, kind: input, shape index: {}]   ;;  %s7251_s2 = inlined_call_operand.vmem [shape: f32[8,8], index: 2, kind: input, shape index: {}]   ;;  %s7252_s12 = inlined_call_operand.vmem [shape: bf16[32,32], index: 12, kind: input, shape index: {}]   ;;  %s7253_s14 = inlined_call_operand.<no memory space> [shape: f32[1,1], index: 14, kind: input, shape index: {}]   ;;  %s7254_s13 = inlined_call_operand.vmem [shape: f32[1,32], index: 13, kind: input, shape index: {}]   ;;  %s7255_s16 = inlined_call_operand.vmem [shape: f32[8,8,8], index: 16, kind: output, shape index: {1}]   ;;  %s7256_s15 = inlined_call_operand.vmem [shape: f32[8,8], index: 15, kind: output, shape index: {0}]  }
   0x1   :  { %7258 = sst [smem:[#allocation7_spill]] %s7240_s4  ;;  %5410 = vset.pattern.permute.xlu1 %v5642_v1  ;;  %5411 = vset.pattern.permute.xlu0 %v5642_v1  ;;  %v5414_v3 = vld [vmem:[%s7241_s0] sm:$0xff]   ;;  %v5415_v4 = vld [vmem:[%s7241_s0 + $0x8] sm:$0xff]   ;;  %v5417_v6 = vld [vmem:[%s7241_s0 + $0x10] sm:$0xff]   ;;  %vm1408_vm2 = vcmask 1041409   ;;  %vm1410_vm3 = vcmask 1042434  }
   0x2   :  { %s7259_s23 = sld [smem:[#allocation7_spill]]  ;;  %5024 = vmatprep.mubr.msk.bf16.mxu0 %vm127_vm0, %v5414_v3  ;;  %v5751_v5 = vld [vmem:[%s7242_s5] sm:$0xff]   ;;  %v5763_v8 = vld [vmem:[%s7242_s5 + $0x8] sm:$0xff]   ;;  %v5418_v9 = vld [vmem:[%s7241_s0 + $0x18] sm:$0xff]   ;;  %vm1412_vm4 = vcmask 1043459   ;;  %vm1414_vm5 = vcmask 1044484  }
   0x3   :  { %v365_v10 = vld [vmem:[%s7243_s3] sm:$0xff]  ;;  %v5421_v50 = vld [vmem:[%s7245_s7 + $0x8] sm:$0xff]   ;;  %v5424_v54 = vld [vmem:[%s7246_s1 + $0x10] sm:$0xff]   ;;  %vm1416_vm6 = vcmask 1045509   ;;  %vm1418_vm7 = vcmask 1046534   ;;  %vm1420_vm8 = vcmask 1047559  }
   0x4   :  { %450 = vperm.xlu1 %5410, %v365_v10   ;;  %v4740_v12 = vld [vmem:[%s7244_s6] ss:$0 sm:$0xff]  ;;  %s5645_s6 = smov 64   ;;  %v5423_v53 = vld [vmem:[%s7246_s1 + $0x8] sm:$0xff]   ;;  %v5425_v55 = vld [vmem:[%s7246_s1 + $0x18] sm:$0xff]   ;;  %vm1424_vm10 = vcmask 64512  }
   0x5   :  { %v5420_v49 = vld [vmem:[%s7245_s7] sm:$0xff]  }
   0x6   :  { %5032 = vmatprep.subr.bf16.mxu1 %v5420_v49  ;;  %v5422_v51 = vld [vmem:[%s7246_s1] sm:$0xff]  }
   0x7   :  { %5033 = vmatpush3.bf16.msra.mxu1 %v5420_v49  ;;  %5036 = vmatprep.mubr.msk.bf16.mxu1 %vm127_vm0, %v5422_v51  ;;  %v4751_v61 = vld [vmem:[%s7247_s10] ss:$0 sm:$0xff] }
   0x8   :  { %v5412_v0 = vld [vmem:[%s7259_s23] sm:$0xff]   ;;  %v5413_v2 = vld [vmem:[%s7259_s23 + $0x8] sm:$0xff]   ;;  %5034 = vmatprep.subr.bf16.mxu1 %v5421_v50 }
   0x9   :  { %5020 = vmatprep.subr.bf16.mxu0 %v5412_v0 }
   0xa   :  { %5021 = vmatpush3.bf16.msra.mxu0 %v5412_v0 }
   0xb   :  { %5022 = vmatprep.subr.bf16.mxu0 %v5413_v2  ;;  %5035 = vmatpush3.bf16.msra.mxu1 %v5421_v50 }
   0xc   :  { %5052 = vmatprep.subr.bf16.mxu1 %v5643_v7 }
   0xe   :  { %5023 = vmatpush3.bf16.msra.mxu0 %v5413_v2  ;;  %5037 = vmatmul.mubr.msk.bf16.vlgmr.msra.gmra.mrb[0].mxu1 %vm127_vm0, %v5423_v53 }
   0xf   :  { %5044 = vmatprep.subr.bf16.mxu0 %v5643_v7  ;;  %5053 = vmatpush3.bf16.msra.mxu1 %v5751_v5 }
  0x10   :  { %5040 = vmatprep.mubr.msk.bf16.mxu1 %vm127_vm0, %v5424_v54  ;;  %5054 = vmatprep.subr.bf16.mxu1 %v5643_v7 }
  0x11   :  { %5025 = vmatmul.mubr.msk.bf16.vlgmr.msra.gmra.mrb[0].mxu0 %vm127_vm0, %v5415_v4 }
  0x12   :  { %5045 = vmatpush3.bf16.msra.mxu0 %v5751_v5  ;;  %5028 = vmatprep.mubr.msk.bf16.mxu0 %vm127_vm0, %v5417_v6 }
  0x13   :  { %5046 = vmatprep.subr.bf16.mxu0 %v5643_v7  ;;  %5055 = vmatpush3.bf16.msra.mxu1 %v5763_v8 }
  0x14   :  { %5068 = vmatprep.subr.bf16.mxu1 %v5643_v7 }
  0x16   :  { %5047 = vmatpush3.bf16.msra.mxu0 %v5763_v8  ;;  %5041 = vmatmul.mubr.msk.bf16.gmra.mrb[4].mxu1 %vm127_vm0, %v5425_v55 }
  0x17   :  { %5060 = vmatprep.subr.bf16.mxu0 %v5643_v7  ;;  %5056 = vmatprep.mubr.msk.bf16.mxu1 %vm5644_vm1, %v5643_v7 }
  0x19   :  { %5029 = vmatmul.mubr.msk.bf16.gmra.mrb[4].mxu0 %vm127_vm0, %v5418_v9 }
  0x1a   :  { %5048 = vmatprep.mubr.msk.bf16.mxu0 %vm5644_vm1, %v5643_v7 }
  0x21   :  { %5049 = vmatmul.mubr.bf16.vlgmr.msra.gmra.mrb[8].mxu0 %v5642_v1 }
  0x22   :  { %5061 = vmatpush3.bf16.msra.mxu0 %v5751_v5  ;;  %5064 = vmatprep.mubr.msk.bf16.mxu0 %vm5644_vm1, %v5643_v7 }
  0x23   :  { %5062 = vmatprep.subr.bf16.mxu0 %v5643_v7 }
  0x26   :  { %5063 = vmatpush3.bf16.msra.mxu0 %v5763_v8 }
  0x27   :  { %5076 = vmatprep.subr.bf16.mxu0 %v5643_v7 }
  0x83   :  { %v451_v56 = vpop.permute.xlu1 %450 }
  0xe1   :  { %v5038_v62 = vpop.f32.mrb[0].mxu1 }
  0xe2   :  { %v327_v63 = vadd.f32 %v5038_v62, %v4751_v61  ;;  %v318_v0 = vpop.f32.mrb[1].mxu1 }
  0xe3   :  { %v319_v2 = vadd.f32 %v4751_v61, %v318_v0  ;;  %v5039_v3 = vpop.f32.mrb[2].mxu1 }
  0xe4   :  { %v5026_v11 = vpop.f32.mrb[0].mxu0  ;;  %v330_v4 = vadd.f32 %v5039_v3, %v4751_v61  ;;  %v321_v6 = vpop.f32.mrb[3].mxu1 }
  0xe5   :  { %v174_v13 = vpop.f32.mrb[1].mxu0  ;;  %v183_v15 = vadd.f32 %v5026_v11, %v4740_v12  ;;  %v322_v9 = vadd.f32 %v4751_v61, %v321_v6 }
  0xe6   :  { %v5027_v14 = vpop.f32.mrb[2].mxu0  ;;  %v175_v18 = vadd.f32 %v4740_v12, %v174_v13  ;;  %v4870_v10 = vpack.c.bf16 %v330_v4, %v327_v63 }
  0xe7   :  { %v186_v16 = vadd.f32 %v5027_v14, %v4740_v12  ;;  %v177_v17 = vpop.f32.mrb[3].mxu0  ;;  %v4865_v11 = vpack.c.bf16 %v322_v9, %v319_v2 }
  0xe8   :  { %v178_v19 = vadd.f32 %v4740_v12, %v177_v17  ;;  %4885 = vst [vmem:[#allocation5 + $0x8] sm:$0xff] %v4870_v10  }
  0xe9   :  { %v4850_v20 = vpack.c.bf16 %v186_v16, %v183_v15  ;;  %4866 = vst [vmem:[#allocation5] sm:$0xff] %v4865_v11  }
  0xea   :  { %v4845_v21 = vpack.c.bf16 %v178_v19, %v175_v18 }
  0xeb   :  { %4882 = vst [vmem:[#allocation4 + $0x8] sm:$0xff] %v4850_v20  }
  0xec   :  { %4846 = vst [vmem:[#allocation4] sm:$0xff] %v4845_v21   ;;  %v5030_v22 = vpop.f32.mrb[4].mxu0 }
  0xed   :  { %v199_v23 = vadd.f32 %v5030_v22, %v4740_v12  ;;  %v190_v24 = vpop.f32.mrb[5].mxu0 }
  0xee   :  { %v5031_v25 = vpop.f32.mrb[6].mxu0  ;;  %v191_v28 = vadd.f32 %v4740_v12, %v190_v24 }
  0xef   :  { %v202_v26 = vadd.f32 %v5031_v25, %v4740_v12  ;;  %v193_v27 = vpop.f32.mrb[7].mxu0 }
  0xf0   :  { %v194_v29 = vadd.f32 %v4740_v12, %v193_v27  ;;  %v5042_v12 = vpop.f32.mrb[4].mxu1 }
  0xf1   :  { %v4860_v30 = vpack.c.bf16 %v202_v26, %v199_v23  ;;  %v343_v13 = vadd.f32 %v5042_v12, %v4751_v61  ;;  %v334_v14 = vpop.f32.mrb[5].mxu1 }
  0xf2   :  { %v4855_v31 = vpack.c.bf16 %v194_v29, %v191_v28  ;;  %v335_v15 = vadd.f32 %v4751_v61, %v334_v14  ;;  %v5043_v16 = vpop.f32.mrb[6].mxu1 }
  0xf3   :  { %4884 = vst [vmem:[#allocation4 + $0x18] sm:$0xff] %v4860_v30   ;;  %v366_v32 = vld [vmem:[#allocation4] sm:$0xf]  ;;  %v346_v17 = vadd.f32 %v5043_v16, %v4751_v61  ;;  %v337_v18 = vpop.f32.mrb[7].mxu1  ;;  %v465_v23 = vld [vmem:[#allocation4 + $0x4] sm:$0xff]  }
  0xf4   :  { %4883 = vst [vmem:[#allocation4 + $0x10] sm:$0xff] %v4855_v31   ;;  %v416_v33 = vpop.f32.mrb[8].mxu0  ;;  %v422_v34 = vunpack.c.l.bf16 %v366_v32  ;;  %v338_v19 = vadd.f32 %v4751_v61, %v337_v18  ;;  %v513_v24 = vunpack.c.l.bf16 %v465_v23  ;;  %v4765_v31 = vld [vmem:[%s7243_s3 + $0x8] sm:$0xff]  ;;  %v608_v51 = vunpack.c.h.bf16 %v465_v23 }
  0xf5   :  { %v5050_v35 = vpop.f32.mrb[9].mxu0  ;;  %v4880_v20 = vpack.c.bf16 %v346_v17, %v343_v13 }
  0xf6   :  { %v423_v36 = vadd.f32 %v422_v34, %v416_v33  ;;  %v419_v37 = vpop.f32.mrb[10].mxu0  ;;  %v4875_v21 = vpack.c.bf16 %v338_v19, %v335_v15 }
  0xf7   :  { %v5051_v38 = vpop.f32.mrb[11].mxu0  ;;  %4887 = vst [vmem:[#allocation5 + $0x18] sm:$0xff] %v4880_v20  }
  0xf8   :  { %5434 = vtanh.f32 %v423_v36  ;;  %v4764_v40 = vmul.f32 -1.442695, %v423_v36  ;;  %4886 = vst [vmem:[#allocation5 + $0x10] sm:$0xff] %v4875_v21  }
  0xfa   :  { %5436 = vpow2.f32 %v4764_v40 }
  0xfb   :  { %v655_v21 = vld [vmem:[#allocation4 + $0xc] sm:$0xff]  }
 0x102   :  { %v5435_v39 = vpop.eup %5434 }
 0x103   :  { %433 = vrot.lane.b32.xlu0 %v5435_v39, %s5645_s6 }
 0x104   :  { %v5437_v41 = vpop.eup %5436 }
 0x105   :  { %v427_v42 = vadd.f32 1.0, %v5437_v41 }
 0x107   :  { %5438 = vrcp.f32 %v427_v42 }
 0x111   :  { %v5439_v43 = vpop.eup %5438 }
 0x112   :  { %v431_v46 = vmul.f32 0.0, %v5439_v43 }
 0x175   :  { %v434_v44 = vpop.permute.xlu0 %433 }
 0x176   :  { %v436_v45 = vmul.f32 %v5439_v43, %v434_v44 }
 0x178   :  { %438 = vrot.lane.b32.xlu0 %v436_v45, %s5646_s25 }
 0x1ea   :  { %v439_v47 = vpop.permute.xlu0 %438 }
 0x1eb   :  { %v5789_v48 = vadd.f32 %v439_v47, %v431_v46 }
 0x1ed   :  { %5440 = vtanh.f32 %v5789_v48  ;;  %v460_v38 = vmul.f32 %v451_v56, %v5789_v48 }
 0x1f7   :  { %v5441_v52 = vpop.eup %5440 }
 0x1f8   :  { %444 = vrot.lane.b32.xlu1 %v5441_v52, %s5645_s6 }
 0x26a   :  { %v445_v57 = vpop.permute.xlu1 %444 }
 0x26b   :  { %v447_v58 = vmul.f32 %v5439_v43, %v445_v57 }
 0x26d   :  { %v5822_v59 = vmul.f32 %v451_v56, %v447_v58  ;;  %v4768_v58 = vld [vmem:[%s7243_s3 + $0x10] sm:$0xff] }
 0x26f   :  { %v466_v60 = vpack.c.bf16 %v5822_v59, %v5822_v59 }
 0x271   :  { %468 = vrot.lane.b32.xlu0 %v466_v60, %s5646_s25 }
 0x2e3   :  { %v469_v22 = vpop.permute.xlu0 %468 }
 0x2e4   :  { %5057 = vmatmul.mubr.msk.bf16.vlgmr.msra.gmra.mrb[8].mxu1 %vm127_vm0, %v469_v22  ;;  %v703_v22 = vunpack.c.l.bf16 %v655_v21 }
 0x2e5   :  { %5069 = vmatpush3.bf16.msra.mxu1 %v5751_v5  ;;  %5072 = vmatprep.mubr.msk.bf16.mxu1 %vm5644_vm1, %v5643_v7 }
 0x2e6   :  { %5070 = vmatprep.subr.bf16.mxu1 %v5643_v7 }
 0x2e9   :  { %5071 = vmatpush3.bf16.msra.mxu1 %v5763_v8 }
 0x2ea   :  { %5084 = vmatprep.subr.bf16.mxu1 %v5643_v7 }
 0x3b7   :  { %v507_v25 = vpop.f32.mrb[8].mxu1 }
 0x3b8   :  { %v514_v26 = vadd.f32 %v513_v24, %v507_v25  ;;  %v5058_v27 = vpop.f32.mrb[9].mxu1 }
 0x3b9   :  { %v510_v28 = vpop.f32.mrb[10].mxu1 }
 0x3ba   :  { %5442 = vtanh.f32 %v514_v26  ;;  %v5059_v29 = vpop.f32.mrb[11].mxu1  ;;  %v4767_v32 = vmul.f32 -1.442695, %v514_v26 }
 0x3bb   :  { %v4771_v29 = vld [vmem:[%s7243_s3 + $0x18] sm:$0xff] }
 0x3bc   :  { %5444 = vpow2.f32 %v4767_v32 }
 0x3c4   :  { %v5443_v30 = vpop.eup %5442 }
 0x3c5   :  { %524 = vrot.lane.b32.xlu1 %v5443_v30, %s5645_s6 }
 0x3c6   :  { %v5445_v33 = vpop.eup %5444 }
 0x3c7   :  { %v518_v34 = vadd.f32 1.0, %v5445_v33 }
 0x3c9   :  { %541 = vperm.xlu1 %5410, %v4765_v31   ;;  %5446 = vrcp.f32 %v518_v34 }
 0x3d3   :  { %v5447_v35 = vpop.eup %5446 }
 0x3d4   :  { %v522_v39 = vmul.f32 %v5447_v35, %v460_v38 }
 0x437   :  { %v525_v36 = vpop.permute.xlu1 %524 }
 0x438   :  { %v527_v37 = vmul.f32 %v5447_v35, %v525_v36 }
 0x43a   :  { %529 = vrot.lane.b32.xlu0 %v527_v37, %s5646_s25 }
 0x448   :  { %v5848_v46 = vpop.permute.xlu1 %541 }
 0x4ac   :  { %v530_v40 = vpop.permute.xlu0 %529 }
 0x4ad   :  { %v532_v41 = vadd.f32 %v530_v40, %v522_v39 }
 0x4af   :  { %5448 = vtanh.f32 %v532_v41  ;;  %v554_v3 = vsub.f32 %v532_v41, %v460_v38 }
 0x4b1   :  { %v555_v4 = vmul.f32 %v554_v3, %v5848_v46 }
 0x4b3   :  { %v556_v6 = vadd.f32 %v555_v4, %v460_v38 }
 0x4b9   :  { %v5449_v42 = vpop.eup %5448 }
 0x4ba   :  { %535 = vrot.lane.b32.xlu0 %v5449_v42, %s5645_s6 }
 0x52c   :  { %v536_v43 = vpop.permute.xlu0 %535 }
 0x52d   :  { %v5844_v44 = vmul.f32 %v5447_v35, %v536_v43 }
 0x52f   :  { %v551_v45 = vsub.f32 %v5844_v44, %v5822_v59 }
 0x531   :  { %v552_v47 = vmul.f32 %v551_v45, %v5848_v46 }
 0x533   :  { %v553_v49 = vadd.f32 %v552_v47, %v5822_v59 }
 0x535   :  { %v561_v48 = vpack.c.bf16 %v553_v49, %v553_v49 }
 0x537   :  { %563 = vrot.lane.b32.xlu1 %v561_v48, %s5646_s25 }
 0x5a9   :  { %v564_v50 = vpop.permute.xlu1 %563 }
 0x5aa   :  { %5065 = vmatmul.mubr.msk.bf16.vlgmr.msra.gmra.mrb[12].mxu0 %vm127_vm0, %v564_v50 }
 0x5ab   :  { %5077 = vmatpush3.bf16.msra.mxu0 %v5751_v5  ;;  %5080 = vmatprep.mubr.msk.bf16.mxu0 %vm5644_vm1, %v5643_v7 }
 0x5ac   :  { %5078 = vmatprep.subr.bf16.mxu0 %v5643_v7 }
 0x5af   :  { %5079 = vmatpush3.bf16.msra.mxu0 %v5763_v8 }
 0x5b0   :  { %5092 = vmatprep.subr.bf16.mxu0 %v5643_v7 }
 0x67d   :  { %v602_v52 = vpop.f32.mrb[12].mxu0 }
 0x67e   :  { %v609_v53 = vadd.f32 %v608_v51, %v602_v52  ;;  %v5066_v54 = vpop.f32.mrb[13].mxu0 }
 0x67f   :  { %v605_v55 = vpop.f32.mrb[14].mxu0 }
 0x680   :  { %5450 = vtanh.f32 %v609_v53  ;;  %v5067_v56 = vpop.f32.mrb[15].mxu0  ;;  %v4770_v60 = vmul.f32 -1.442695, %v609_v53  ;;  %v798_v53 = vunpack.c.h.bf16 %v655_v21 }
 0x682   :  { %5452 = vpow2.f32 %v4770_v60 }
 0x68a   :  { %v5451_v57 = vpop.eup %5450 }
 0x68b   :  { %619 = vrot.lane.b32.xlu0 %v5451_v57, %s5645_s6 }
 0x68c   :  { %v5453_v61 = vpop.eup %5452 }
 0x68d   :  { %v613_v62 = vadd.f32 1.0, %v5453_v61  ;;  %v4774_v61 = vld [vmem:[%s7243_s3 + $0x20] sm:$0xff] }
 0x68f   :  { %636 = vperm.xlu0 %5411, %v4768_v58   ;;  %5454 = vrcp.f32 %v613_v62 }
 0x699   :  { %v5455_v63 = vpop.eup %5454 }
 0x69a   :  { %v617_v9 = vmul.f32 %v5455_v63, %v556_v6 }
 0x6fd   :  { %v620_v0 = vpop.permute.xlu0 %619 }
 0x6fe   :  { %v622_v2 = vmul.f32 %v5455_v63, %v620_v0 }
 0x700   :  { %624 = vrot.lane.b32.xlu1 %v622_v2, %s5646_s25 }
 0x70e   :  { %v5870_v16 = vpop.permute.xlu0 %636 }
 0x772   :  { %v625_v10 = vpop.permute.xlu1 %624 }
 0x773   :  { %v627_v11 = vadd.f32 %v625_v10, %v617_v9 }
 0x775   :  { %5456 = vtanh.f32 %v627_v11  ;;  %v649_v36 = vsub.f32 %v627_v11, %v556_v6 }
 0x777   :  { %v650_v37 = vmul.f32 %v649_v36, %v5870_v16 }
 0x779   :  { %v651_v38 = vadd.f32 %v650_v37, %v556_v6 }
 0x77f   :  { %v5457_v12 = vpop.eup %5456 }
 0x780   :  { %630 = vrot.lane.b32.xlu1 %v5457_v12, %s5645_s6 }
 0x7f2   :  { %v631_v13 = vpop.permute.xlu1 %630 }
 0x7f3   :  { %v5867_v14 = vmul.f32 %v5455_v63, %v631_v13 }
 0x7f5   :  { %v646_v15 = vsub.f32 %v5867_v14, %v553_v49 }
 0x7f7   :  { %v647_v17 = vmul.f32 %v646_v15, %v5870_v16 }
 0x7f9   :  { %v648_v18 = vadd.f32 %v647_v17, %v553_v49 }
 0x7fb   :  { %v656_v19 = vpack.c.bf16 %v648_v18, %v648_v18 }
 0x7fd   :  { %658 = vrot.lane.b32.xlu1 %v656_v19, %s5646_s25 }
 0x86f   :  { %v659_v20 = vpop.permute.xlu1 %658 }
 0x870   :  { %5073 = vmatmul.mubr.msk.bf16.vlgmr.msra.gmra.mrb[12].mxu1 %vm127_vm0, %v659_v20 }
 0x871   :  { %5085 = vmatpush3.bf16.msra.mxu1 %v5751_v5  ;;  %5088 = vmatprep.mubr.msk.bf16.mxu1 %vm5644_vm1, %v5643_v7 }
 0x872   :  { %5086 = vmatprep.subr.bf16.mxu1 %v5643_v7 }
 0x875   :  { %5087 = vmatpush3.bf16.msra.mxu1 %v5763_v8 }
 0x876   :  { %5100 = vmatprep.subr.bf16.mxu1 %v5643_v7 }
 0x943   :  { %v697_v23 = vpop.f32.mrb[12].mxu1 }
 0x944   :  { %v704_v24 = vadd.f32 %v703_v22, %v697_v23  ;;  %v5074_v25 = vpop.f32.mrb[13].mxu1 }
 0x945   :  { %v700_v26 = vpop.f32.mrb[14].mxu1  ;;  %v845_v25 = vld [vmem:[#allocation4 + $0x14] sm:$0xff]  }
 0x946   :  { %5458 = vtanh.f32 %v704_v24  ;;  %v5075_v27 = vpop.f32.mrb[15].mxu1  ;;  %v4773_v30 = vmul.f32 -1.442695, %v704_v24  ;;  %v893_v26 = vunpack.c.l.bf16 %v845_v25 }
 0x948   :  { %5460 = vpow2.f32 %v4773_v30 }
 0x950   :  { %v5459_v28 = vpop.eup %5458 }
 0x951   :  { %714 = vrot.lane.b32.xlu0 %v5459_v28, %s5645_s6 }
 0x952   :  { %v5461_v31 = vpop.eup %5460 }
 0x953   :  { %v708_v32 = vadd.f32 1.0, %v5461_v31 }
 0x955   :  { %731 = vperm.xlu0 %5411, %v4771_v29   ;;  %5462 = vrcp.f32 %v708_v32 }
 0x95f   :  { %v5463_v33 = vpop.eup %5462 }
 0x960   :  { %v712_v39 = vmul.f32 %v5463_v33, %v651_v38 }
 0x9c3   :  { %v715_v34 = vpop.permute.xlu0 %714 }
 0x9c4   :  { %v717_v35 = vmul.f32 %v5463_v33, %v715_v34 }
 0x9c6   :  { %719 = vrot.lane.b32.xlu1 %v717_v35, %s5646_s25 }
 0x9d4   :  { %v5891_v49 = vpop.permute.xlu0 %731 }
 0xa38   :  { %v720_v40 = vpop.permute.xlu1 %719 }
 0xa39   :  { %v722_v41 = vadd.f32 %v720_v40, %v712_v39 }
 0xa3b   :  { %5464 = vtanh.f32 %v722_v41  ;;  %v744_v6 = vsub.f32 %v722_v41, %v651_v38 }
 0xa3d   :  { %v745_v9 = vmul.f32 %v744_v6, %v5891_v49 }
 0xa3f   :  { %v746_v10 = vadd.f32 %v745_v9, %v651_v38 }
 0xa45   :  { %v5465_v42 = vpop.eup %5464 }
 0xa46   :  { %725 = vrot.lane.b32.xlu1 %v5465_v42, %s5645_s6 }
 0xab8   :  { %v726_v43 = vpop.permute.xlu1 %725 }
 0xab9   :  { %v5888_v45 = vmul.f32 %v5463_v33, %v726_v43 }
 0xabb   :  { %v741_v47 = vsub.f32 %v5888_v45, %v648_v18 }
 0xabd   :  { %v742_v48 = vmul.f32 %v741_v47, %v5891_v49 }
 0xabf   :  { %v743_v50 = vadd.f32 %v742_v48, %v648_v18 }
 0xac1   :  { %v751_v51 = vpack.c.bf16 %v743_v50, %v743_v50 }
 0xac3   :  { %753 = vrot.lane.b32.xlu0 %v751_v51, %s5646_s25 }
 0xb35   :  { %v754_v52 = vpop.permute.xlu0 %753 }
 0xb36   :  { %5081 = vmatmul.mubr.msk.bf16.vlgmr.msra.gmra.mrb[16].mxu0 %vm127_vm0, %v754_v52 }
 0xb37   :  { %5093 = vmatpush3.bf16.msra.mxu0 %v5751_v5  ;;  %5096 = vmatprep.mubr.msk.bf16.mxu0 %vm5644_vm1, %v5643_v7 }
 0xb38   :  { %5094 = vmatprep.subr.bf16.mxu0 %v5643_v7 }
 0xb3b   :  { %5095 = vmatpush3.bf16.msra.mxu0 %v5763_v8 }
 0xb3c   :  { %5108 = vmatprep.subr.bf16.mxu0 %v5643_v7 }
 0xc09   :  { %v792_v54 = vpop.f32.mrb[16].mxu0 }
 0xc0a   :  { %v799_v55 = vadd.f32 %v798_v53, %v792_v54  ;;  %v5082_v56 = vpop.f32.mrb[17].mxu0 }
 0xc0b   :  { %v795_v57 = vpop.f32.mrb[18].mxu0 }
 0xc0c   :  { %5466 = vtanh.f32 %v799_v55  ;;  %v5083_v58 = vpop.f32.mrb[19].mxu0  ;;  %v4776_v62 = vmul.f32 -1.442695, %v799_v55  ;;  %v988_v57 = vunpack.c.h.bf16 %v845_v25 }
 0xc0e   :  { %5468 = vpow2.f32 %v4776_v62 }
 0xc16   :  { %v5467_v60 = vpop.eup %5466 }
 0xc17   :  { %809 = vrot.lane.b32.xlu1 %v5467_v60, %s5645_s6 }
 0xc18   :  { %v5469_v63 = vpop.eup %5468 }
 0xc19   :  { %v803_v0 = vadd.f32 1.0, %v5469_v63 }
 0xc1b   :  { %826 = vperm.xlu1 %5410, %v4774_v61   ;;  %5470 = vrcp.f32 %v803_v0 }
 0xc25   :  { %v5471_v2 = vpop.eup %5470 }
 0xc26   :  { %v807_v11 = vmul.f32 %v5471_v2, %v746_v10 }
 0xc89   :  { %v810_v3 = vpop.permute.xlu1 %809 }
 0xc8a   :  { %v812_v4 = vmul.f32 %v5471_v2, %v810_v3 }
 0xc8c   :  { %814 = vrot.lane.b32.xlu0 %v812_v4, %s5646_s25 }
 0xc9a   :  { %v5912_v20 = vpop.permute.xlu1 %826 }
 0xcfe   :  { %v815_v12 = vpop.permute.xlu0 %814 }
 0xcff   :  { %v817_v13 = vadd.f32 %v815_v12, %v807_v11 }
 0xd01   :  { %5472 = vtanh.f32 %v817_v13  ;;  %v839_v38 = vsub.f32 %v817_v13, %v746_v10 }
 0xd03   :  { %v840_v39 = vmul.f32 %v839_v38, %v5912_v20 }
 0xd05   :  { %v841_v40 = vadd.f32 %v840_v39, %v746_v10 }
 0xd0b   :  { %v5473_v15 = vpop.eup %5472 }
 0xd0c   :  { %820 = vrot.lane.b32.xlu0 %v5473_v15, %s5645_s6 }
 0xd7e   :  { %v821_v17 = vpop.permute.xlu0 %820 }
 0xd7f   :  { %v5909_v18 = vmul.f32 %v5471_v2, %v821_v17  ;;  %v4780_v2 = vld [vmem:[%s7243_s3 + $0x30] sm:$0xff] }
 0xd81   :  { %v836_v19 = vsub.f32 %v5909_v18, %v743_v50 }
 0xd83   :  { %v837_v21 = vmul.f32 %v836_v19, %v5912_v20 }
 0xd85   :  { %v838_v22 = vadd.f32 %v837_v21, %v743_v50 }
 0xd87   :  { %v846_v23 = vpack.c.bf16 %v838_v22, %v838_v22 }
 0xd89   :  { %848 = vrot.lane.b32.xlu1 %v846_v23, %s5646_s25 }
 0xdfb   :  { %v849_v24 = vpop.permute.xlu1 %848 }
 0xdfc   :  { %5089 = vmatmul.mubr.msk.bf16.vlgmr.msra.gmra.mrb[16].mxu1 %vm127_vm0, %v849_v24 }
 0xdfd   :  { %5101 = vmatpush3.bf16.msra.mxu1 %v5751_v5  ;;  %5104 = vmatprep.mubr.msk.bf16.mxu1 %vm5644_vm1, %v5643_v7  ;;  %v4777_v5 = vld [vmem:[%s7243_s3 + $0x28] sm:$0xff] }
 0xdfe   :  { %5102 = vmatprep.subr.bf16.mxu1 %v5643_v7 }
 0xe01   :  { %5103 = vmatpush3.bf16.msra.mxu1 %v5763_v8 }
 0xe02   :  { %5124 = vmatprep.subr.bf16.mxu1 %v5643_v7 }
 0xecf   :  { %v887_v27 = vpop.f32.mrb[16].mxu1 }
 0xed0   :  { %v894_v28 = vadd.f32 %v893_v26, %v887_v27  ;;  %v5090_v29 = vpop.f32.mrb[17].mxu1 }
 0xed1   :  { %v890_v30 = vpop.f32.mrb[18].mxu1 }
 0xed2   :  { %5474 = vtanh.f32 %v894_v28  ;;  %v5091_v31 = vpop.f32.mrb[19].mxu1  ;;  %v4779_v33 = vmul.f32 -1.442695, %v894_v28 }
 0xed3   :  { %v1035_v31 = vld [vmem:[#allocation4 + $0x1c] sm:$0xf] }
 0xed4   :  { %5476 = vpow2.f32 %v4779_v33 }
 0xedc   :  { %v5475_v32 = vpop.eup %5474 }
 0xedd   :  { %904 = vrot.lane.b32.xlu0 %v5475_v32, %s5645_s6  ;;  %v1083_v32 = vunpack.c.l.bf16 %v1035_v31 }
 0xede   :  { %v5477_v8 = vpop.eup %5476 }
 0xedf   :  { %v898_v34 = vadd.f32 1.0, %v5477_v8 }
 0xee1   :  { %921 = vperm.xlu0 %5411, %v4777_v5   ;;  %5478 = vrcp.f32 %v898_v34 }
 0xeeb   :  { %v5479_v35 = vpop.eup %5478 }
 0xeec   :  { %v902_v41 = vmul.f32 %v5479_v35, %v841_v40 }
 0xf4f   :  { %v905_v36 = vpop.permute.xlu0 %904 }
 0xf50   :  { %v907_v37 = vmul.f32 %v5479_v35, %v905_v36 }
 0xf52   :  { %909 = vrot.lane.b32.xlu1 %v907_v37, %s5646_s25  ;;  %v4783_v37 = vld [vmem:[%s7243_s3 + $0x38] sm:$0xff] }
 0xf60   :  { %v5933_v52 = vpop.permute.xlu0 %921 }
 0xfc4   :  { %v910_v42 = vpop.permute.xlu1 %909 }
 0xfc5   :  { %v912_v43 = vadd.f32 %v910_v42, %v902_v41 }
 0xfc7   :  { %5480 = vtanh.f32 %v912_v43  ;;  %v934_v12 = vsub.f32 %v912_v43, %v841_v40 }
 0xfc9   :  { %v935_v13 = vmul.f32 %v934_v12, %v5933_v52 }
 0xfcb   :  { %v936_v15 = vadd.f32 %v935_v13, %v841_v40 }
 0xfd1   :  { %v5481_v47 = vpop.eup %5480 }
 0xfd2   :  { %915 = vrot.lane.b32.xlu1 %v5481_v47, %s5645_s6 }
0x1044   :  { %v916_v48 = vpop.permute.xlu1 %915 }
0x1045   :  { %v5930_v50 = vmul.f32 %v5479_v35, %v916_v48 }
0x1047   :  { %v931_v51 = vsub.f32 %v5930_v50, %v838_v22 }
0x1049   :  { %v932_v53 = vmul.f32 %v931_v51, %v5933_v52 }
0x104b   :  { %v933_v54 = vadd.f32 %v932_v53, %v838_v22 }
0x104d   :  { %v941_v55 = vpack.c.bf16 %v933_v54, %v933_v54 }
0x104f   :  { %943 = vrot.lane.b32.xlu0 %v941_v55, %s5646_s25 }
0x10c1   :  { %v944_v56 = vpop.permute.xlu0 %943 }
0x10c2   :  { %5097 = vmatmul.mubr.msk.bf16.vlgmr.msra.gmra.mrb[20].mxu0 %vm127_vm0, %v944_v56  ;;  %v5966_v56 = vld [vmem:[%s7248_s8] sm:$0xff]  }
0x10c3   :  { %5112 = vmatprep.mubr.msk.bf16.mxu0 %vm5644_vm1, %v5643_v7  ;;  %5109 = vmatpush3.bf16.msra.mxu0 %v5966_v56 }
0x10c4   :  { %5110 = vmatprep.subr.bf16.mxu0 %v5643_v7 }
0x1195   :  { %v982_v58 = vpop.f32.mrb[20].mxu0 }
0x1196   :  { %v989_v60 = vadd.f32 %v988_v57, %v982_v58  ;;  %v5098_v61 = vpop.f32.mrb[21].mxu0  ;;  %v5973_v58 = vld [vmem:[%s7248_s8 + $0x8] sm:$0xff]  }
0x1197   :  { %v985_v62 = vpop.f32.mrb[22].mxu0  ;;  %5111 = vmatpush3.bf16.msra.mxu0 %v5973_v58  ;;  %v5988_v61 = vld [vmem:[%s7249_s9 + $0x8] sm:$0xff]  }
0x1198   :  { %5482 = vtanh.f32 %v989_v60  ;;  %v5099_v63 = vpop.f32.mrb[23].mxu0  ;;  %v4782_v3 = vmul.f32 -1.442695, %v989_v60  ;;  %v5980_v60 = vld [vmem:[%s7249_s9] sm:$0xff]   ;;  %5116 = vmatprep.subr.bf16.mxu0 %v5643_v7 }
0x119a   :  { %5484 = vpow2.f32 %v4782_v3  ;;  %5113 = vmatmul.mubr.bf16.vlgmr.msra.gmra.mrb[24].mxu0 %v5642_v1 }
0x119b   :  { %5117 = vmatpush3.bf16.msra.mxu0 %v5980_v60  ;;  %5120 = vmatprep.mubr.msk.bf16.mxu0 %vm5644_vm1, %v5643_v7 }
0x119c   :  { %5118 = vmatprep.subr.bf16.mxu0 %v5643_v7 }
0x119f   :  { %5119 = vmatpush3.bf16.msra.mxu0 %v5988_v61 }
0x11a0   :  { %5140 = vmatprep.subr.bf16.mxu0 %v5643_v7 }
0x11a2   :  { %v5483_v0 = vpop.eup %5482 }
0x11a3   :  { %999 = vrot.lane.b32.xlu1 %v5483_v0, %s5645_s6 }
0x11a4   :  { %v5485_v4 = vpop.eup %5484 }
0x11a5   :  { %v993_v6 = vadd.f32 1.0, %v5485_v4 }
0x11a7   :  { %1016 = vperm.xlu1 %5410, %v4780_v2   ;;  %5486 = vrcp.f32 %v993_v6 }
0x11b1   :  { %v5487_v9 = vpop.eup %5486 }
0x11b2   :  { %v997_v17 = vmul.f32 %v5487_v9, %v936_v15 }
0x1215   :  { %v1000_v10 = vpop.permute.xlu1 %999 }
0x1216   :  { %v1002_v11 = vmul.f32 %v5487_v9, %v1000_v10 }
0x1218   :  { %1004 = vrot.lane.b32.xlu0 %v1002_v11, %s5646_s25 }
0x1226   :  { %v5950_v26 = vpop.permute.xlu1 %1016 }
0x128a   :  { %v1005_v19 = vpop.permute.xlu0 %1004 }
0x128b   :  { %v1007_v21 = vadd.f32 %v1005_v19, %v997_v17 }
0x128d   :  { %5488 = vtanh.f32 %v1007_v21  ;;  %v1029_v47 = vsub.f32 %v1007_v21, %v936_v15 }
0x128f   :  { %v1030_v48 = vmul.f32 %v1029_v47, %v5950_v26 }
0x1291   :  { %v1031_v51 = vadd.f32 %v1030_v48, %v936_v15 }
0x1297   :  { %v5489_v22 = vpop.eup %5488 }
0x1298   :  { %1010 = vrot.lane.b32.xlu0 %v5489_v22, %s5645_s6 }
0x130a   :  { %v1011_v23 = vpop.permute.xlu0 %1010 }
0x130b   :  { %v5947_v24 = vmul.f32 %v5487_v9, %v1011_v23  ;;  %v1135_v9 = vld [vmem:[#allocation5] sm:$0xf] }
0x130c   :  { %v1188_v10 = vunpack.c.l.bf16 %v1135_v9 }
0x130d   :  { %v1026_v25 = vsub.f32 %v5947_v24, %v933_v54 }
0x130f   :  { %v1027_v27 = vmul.f32 %v1026_v25, %v5950_v26 }
0x1311   :  { %v1028_v28 = vadd.f32 %v1027_v27, %v933_v54 }
0x1313   :  { %v1036_v29 = vpack.c.bf16 %v1028_v28, %v1028_v28 }
0x1315   :  { %1038 = vrot.lane.b32.xlu1 %v1036_v29, %s5646_s25 }
0x1387   :  { %v1039_v30 = vpop.permute.xlu1 %1038 }
0x1388   :  { %5105 = vmatmul.mubr.msk.bf16.vlgmr.msra.gmra.mrb[20].mxu1 %vm127_vm0, %v1039_v30 }
0x1389   :  { %5128 = vmatprep.mubr.msk.bf16.mxu1 %vm5644_vm1, %v5643_v7 }
0x145b   :  { %v1077_v5 = vpop.f32.mrb[20].mxu1 }
0x145c   :  { %v1084_v33 = vadd.f32 %v1083_v32, %v1077_v5  ;;  %v5106_v8 = vpop.f32.mrb[21].mxu1 }
0x145d   :  { %v1080_v34 = vpop.f32.mrb[22].mxu1 }
0x145e   :  { %5490 = vtanh.f32 %v1084_v33  ;;  %v5107_v35 = vpop.f32.mrb[23].mxu1  ;;  %v4785_v38 = vmul.f32 -1.442695, %v1084_v33  ;;  %v639_v34 = vmul.f32 %v5870_v16, %v5867_v14  ;;  %v1019_v14 = vmul.f32 %v5950_v26, %v5947_v24 }
0x145f   :  { %v829_v35 = vmul.f32 %v5912_v20, %v5909_v18  ;;  %v734_v26 = vmul.f32 %v5891_v49, %v5888_v45 }
0x1460   :  { %5492 = vpow2.f32 %v4785_v38  ;;  %v544_v38 = vmul.f32 %v5848_v46, %v5844_v44 }
0x1468   :  { %v5491_v36 = vpop.eup %5490 }
0x1469   :  { %1094 = vrot.lane.b32.xlu0 %v5491_v36, %s5645_s6  ;;  %v6026_v36 = vld [vmem:[%s7250_s11] sm:$0xff]  }
0x146a   :  { %v5493_v39 = vpop.eup %5492  ;;  %5125 = vmatpush3.bf16.msra.mxu1 %v6026_v36 }
0x146b   :  { %v1088_v40 = vadd.f32 1.0, %v5493_v39  ;;  %5126 = vmatprep.subr.bf16.mxu1 %v5643_v7 }
0x146d   :  { %1111 = vperm.xlu0 %5411, %v4783_v37   ;;  %5494 = vrcp.f32 %v1088_v40  ;;  %v924_v40 = vmul.f32 %v5933_v52, %v5930_v50 }
0x1477   :  { %v5495_v41 = vpop.eup %5494 }
0x1478   :  { %v1092_v53 = vmul.f32 %v5495_v41, %v1031_v51 }
0x14db   :  { %v1095_v42 = vpop.permute.xlu0 %1094 }
0x14dc   :  { %v1097_v43 = vmul.f32 %v5495_v41, %v1095_v42 }
0x14de   :  { %1099 = vrot.lane.b32.xlu1 %v1097_v43, %s5646_s25 }
0x14ec   :  { %v5998_v0 = vpop.permute.xlu0 %1111 }
0x1550   :  { %v1100_v54 = vpop.permute.xlu1 %1099 }
0x1551   :  { %v1102_v55 = vadd.f32 %v1100_v54, %v1092_v53 }
0x1553   :  { %5496 = vtanh.f32 %v1102_v55  ;;  %v1124_v29 = vsub.f32 %v1102_v55, %v1031_v51 }
0x1555   :  { %v1125_v30 = vmul.f32 %v1124_v29, %v5998_v0 }
0x1557   :  { %v1126_v31 = vadd.f32 %v1125_v30, %v1031_v51 }
0x155d   :  { %v5497_v57 = vpop.eup %5496 }
0x155e   :  { %1105 = vrot.lane.b32.xlu1 %v5497_v57, %s5645_s6 }
0x15d0   :  { %v1106_v62 = vpop.permute.xlu1 %1105 }
0x15d1   :  { %v5995_v63 = vmul.f32 %v5495_v41, %v1106_v62 }
0x15d3   :  { %v1121_v1 = vsub.f32 %v5995_v63, %v1028_v28  ;;  %v1114_v44 = vmul.f32 %v5998_v0, %v5995_v63 }
0x15d5   :  { %v1122_v2 = vmul.f32 %v1121_v1, %v5998_v0 }
0x15d7   :  { %v1123_v3 = vadd.f32 %v1122_v2, %v1028_v28 }
0x15d9   :  { %v1190_v4 = vpack.c.bf16 %v1123_v3, %v1123_v3 }
0x15db   :  { %1192 = vrot.lane.b32.xlu0 %v1190_v4, %s5646_s25 }
0x164d   :  { %v1193_v6 = vpop.permute.xlu0 %1192 }
0x164e   :  { %5121 = vmatmul.mubr.msk.bf16.vlgmr.msra.gmra.mrb[24].mxu0 %vm127_vm0, %v1193_v6 }
0x164f   :  { %5141 = vmatpush3.bf16.msra.mxu0 %v5966_v56  ;;  %5144 = vmatprep.mubr.msk.bf16.mxu0 %vm5644_vm1, %v5643_v7 }
0x1650   :  { %5142 = vmatprep.subr.bf16.mxu0 %v5643_v7 }
0x1653   :  { %5143 = vmatpush3.bf16.msra.mxu0 %v5973_v58 }
0x1654   :  { %5148 = vmatprep.subr.bf16.mxu0 %v5643_v7 }
0x1721   :  { %v1243_v11 = vpop.f32.mrb[24].mxu0 }
0x1722   :  { %v5364_v12 = vadd.f32 %v1243_v11, %v1188_v10  ;;  %v5122_v13 = vpop.f32.mrb[25].mxu0 }
0x1723   :  { %v1246_v15 = vpop.f32.mrb[26].mxu0 }
0x1724   :  { %5498 = vtanh.f32 %v5364_v12  ;;  %v5123_v17 = vpop.f32.mrb[27].mxu0  ;;  %v4791_v21 = vmul.f32 -1.442695, %v5364_v12 }
0x1726   :  { %5500 = vpow2.f32 %v4791_v21 }
0x172e   :  { %v5499_v19 = vpop.eup %5498 }
0x172f   :  { %1259 = vrot.lane.b32.xlu1 %v5499_v19, %s5645_s6 }
0x1730   :  { %v5501_v22 = vpop.eup %5500 }
0x1731   :  { %v1253_v23 = vadd.f32 1.0, %v5501_v22 }
0x1733   :  { %5502 = vrcp.f32 %v1253_v23 }
0x173d   :  { %v5503_v25 = vpop.eup %5502 }
0x173e   :  { %v1257_v32 = vmul.f32 %v5503_v25, %v1126_v31 }
0x17a1   :  { %v1260_v27 = vpop.permute.xlu1 %1259 }
0x17a2   :  { %v1262_v28 = vmul.f32 %v5503_v25, %v1260_v27 }
0x17a4   :  { %1264 = vrot.lane.b32.xlu0 %v1262_v28, %s5646_s25 }
0x1816   :  { %v1265_v5 = vpop.permute.xlu0 %1264 }
0x1817   :  { %v6012_v33 = vadd.f32 %v1265_v5, %v1257_v32 }
0x1819   :  { %5504 = vtanh.f32 %v6012_v33 }
0x1823   :  { %v5505_v8 = vpop.eup %5504 }
0x1824   :  { %1270 = vrot.lane.b32.xlu1 %v5505_v8, %s5645_s6 }
0x1828   :  { %455 = vrot.lane.b32.xlu1 %v5822_v59, %s5646_s25  ;;  %v6033_v59 = vld [vmem:[%s7250_s11 + $0x8] sm:$0xff]  }
0x1829   :  { %5127 = vmatpush3.bf16.msra.mxu1 %v6033_v59 }
0x182a   :  { %5132 = vmatprep.subr.bf16.mxu1 %v5643_v7 }
0x182c   :  { %641 = vrot.lane.b32.xlu1 %v639_v34, %s5646_s25 }
0x1830   :  { %831 = vrot.lane.b32.xlu1 %v829_v35, %s5646_s25 }
0x1834   :  { %1021 = vrot.lane.b32.xlu1 %v1019_v14, %s5646_s25 }
0x1896   :  { %v1271_v16 = vpop.permute.xlu1 %1270 }
0x1897   :  { %v1273_v18 = vmul.f32 %v5503_v25, %v1271_v16  ;;  %v1374_v25 = vlaneseq }
0x1899   :  { %v1274_v20 = vpack.c.bf16 %v1273_v18, %v1273_v18  ;;  %v1375_v27 = vand.u32 127, %v1374_v25  ;;  %v6110_v28 = vshrl.u32 %v1374_v25, 7 }
0x189a   :  { %v456_v37 = vpop.permute.xlu1 %455 }
0x189b   :  { %458 = vst.msk [vmem:[#allocation2] sm:$0xff] %vm127_vm0, %v456_v37  ;;  %1276 = vrot.lane.b32.xlu0 %v1274_v20, %s5646_s25  ;;  %v6113_v29 = vsub.s32 %v1375_v27, %v6110_v28  ;;  %v6141_v25 = vsub.s32 1, %v6110_v28  ;;  %v6144_v27 = vsub.s32 0, %v6110_v28 }
0x189e   :  { %v642_v24 = vpop.permute.xlu1 %641 }
0x189f   :  { %645 = vst.msk [vmem:[#allocation2 + $0x10] sm:$0xff] %vm127_vm0, %v642_v24  ;;  %546 = vrot.lane.b32.xlu0 %v544_v38, %s5646_s25 }
0x18a2   :  { %v832_v39 = vpop.permute.xlu1 %831  ;;  %v6068_v42 = vld [vmem:[#allocation2] sm:$0xff] }
0x18a3   :  { %835 = vst.msk [vmem:[#allocation2 + $0x20] sm:$0xff] %vm127_vm0, %v832_v39  ;;  %736 = vrot.lane.b32.xlu0 %v734_v26, %s5646_s25 }
0x18a6   :  { %v1022_v41 = vpop.permute.xlu1 %1021  ;;  %v6078_v54 = vld [vmem:[#allocation2 + $0x10] sm:$0xff] }
0x18a7   :  { %1025 = vst.msk [vmem:[#allocation2 + $0x30] sm:$0xff] %vm127_vm0, %v1022_v41  ;;  %926 = vrot.lane.b32.xlu0 %v924_v40, %s5646_s25  ;;  %v6128_v40 = vld [vmem:[%s7251_s2] sm:$0xff] }
0x18a8   :  { %vm1365_vm9 = vcmp.gt.f32.partialorder %v6128_v40, 0.5 }
0x18aa   :  { %v6088_v3 = vld [vmem:[#allocation2 + $0x20] sm:$0xff] }
0x18ab   :  { %1116 = vrot.lane.b32.xlu0 %v1114_v44, %s5646_s25 }
0x18ae   :  { %v6098_v12 = vld [vmem:[#allocation2 + $0x30] sm:$0xff] }
0x190d   :  { %v6058_v46 = vpop.permute.xlu0 %1276 }
0x190e   :  { %5129 = vmatmul.mubr.msk.bf16.vlgmr.msra.gmra.mrb[24].mxu1 %vm127_vm0, %v6058_v46 }
0x190f   :  { %5136 = vmatprep.mubr.msk.bf16.mxu1 %vm5644_vm1, %v5643_v7 }
0x1911   :  { %v547_v45 = vpop.permute.xlu0 %546 }
0x1912   :  { %550 = vst.msk [vmem:[#allocation2 + $0x8] sm:$0xff] %vm127_vm0, %v547_v45 }
0x1915   :  { %v737_v49 = vpop.permute.xlu0 %736 }
0x1916   :  { %740 = vst.msk [vmem:[#allocation2 + $0x18] sm:$0xff] %vm127_vm0, %v737_v49 }
0x1919   :  { %v927_v50 = vpop.permute.xlu0 %926  ;;  %v6070_v43 = vld [vmem:[#allocation2 + $0x8] sm:$0xff] }
0x191a   :  { %930 = vst.msk [vmem:[#allocation2 + $0x28] sm:$0xff] %vm127_vm0, %v927_v50 }
0x191d   :  { %v1117_v52 = vpop.permute.xlu0 %1116  ;;  %v6080_v55 = vld [vmem:[#allocation2 + $0x18] sm:$0xff] }
0x191e   :  { %1120 = vst.msk [vmem:[#allocation2 + $0x38] sm:$0xff] %vm127_vm0, %v1117_v52 }
0x1921   :  { %v6090_v4 = vld [vmem:[#allocation2 + $0x28] sm:$0xff] }
0x1925   :  { %v6100_v13 = vld [vmem:[#allocation2 + $0x38] sm:$0xff] }
0x19e1   :  { %v6072_v47 = vpop.f32.mrb[24].mxu1 }
0x19e2   :  { %v5130_v48 = vpop.f32.mrb[25].mxu1  ;;  %v1334_v51 = vmul.f32 %v6072_v47, %v6070_v43  ;;  %v1333_v53 = vmul.f32 %v6072_v47, %v6068_v42  ;;  %v1335_v0 = vmul.f32 %v6072_v47, %v6078_v54  ;;  %v1336_v2 = vmul.f32 %v6072_v47, %v6080_v55 }
0x19e3   :  { %v1330_v57 = vpop.f32.mrb[26].mxu1  ;;  %v1337_v10 = vmul.f32 %v6072_v47, %v6088_v3  ;;  %v1338_v11 = vmul.f32 %v6072_v47, %v6090_v4  ;;  %v1339_v19 = vmul.f32 %v6072_v47, %v6098_v12  ;;  %v1340_v21 = vmul.f32 %v6072_v47, %v6100_v13 }
0x19e4   :  { %v5131_v62 = vpop.f32.mrb[27].mxu1  ;;  %v1344_v63 = vsel %vm127_vm0, %v1334_v51, 0.0  ;;  %v1341_v1 = vsel %vm127_vm0, %v1333_v53, 0.0  ;;  %v1347_v6 = vsel %vm127_vm0, %v1335_v0, 0.0  ;;  %v1350_v9 = vsel %vm127_vm0, %v1336_v2, 0.0 }
0x19e5   :  { %1345 = vadd.xlane.f32.xlu0 %v1344_v63  ;;  %1342 = vadd.xlane.f32.xlu1 %v1341_v1  ;;  %v1353_v15 = vsel %vm127_vm0, %v1337_v10, 0.0  ;;  %v1356_v17 = vsel %vm127_vm0, %v1338_v11, 0.0  ;;  %v1359_v22 = vsel %vm127_vm0, %v1339_v19, 0.0  ;;  %v1362_v23 = vsel %vm127_vm0, %v1340_v21, 0.0 }
0x19e9   :  { %1348 = vadd.xlane.f32.xlu0 %v1347_v6  ;;  %1351 = vadd.xlane.f32.xlu1 %v1350_v9 }
0x19ed   :  { %1354 = vadd.xlane.f32.xlu0 %v1353_v15  ;;  %1357 = vadd.xlane.f32.xlu1 %v1356_v17 }
0x19f1   :  { %1360 = vadd.xlane.f32.xlu0 %v1359_v22  ;;  %1363 = vadd.xlane.f32.xlu1 %v1362_v23 }
0x1a72   :  { %v1346_v30 = vpop.xlane.xlu0 %1345  ;;  %v1343_v31 = vpop.xlane.xlu1 %1342 }
0x1a73   :  { %v1383_v32 = vrot.slane %v1346_v30, %v6113_v29  ;;  %v1379_v5 = vrot.slane %v1343_v31, %v6113_v29 }
0x1a75   :  { %v1409_v14 = vsel %vm1408_vm2, %v1383_v32, %v1379_v5 }
0x1a76   :  { %v1349_v8 = vpop.xlane.xlu0 %1348  ;;  %v1352_v34 = vpop.xlane.xlu1 %1351 }
0x1a77   :  { %v1387_v35 = vrot.slane %v1349_v8, %v6113_v29  ;;  %v1391_v16 = vrot.slane %v1352_v34, %v6113_v29  ;;  %v6153_v8 = vsub.s32 2, %v6110_v28  ;;  %v6156_v34 = vsub.s32 3, %v6110_v28 }
0x1a79   :  { %v1411_v18 = vsel %vm1410_vm3, %v1387_v35, %v1409_v14  ;;  %v6161_v35 = vld [vmem:[%s7252_s12] sm:$0xff]  }
0x1a7a   :  { %v1355_v20 = vpop.xlane.xlu0 %1354  ;;  %v1358_v37 = vpop.xlane.xlu1 %1357  ;;  %v1413_v24 = vsel %vm1412_vm4, %v1391_v16, %v1411_v18  ;;  %v6168_v18 = vsub.s32 4, %v6110_v28  ;;  %5133 = vmatpush3.bf16.msra.mxu1 %v6161_v35 }
0x1a7b   :  { %v1395_v38 = vrot.slane %v1355_v20, %v6113_v29  ;;  %v1399_v26 = vrot.slane %v1358_v37, %v6113_v29  ;;  %v6171_v20 = vsub.s32 5, %v6110_v28  ;;  %v6177_v37 = vld [vmem:[%s7252_s12 + $0x8] sm:$0xff]   ;;  %5134 = vmatprep.subr.bf16.mxu1 %v5643_v7 }
0x1a7d   :  { %v1415_v39 = vsel %vm1414_vm5, %v1395_v38, %v1413_v24 }
0x1a7e   :  { %v1361_v41 = vpop.xlane.xlu0 %1360  ;;  %v1364_v44 = vpop.xlane.xlu1 %1363  ;;  %v1417_v50 = vsel %vm1416_vm6, %v1399_v26, %v1415_v39  ;;  %v6185_v26 = vsub.s32 6, %v6110_v28  ;;  %v6188_v39 = vsub.s32 7, %v6110_v28  ;;  %5135 = vmatpush3.bf16.msra.mxu1 %v6177_v37 }
0x1a7f   :  { %v1403_v45 = vrot.slane %v1361_v41, %v6113_v29  ;;  %v1407_v49 = vrot.slane %v1364_v44, %v6113_v29  ;;  %5156 = vmatprep.subr.bf16.mxu1 %v5643_v7 }
0x1a81   :  { %v1419_v52 = vsel %vm1418_vm7, %v1403_v45, %v1417_v50 }
0x1a82   :  { %v1421_v48 = vsel %vm1420_vm8, %v1407_v49, %v1419_v52 }
0x1a83   :  { %v1423_v51 = vsel %vm1365_vm9, %v1421_v48, -1e+30 }
0x1a84   :  { %v1425_v53 = vsel %vm1424_vm10, %v1423_v51, -inf }
0x1a85   :  { %v1426_v57 = vrot.slane %v1425_v53, 4 }
0x1a87   :  { %v1427_v62 = vmax.f32 %v1425_v53, %v1426_v57 }
0x1a89   :  { %v1428_v63 = vrot.slane %v1427_v62, 2 }
0x1a8b   :  { %v1429_v1 = vmax.f32 %v1427_v62, %v1428_v63 }
0x1a8d   :  { %v1430_v0 = vrot.slane %v1429_v1, 1 }
0x1a8f   :  { %v1431_v2 = vmax.f32 %v1429_v1, %v1430_v0 }
0x1a91   :  { %v1432_v6 = vsub.f32 %v1423_v51, %v1431_v2 }
0x1a93   :  { %v1433_v9 = vmul.f32 1.442695, %v1432_v6 }
0x1a95   :  { %5506 = vpow2.f32 %v1433_v9 }
0x1a9f   :  { %v5507_v10 = vpop.eup %5506 }
0x1aa0   :  { %v1435_v11 = vsel %vm1424_vm10, %v5507_v10, 0.0 }
0x1aa1   :  { %v1436_v15 = vrot.slane %v1435_v11, 4 }
0x1aa3   :  { %v1437_v17 = vadd.f32 %v1436_v15, %v1435_v11 }
0x1aa5   :  { %v1438_v19 = vrot.slane %v1437_v17, 2 }
0x1aa7   :  { %v1439_v21 = vadd.f32 %v1438_v19, %v1437_v17 }
0x1aa9   :  { %v1440_v22 = vrot.slane %v1439_v21, 1 }
0x1aab   :  { %v1441_v23 = vadd.f32 %v1440_v22, %v1439_v21 }
0x1aad   :  { %5508 = vrcp.f32 %v1441_v23 }
0x1ab7   :  { %v5509_v30 = vpop.eup %5508 }
0x1ab8   :  { %v6146_v31 = vmul.f32 %v5509_v30, %v5507_v10 }
0x1aba   :  { %v1454_v32 = vrot.slane %v6146_v31, %v6141_v25  ;;  %v1447_v5 = vrot.slane %v6146_v31, %v6144_v27  ;;  %v1461_v14 = vrot.slane %v6146_v31, %v6153_v8  ;;  %v1468_v16 = vrot.slane %v6146_v31, %v6156_v34 }
0x1abb   :  { %v1475_v38 = vrot.slane %v6146_v31, %v6168_v18  ;;  %v1482_v24 = vrot.slane %v6146_v31, %v6171_v20  ;;  %v1489_v41 = vrot.slane %v6146_v31, %v6185_v26  ;;  %v1496_v44 = vrot.slane %v6146_v31, %v6188_v39 }
0x1abc   :  { %1456 = vbcast.lane.b32.xlu1 %v1454_v32, 256  ;;  %1449 = vbcast.lane.b32.xlu0 %v1447_v5, 256 }
0x1ac0   :  { %1463 = vbcast.lane.b32.xlu1 %v1461_v14, 256  ;;  %1470 = vbcast.lane.b32.xlu0 %v1468_v16, 256 }
0x1ac4   :  { %1477 = vbcast.lane.b32.xlu1 %v1475_v38, 256  ;;  %1484 = vbcast.lane.b32.xlu0 %v1482_v24, 256 }
0x1ac8   :  { %1491 = vbcast.lane.b32.xlu1 %v1489_v41, 256  ;;  %1498 = vbcast.lane.b32.xlu0 %v1496_v44, 256 }
0x1acc   :  { %1537 = vrot.lane.b32.xlu1 %v6072_v47, %s5647_s17 }
0x1b2e   :  { %v1457_v28 = vpop.permute.xlu1 %1456  ;;  %v1450_v45 = vpop.permute.xlu0 %1449 }
0x1b2f   :  { %v1501_v49 = vmul.f32 %v1457_v28, %v6070_v43  ;;  %v1500_v50 = vmul.f32 %v1450_v45, %v6068_v42 }
0x1b31   :  { %v1509_v52 = vsel %vm127_vm0, %v1501_v49, 0.0  ;;  %v1508_v48 = vsel %vm127_vm0, %v1500_v50, 0.0 }
0x1b32   :  { %v1464_v51 = vpop.permute.xlu1 %1463  ;;  %v1471_v53 = vpop.permute.xlu0 %1470  ;;  %v1510_v63 = vadd.f32 %v1509_v52, %v1508_v48 }
0x1b33   :  { %v1502_v57 = vmul.f32 %v1464_v51, %v6078_v54  ;;  %v1503_v62 = vmul.f32 %v1471_v53, %v6080_v55  ;;  %v6237_v51 = vld [vmem:[#allocation5 + $0x4] sm:$0xff]  }
0x1b34   :  { %v1664_v53 = vunpack.c.l.bf16 %v6237_v51 }
0x1b35   :  { %v1511_v1 = vsel %vm127_vm0, %v1502_v57, 0.0  ;;  %v1513_v6 = vsel %vm127_vm0, %v1503_v62, 0.0 }
0x1b36   :  { %v1512_v47 = vadd.f32 %v1511_v1, %v1510_v63  ;;  %v1478_v0 = vpop.permute.xlu1 %1477  ;;  %v1485_v2 = vpop.permute.xlu0 %1484 }
0x1b37   :  { %v1504_v9 = vmul.f32 %v1478_v0, %v6088_v3  ;;  %v1505_v10 = vmul.f32 %v1485_v2, %v6090_v4 }
0x1b38   :  { %v1514_v11 = vadd.f32 %v1513_v6, %v1512_v47 }
0x1b39   :  { %v1515_v15 = vsel %vm127_vm0, %v1504_v9, 0.0  ;;  %v1517_v22 = vsel %vm127_vm0, %v1505_v10, 0.0 }
0x1b3a   :  { %v1516_v17 = vadd.f32 %v1515_v15, %v1514_v11  ;;  %v1492_v19 = vpop.permute.xlu1 %1491  ;;  %v1499_v21 = vpop.permute.xlu0 %1498 }
0x1b3b   :  { %v1506_v23 = vmul.f32 %v1492_v19, %v6098_v12  ;;  %v1507_v30 = vmul.f32 %v1499_v21, %v6100_v13 }
0x1b3c   :  { %v1518_v32 = vadd.f32 %v1517_v22, %v1516_v17 }
0x1b3d   :  { %v1519_v5 = vsel %vm127_vm0, %v1506_v23, 0.0  ;;  %v1521_v16 = vsel %vm127_vm0, %v1507_v30, 0.0 }
0x1b3e   :  { %v1520_v14 = vadd.f32 %v1519_v5, %v1518_v32  ;;  %v1538_v41 = vpop.permute.xlu1 %1537 }
0x1b40   :  { %v1522_v38 = vadd.f32 %v1521_v16, %v1520_v14 }
0x1b42   :  { %v1523_v24 = vpack.c.bf16 %v1522_v38, %v1522_v38 }
0x1b44   :  { %5137 = vmatmul.mubr.msk.bf16.vlgmr.msra.gmra.mrb[28].mxu1 %vm127_vm0, %v1523_v24 }
0x1b45   :  { %5157 = vmatpush3.bf16.msra.mxu1 %v6026_v36  ;;  %5160 = vmatprep.mubr.msk.bf16.mxu1 %vm5644_vm1, %v5643_v7 }
0x1b46   :  { %5158 = vmatprep.subr.bf16.mxu1 %v5643_v7 }
0x1b49   :  { %5159 = vmatpush3.bf16.msra.mxu1 %v6033_v59 }
0x1b4a   :  { %5164 = vmatprep.subr.bf16.mxu1 %v5643_v7 }
0x1c17   :  { %v1577_v44 = vpop.f32.mrb[28].mxu1 }
0x1c18   :  { %v1578_v28 = vadd.f32 %v1577_v44, %v1538_v41  ;;  %v5138_v45 = vpop.f32.mrb[29].mxu1 }
0x1c19   :  { %v1580_v49 = vpop.f32.mrb[30].mxu1 }
0x1c1a   :  { %5510 = vtanh.f32 %v1578_v28  ;;  %v5139_v50 = vpop.f32.mrb[31].mxu1 }
0x1c24   :  { %v5511_v52 = vpop.eup %5510 }
0x1c25   :  { %1584 = vst.msk [vmem:[#allocation3] sm:$0xff] %vm127_vm0, %v5511_v52  ;;  %v1620_v48 = vpack.c.bf16 %v5511_v52, %v5511_v52 }
0x1c27   :  { %5145 = vmatmul.mubr.msk.bf16.vlgmr.msra.gmra.mrb[28].mxu0 %vm127_vm0, %v1620_v48 }
0x1c28   :  { %5149 = vmatpush3.bf16.msra.mxu0 %v5980_v60  ;;  %5152 = vmatprep.mubr.msk.bf16.mxu0 %vm5644_vm1, %v5643_v7 }
0x1c29   :  { %5150 = vmatprep.subr.bf16.mxu0 %v5643_v7 }
0x1c2c   :  { %5151 = vmatpush3.bf16.msra.mxu0 %v5988_v61 }
0x1c2d   :  { %5172 = vmatprep.subr.bf16.mxu0 %v5643_v7 }
0x1c33   :  { %5153 = vmatmul.mubr.msk.bf16.vlgmr.msra.gmra.mrb[28].mxu0 %vm127_vm0, %v6058_v46 }
0x1c34   :  { %5173 = vmatpush3.bf16.msra.mxu0 %v5966_v56  ;;  %5176 = vmatprep.mubr.msk.bf16.mxu0 %vm5644_vm1, %v5643_v7 }
0x1c35   :  { %5174 = vmatprep.subr.bf16.mxu0 %v5643_v7 }
0x1c38   :  { %5175 = vmatpush3.bf16.msra.mxu0 %v5973_v58 }
0x1c39   :  { %5180 = vmatprep.subr.bf16.mxu0 %v5643_v7 }
0x1d06   :  { %v1700_v57 = vpop.f32.mrb[28].mxu0 }
0x1d07   :  { %v5365_v62 = vadd.f32 %v1700_v57, %v1664_v53  ;;  %v5154_v63 = vpop.f32.mrb[29].mxu0 }
0x1d08   :  { %v1703_v1 = vpop.f32.mrb[30].mxu0 }
0x1d09   :  { %5512 = vtanh.f32 %v5365_v62  ;;  %v5155_v46 = vpop.f32.mrb[31].mxu0  ;;  %v4800_v0 = vmul.f32 -1.442695, %v5365_v62 }
0x1d0b   :  { %5514 = vpow2.f32 %v4800_v0 }
0x1d13   :  { %v5513_v47 = vpop.eup %5512 }
0x1d14   :  { %1716 = vrot.lane.b32.xlu0 %v5513_v47, %s5645_s6 }
0x1d15   :  { %v5515_v2 = vpop.eup %5514 }
0x1d16   :  { %v1710_v6 = vadd.f32 1.0, %v5515_v2 }
0x1d18   :  { %5516 = vrcp.f32 %v1710_v6 }
0x1d22   :  { %v5517_v9 = vpop.eup %5516 }
0x1d23   :  { %v1714_v15 = vmul.f32 %v5517_v9, %v6012_v33 }
0x1d86   :  { %v1717_v10 = vpop.permute.xlu0 %1716 }
0x1d87   :  { %v1719_v11 = vmul.f32 %v5517_v9, %v1717_v10 }
0x1d89   :  { %1721 = vrot.lane.b32.xlu1 %v1719_v11, %s5646_s25 }
0x1dfb   :  { %v1722_v17 = vpop.permute.xlu1 %1721 }
0x1dfc   :  { %v6243_v19 = vadd.f32 %v1722_v17, %v1714_v15 }
0x1dfe   :  { %5518 = vtanh.f32 %v6243_v19 }
0x1e08   :  { %v5519_v21 = vpop.eup %5518 }
0x1e09   :  { %1727 = vrot.lane.b32.xlu0 %v5519_v21, %s5645_s6 }
0x1e7b   :  { %v1728_v22 = vpop.permute.xlu0 %1727 }
0x1e7c   :  { %v1730_v23 = vmul.f32 %v5517_v9, %v1728_v22 }
0x1e7e   :  { %v1731_v30 = vpack.c.bf16 %v1730_v23, %v1730_v23 }
0x1e80   :  { %1733 = vrot.lane.b32.xlu1 %v1731_v30, %s5646_s25 }
0x1ef2   :  { %v6248_v32 = vpop.permute.xlu1 %1733 }
0x1ef3   :  { %5161 = vmatmul.mubr.msk.bf16.vlgmr.msra.gmra.mrb[32].mxu1 %vm127_vm0, %v6248_v32 }
0x1ef4   :  { %5165 = vmatpush3.bf16.msra.mxu1 %v6161_v35  ;;  %5168 = vmatprep.mubr.msk.bf16.mxu1 %vm5644_vm1, %v5643_v7 }
0x1ef5   :  { %5166 = vmatprep.subr.bf16.mxu1 %v5643_v7 }
0x1ef8   :  { %5167 = vmatpush3.bf16.msra.mxu1 %v6177_v37 }
0x1ef9   :  { %5188 = vmatprep.subr.bf16.mxu1 %v5643_v7 }
0x1fc6   :  { %v6258_v33 = vpop.f32.mrb[32].mxu1 }
0x1fc7   :  { %v5162_v5 = vpop.f32.mrb[33].mxu1  ;;  %v1779_v14 = vmul.f32 %v6258_v33, %v6070_v43  ;;  %v1778_v16 = vmul.f32 %v6258_v33, %v6068_v42  ;;  %v1782_v28 = vmul.f32 %v6258_v33, %v6088_v3  ;;  %v1780_v45 = vmul.f32 %v6258_v33, %v6078_v54 }
0x1fc8   :  { %v1775_v38 = vpop.f32.mrb[34].mxu1  ;;  %v1784_v52 = vmul.f32 %v6258_v33, %v6098_v12  ;;  %v1781_v48 = vmul.f32 %v6258_v33, %v6080_v55  ;;  %v1783_v62 = vmul.f32 %v6258_v33, %v6090_v4  ;;  %v1785_v1 = vmul.f32 %v6258_v33, %v6100_v13 }
0x1fc9   :  { %v5163_v24 = vpop.f32.mrb[35].mxu1  ;;  %v1789_v41 = vsel %vm127_vm0, %v1779_v14, 0.0  ;;  %v1786_v44 = vsel %vm127_vm0, %v1778_v16, 0.0  ;;  %v1798_v49 = vsel %vm127_vm0, %v1782_v28, 0.0  ;;  %v1792_v50 = vsel %vm127_vm0, %v1780_v45, 0.0 }
0x1fca   :  { %1790 = vadd.xlane.f32.xlu1 %v1789_v41  ;;  %1787 = vadd.xlane.f32.xlu0 %v1786_v44  ;;  %v1804_v53 = vsel %vm127_vm0, %v1784_v52, 0.0  ;;  %v1795_v57 = vsel %vm127_vm0, %v1781_v48, 0.0  ;;  %v1801_v63 = vsel %vm127_vm0, %v1783_v62, 0.0  ;;  %v1807_v46 = vsel %vm127_vm0, %v1785_v1, 0.0 }
0x1fce   :  { %1799 = vadd.xlane.f32.xlu1 %v1798_v49  ;;  %1793 = vadd.xlane.f32.xlu0 %v1792_v50 }
0x1fd2   :  { %1805 = vadd.xlane.f32.xlu1 %v1804_v53  ;;  %1796 = vadd.xlane.f32.xlu0 %v1795_v57 }
0x1fd6   :  { %1802 = vadd.xlane.f32.xlu0 %v1801_v63 }
0x1fda   :  { %1808 = vadd.xlane.f32.xlu0 %v1807_v46 }
0x2057   :  { %v1788_v47 = vpop.xlane.xlu0 %1787  ;;  %v1791_v0 = vpop.xlane.xlu1 %1790 }
0x2058   :  { %v1825_v6 = vrot.slane %v1791_v0, %v6113_v29  ;;  %v1821_v9 = vrot.slane %v1788_v47, %v6113_v29 }
0x205a   :  { %v1850_v17 = vsel %vm1408_vm2, %v1825_v6, %v1821_v9 }
0x205b   :  { %v1794_v2 = vpop.xlane.xlu0 %1793  ;;  %v1800_v11 = vpop.xlane.xlu1 %1799 }
0x205c   :  { %v1829_v10 = vrot.slane %v1794_v2, %v6113_v29  ;;  %v1837_v30 = vrot.slane %v1800_v11, %v6113_v29 }
0x205e   :  { %v1851_v22 = vsel %vm1410_vm3, %v1829_v10, %v1850_v17 }
0x205f   :  { %v1797_v15 = vpop.xlane.xlu0 %1796  ;;  %v1806_v14 = vpop.xlane.xlu1 %1805 }
0x2060   :  { %v1833_v21 = vrot.slane %v1797_v15, %v6113_v29  ;;  %v1845_v41 = vrot.slane %v1806_v14, %v6113_v29 }
0x2062   :  { %v1852_v23 = vsel %vm1412_vm4, %v1833_v21, %v1851_v22 }
0x2063   :  { %v1803_v5 = vpop.xlane.xlu0 %1802  ;;  %v1853_v38 = vsel %vm1414_vm5, %v1837_v30, %v1852_v23 }
0x2064   :  { %v1841_v16 = vrot.slane %v1803_v5, %v6113_v29 }
0x2066   :  { %v1854_v24 = vsel %vm1416_vm6, %v1841_v16, %v1853_v38 }
0x2067   :  { %v1809_v44 = vpop.xlane.xlu0 %1808  ;;  %v1855_v45 = vsel %vm1418_vm7, %v1845_v41, %v1854_v24 }
0x2068   :  { %v1849_v28 = vrot.slane %v1809_v44, %v6113_v29 }
0x206a   :  { %v1856_v49 = vsel %vm1420_vm8, %v1849_v28, %v1855_v45 }
0x206b   :  { %v1858_v50 = vsel %vm1365_vm9, %v1856_v49, -1e+30 }
0x206c   :  { %v1859_v52 = vsel %vm1424_vm10, %v1858_v50, -inf }
0x206d   :  { %v1860_v48 = vrot.slane %v1859_v52, 4 }
0x206f   :  { %v1861_v53 = vmax.f32 %v1859_v52, %v1860_v48 }
0x2071   :  { %v1862_v57 = vrot.slane %v1861_v53, 2 }
0x2073   :  { %v1863_v62 = vmax.f32 %v1861_v53, %v1862_v57 }
0x2075   :  { %v1864_v63 = vrot.slane %v1863_v62, 1 }
0x2077   :  { %v1865_v1 = vmax.f32 %v1863_v62, %v1864_v63 }
0x2079   :  { %v1866_v46 = vsub.f32 %v1858_v50, %v1865_v1 }
0x207b   :  { %v1867_v47 = vmul.f32 1.442695, %v1866_v46 }
0x207d   :  { %5520 = vpow2.f32 %v1867_v47 }
0x2087   :  { %v5521_v0 = vpop.eup %5520 }
0x2088   :  { %v1869_v2 = vsel %vm1424_vm10, %v5521_v0, 0.0 }
0x2089   :  { %v1870_v6 = vrot.slane %v1869_v2, 4 }
0x208b   :  { %v1871_v9 = vadd.f32 %v1870_v6, %v1869_v2 }
0x208d   :  { %v1872_v10 = vrot.slane %v1871_v9, 2 }
0x208f   :  { %v1873_v11 = vadd.f32 %v1872_v10, %v1871_v9 }
0x2091   :  { %v1874_v15 = vrot.slane %v1873_v11, 1 }
0x2093   :  { %v1875_v17 = vadd.f32 %v1874_v15, %v1873_v11 }
0x2095   :  { %5522 = vrcp.f32 %v1875_v17 }
0x209f   :  { %v5523_v21 = vpop.eup %5522 }
0x20a0   :  { %v6303_v22 = vmul.f32 %v5523_v21, %v5521_v0 }
0x20a2   :  { %v1888_v23 = vrot.slane %v6303_v22, %v6141_v25  ;;  %v1881_v30 = vrot.slane %v6303_v22, %v6144_v27  ;;  %v1909_v5 = vrot.slane %v6303_v22, %v6168_v18  ;;  %v1895_v14 = vrot.slane %v6303_v22, %v6153_v8 }
0x20a3   :  { %v1923_v16 = vrot.slane %v6303_v22, %v6185_v26  ;;  %v1902_v38 = vrot.slane %v6303_v22, %v6156_v34  ;;  %v1916_v24 = vrot.slane %v6303_v22, %v6171_v20  ;;  %v1930_v41 = vrot.slane %v6303_v22, %v6188_v39 }
0x20a4   :  { %1890 = vbcast.lane.b32.xlu0 %v1888_v23, 256  ;;  %1883 = vbcast.lane.b32.xlu1 %v1881_v30, 256 }
0x20a8   :  { %1911 = vbcast.lane.b32.xlu0 %v1909_v5, 256  ;;  %1897 = vbcast.lane.b32.xlu1 %v1895_v14, 256 }
0x20ac   :  { %1925 = vbcast.lane.b32.xlu0 %v1923_v16, 256  ;;  %1904 = vbcast.lane.b32.xlu1 %v1902_v38, 256 }
0x20b0   :  { %1959 = vrot.lane.b32.xlu0 %v6258_v33, %s5647_s17  ;;  %1918 = vbcast.lane.b32.xlu1 %v1916_v24, 256 }
0x20b4   :  { %1932 = vbcast.lane.b32.xlu1 %v1930_v41, 256 }
0x2116   :  { %v1891_v44 = vpop.permute.xlu0 %1890  ;;  %v1884_v28 = vpop.permute.xlu1 %1883 }
0x2117   :  { %v1935_v45 = vmul.f32 %v1891_v44, %v6070_v43  ;;  %v1934_v49 = vmul.f32 %v1884_v28, %v6068_v42 }
0x2119   :  { %v1943_v48 = vsel %vm127_vm0, %v1935_v45, 0.0  ;;  %v1942_v53 = vsel %vm127_vm0, %v1934_v49, 0.0 }
0x211a   :  { %v1912_v50 = vpop.permute.xlu0 %1911  ;;  %v1898_v52 = vpop.permute.xlu1 %1897  ;;  %v1944_v62 = vadd.f32 %v1943_v48, %v1942_v53 }
0x211b   :  { %v1936_v57 = vmul.f32 %v1898_v52, %v6078_v54  ;;  %v1938_v1 = vmul.f32 %v1912_v50, %v6088_v3 }
0x211d   :  { %v1945_v33 = vsel %vm127_vm0, %v1936_v57, 0.0  ;;  %v1949_v10 = vsel %vm127_vm0, %v1938_v1, 0.0 }
0x211e   :  { %v1905_v63 = vpop.permute.xlu1 %1904  ;;  %v1946_v47 = vadd.f32 %v1945_v33, %v1944_v62  ;;  %v1926_v0 = vpop.permute.xlu0 %1925 }
0x211f   :  { %v1937_v46 = vmul.f32 %v1905_v63, %v6080_v55  ;;  %v1940_v11 = vmul.f32 %v1926_v0, %v6098_v12 }
0x2121   :  { %v1947_v2 = vsel %vm127_vm0, %v1937_v46, 0.0  ;;  %v1953_v5 = vsel %vm127_vm0, %v1940_v11, 0.0 }
0x2122   :  { %v1948_v6 = vadd.f32 %v1947_v2, %v1946_v47  ;;  %v1919_v9 = vpop.permute.xlu1 %1918  ;;  %v1960_v44 = vpop.permute.xlu0 %1959 }
0x2123   :  { %v1939_v15 = vmul.f32 %v1919_v9, %v6090_v4 }
0x2124   :  { %v1950_v17 = vadd.f32 %v1949_v10, %v1948_v6 }
0x2125   :  { %v1951_v21 = vsel %vm127_vm0, %v1939_v15, 0.0 }
0x2126   :  { %v1952_v23 = vadd.f32 %v1951_v21, %v1950_v17  ;;  %v1933_v30 = vpop.permute.xlu1 %1932 }
0x2127   :  { %v1941_v14 = vmul.f32 %v1933_v30, %v6100_v13 }
0x2128   :  { %v1954_v16 = vadd.f32 %v1953_v5, %v1952_v23 }
0x2129   :  { %v1955_v38 = vsel %vm127_vm0, %v1941_v14, 0.0 }
0x212a   :  { %v1956_v24 = vadd.f32 %v1955_v38, %v1954_v16 }
0x212c   :  { %v1957_v41 = vpack.c.bf16 %v1956_v24, %v1956_v24 }
0x212e   :  { %5169 = vmatmul.mubr.msk.bf16.vlgmr.msra.gmra.mrb[36].mxu1 %vm127_vm0, %v1957_v41 }
0x212f   :  { %5189 = vmatpush3.bf16.msra.mxu1 %v6026_v36  ;;  %5192 = vmatprep.mubr.msk.bf16.mxu1 %vm5644_vm1, %v5643_v7 }
0x2130   :  { %5190 = vmatprep.subr.bf16.mxu1 %v5643_v7 }
0x2133   :  { %5191 = vmatpush3.bf16.msra.mxu1 %v6033_v59 }
0x2134   :  { %5196 = vmatprep.subr.bf16.mxu1 %v5643_v7 }
0x2201   :  { %v1999_v28 = vpop.f32.mrb[36].mxu1 }
0x2202   :  { %v2000_v45 = vadd.f32 %v1999_v28, %v1960_v44  ;;  %v5170_v49 = vpop.f32.mrb[37].mxu1 }
0x2203   :  { %v2002_v50 = vpop.f32.mrb[38].mxu1 }
0x2204   :  { %5524 = vtanh.f32 %v2000_v45  ;;  %v5171_v52 = vpop.f32.mrb[39].mxu1 }
0x220e   :  { %v5525_v48 = vpop.eup %5524 }
0x220f   :  { %2007 = vst.msk [vmem:[#allocation3 + $0x8] sm:$0xff] %vm127_vm0, %v5525_v48  ;;  %v2044_v36 = vpack.c.bf16 %v5525_v48, %v5525_v48 }
0x2211   :  { %5177 = vmatmul.mubr.msk.bf16.vlgmr.msra.gmra.mrb[32].mxu0 %vm127_vm0, %v2044_v36 }
0x2212   :  { %5181 = vmatpush3.bf16.msra.mxu0 %v5980_v60  ;;  %5184 = vmatprep.mubr.msk.bf16.mxu0 %vm5644_vm1, %v5643_v7  ;;  %v2088_v60 = vunpack.c.h.bf16 %v6237_v51 }
0x2213   :  { %5182 = vmatprep.subr.bf16.mxu0 %v5643_v7 }
0x2216   :  { %5183 = vmatpush3.bf16.msra.mxu0 %v5988_v61 }
0x2217   :  { %5204 = vmatprep.subr.bf16.mxu0 %v5643_v7 }
0x221d   :  { %5185 = vmatmul.mubr.msk.bf16.vlgmr.msra.gmra.mrb[32].mxu0 %vm127_vm0, %v6248_v32 }
0x221e   :  { %5205 = vmatpush3.bf16.msra.mxu0 %v5966_v56  ;;  %5208 = vmatprep.mubr.msk.bf16.mxu0 %vm5644_vm1, %v5643_v7 }
0x221f   :  { %5206 = vmatprep.subr.bf16.mxu0 %v5643_v7 }
0x2222   :  { %5207 = vmatpush3.bf16.msra.mxu0 %v5973_v58 }
0x2223   :  { %5212 = vmatprep.subr.bf16.mxu0 %v5643_v7 }
0x22f0   :  { %v2124_v59 = vpop.f32.mrb[32].mxu0 }
0x22f1   :  { %v5366_v61 = vadd.f32 %v2124_v59, %v2088_v60  ;;  %v5186_v53 = vpop.f32.mrb[33].mxu0 }
0x22f2   :  { %v2127_v57 = vpop.f32.mrb[34].mxu0 }
0x22f3   :  { %5526 = vtanh.f32 %v5366_v61  ;;  %v5187_v33 = vpop.f32.mrb[35].mxu0  ;;  %v4806_v56 = vmul.f32 -1.442695, %v5366_v61 }
0x22f5   :  { %5528 = vpow2.f32 %v4806_v56 }
0x22fd   :  { %v5527_v32 = vpop.eup %5526 }
0x22fe   :  { %2140 = vrot.lane.b32.xlu1 %v5527_v32, %s5645_s6 }
0x22ff   :  { %v5529_v62 = vpop.eup %5528 }
0x2300   :  { %v2134_v63 = vadd.f32 1.0, %v5529_v62 }
0x2302   :  { %5530 = vrcp.f32 %v2134_v63 }
0x230c   :  { %v5531_v1 = vpop.eup %5530 }
0x230d   :  { %v2138_v51 = vmul.f32 %v5531_v1, %v6243_v19 }
0x2370   :  { %v2141_v58 = vpop.permute.xlu1 %2140 }
0x2371   :  { %v2143_v46 = vmul.f32 %v5531_v1, %v2141_v58 }
0x2373   :  { %2145 = vrot.lane.b32.xlu0 %v2143_v46, %s5646_s25 }
0x23e5   :  { %v2146_v47 = vpop.permute.xlu0 %2145 }
0x23e6   :  { %v6366_v0 = vadd.f32 %v2146_v47, %v2138_v51 }
0x23e8   :  { %5532 = vtanh.f32 %v6366_v0 }
0x23f2   :  { %v5533_v2 = vpop.eup %5532 }
0x23f3   :  { %2151 = vrot.lane.b32.xlu1 %v5533_v2, %s5645_s6 }
0x2465   :  { %v2152_v6 = vpop.permute.xlu1 %2151 }
0x2466   :  { %v2154_v9 = vmul.f32 %v5531_v1, %v2152_v6 }
0x2468   :  { %v2155_v10 = vpack.c.bf16 %v2154_v9, %v2154_v9 }
0x246a   :  { %2157 = vrot.lane.b32.xlu0 %v2155_v10, %s5646_s25 }
0x24dc   :  { %v6371_v11 = vpop.permute.xlu0 %2157 }
0x24dd   :  { %5193 = vmatmul.mubr.msk.bf16.vlgmr.msra.gmra.mrb[40].mxu1 %vm127_vm0, %v6371_v11 }
0x24de   :  { %5197 = vmatpush3.bf16.msra.mxu1 %v6161_v35  ;;  %5200 = vmatprep.mubr.msk.bf16.mxu1 %vm5644_vm1, %v5643_v7 }
0x24df   :  { %5198 = vmatprep.subr.bf16.mxu1 %v5643_v7 }
0x24e2   :  { %5199 = vmatpush3.bf16.msra.mxu1 %v6177_v37 }
0x24e3   :  { %5220 = vmatprep.subr.bf16.mxu1 %v5643_v7 }
0x25b0   :  { %v6381_v19 = vpop.f32.mrb[40].mxu1 }
0x25b1   :  { %v5194_v15 = vpop.f32.mrb[41].mxu1  ;;  %v2203_v17 = vmul.f32 %v6381_v19, %v6070_v43  ;;  %v2202_v21 = vmul.f32 %v6381_v19, %v6068_v42  ;;  %v2204_v16 = vmul.f32 %v6381_v19, %v6078_v54  ;;  %v2205_v38 = vmul.f32 %v6381_v19, %v6080_v55 }
0x25b2   :  { %v2199_v23 = vpop.f32.mrb[42].mxu1  ;;  %v2206_v44 = vmul.f32 %v6381_v19, %v6088_v3  ;;  %v2207_v28 = vmul.f32 %v6381_v19, %v6090_v4  ;;  %v2208_v50 = vmul.f32 %v6381_v19, %v6098_v12  ;;  %v2209_v52 = vmul.f32 %v6381_v19, %v6100_v13 }
0x25b3   :  { %v5195_v30 = vpop.f32.mrb[43].mxu1  ;;  %v2213_v5 = vsel %vm127_vm0, %v2203_v17, 0.0  ;;  %v2210_v14 = vsel %vm127_vm0, %v2202_v21, 0.0  ;;  %v2216_v24 = vsel %vm127_vm0, %v2204_v16, 0.0  ;;  %v2219_v41 = vsel %vm127_vm0, %v2205_v38, 0.0 }
0x25b4   :  { %2214 = vadd.xlane.f32.xlu0 %v2213_v5  ;;  %2211 = vadd.xlane.f32.xlu1 %v2210_v14  ;;  %v2222_v45 = vsel %vm127_vm0, %v2206_v44, 0.0  ;;  %v2225_v49 = vsel %vm127_vm0, %v2207_v28, 0.0  ;;  %v2228_v48 = vsel %vm127_vm0, %v2208_v50, 0.0  ;;  %v2231_v36 = vsel %vm127_vm0, %v2209_v52, 0.0 }
0x25b8   :  { %2217 = vadd.xlane.f32.xlu0 %v2216_v24  ;;  %2220 = vadd.xlane.f32.xlu1 %v2219_v41 }
0x25bc   :  { %2223 = vadd.xlane.f32.xlu0 %v2222_v45  ;;  %2226 = vadd.xlane.f32.xlu1 %v2225_v49 }
0x25c0   :  { %2229 = vadd.xlane.f32.xlu0 %v2228_v48  ;;  %2232 = vadd.xlane.f32.xlu1 %v2231_v36 }
0x2641   :  { %v2215_v60 = vpop.xlane.xlu0 %2214  ;;  %v2212_v59 = vpop.xlane.xlu1 %2211 }
0x2642   :  { %v2249_v61 = vrot.slane %v2215_v60, %v6113_v29  ;;  %v2245_v53 = vrot.slane %v2212_v59, %v6113_v29 }
0x2644   :  { %v2274_v56 = vsel %vm1408_vm2, %v2249_v61, %v2245_v53 }
0x2645   :  { %v2218_v57 = vpop.xlane.xlu0 %2217  ;;  %v2221_v33 = vpop.xlane.xlu1 %2220 }
0x2646   :  { %v2253_v32 = vrot.slane %v2218_v57, %v6113_v29  ;;  %v2257_v62 = vrot.slane %v2221_v33, %v6113_v29 }
0x2648   :  { %v2275_v63 = vsel %vm1410_vm3, %v2253_v32, %v2274_v56 }
0x2649   :  { %v2224_v1 = vpop.xlane.xlu0 %2223  ;;  %v2227_v58 = vpop.xlane.xlu1 %2226  ;;  %v2276_v51 = vsel %vm1412_vm4, %v2257_v62, %v2275_v63 }
0x264a   :  { %v2261_v46 = vrot.slane %v2224_v1, %v6113_v29  ;;  %v2265_v47 = vrot.slane %v2227_v58, %v6113_v29 }
0x264c   :  { %v2277_v2 = vsel %vm1414_vm5, %v2261_v46, %v2276_v51 }
0x264d   :  { %v2230_v6 = vpop.xlane.xlu0 %2229  ;;  %v2233_v9 = vpop.xlane.xlu1 %2232  ;;  %v2278_v17 = vsel %vm1416_vm6, %v2265_v47, %v2277_v2 }
0x264e   :  { %v2269_v10 = vrot.slane %v2230_v6, %v6113_v29  ;;  %v2273_v15 = vrot.slane %v2233_v9, %v6113_v29 }
0x2650   :  { %v2279_v21 = vsel %vm1418_vm7, %v2269_v10, %v2278_v17 }
0x2651   :  { %v2280_v23 = vsel %vm1420_vm8, %v2273_v15, %v2279_v21 }
0x2652   :  { %v2282_v30 = vsel %vm1365_vm9, %v2280_v23, -1e+30 }
0x2653   :  { %v2283_v5 = vsel %vm1424_vm10, %v2282_v30, -inf }
0x2654   :  { %v2284_v14 = vrot.slane %v2283_v5, 4 }
0x2656   :  { %v2285_v16 = vmax.f32 %v2283_v5, %v2284_v14 }
0x2658   :  { %v2286_v38 = vrot.slane %v2285_v16, 2 }
0x265a   :  { %v2287_v24 = vmax.f32 %v2285_v16, %v2286_v38 }
0x265c   :  { %v2288_v41 = vrot.slane %v2287_v24, 1 }
0x265e   :  { %v2289_v44 = vmax.f32 %v2287_v24, %v2288_v41 }
0x2660   :  { %v2290_v28 = vsub.f32 %v2282_v30, %v2289_v44 }
0x2662   :  { %v2291_v45 = vmul.f32 1.442695, %v2290_v28 }
0x2664   :  { %5534 = vpow2.f32 %v2291_v45 }
0x266e   :  { %v5535_v49 = vpop.eup %5534 }
0x266f   :  { %v2293_v50 = vsel %vm1424_vm10, %v5535_v49, 0.0 }
0x2670   :  { %v2294_v52 = vrot.slane %v2293_v50, 4 }
0x2672   :  { %v2295_v48 = vadd.f32 %v2294_v52, %v2293_v50 }
0x2674   :  { %v2296_v36 = vrot.slane %v2295_v48, 2 }
0x2676   :  { %v2297_v60 = vadd.f32 %v2296_v36, %v2295_v48 }
0x2678   :  { %v2298_v59 = vrot.slane %v2297_v60, 1 }
0x267a   :  { %v2299_v61 = vadd.f32 %v2298_v59, %v2297_v60  ;;  %v6466_v60 = vld [vmem:[%s7250_s11] sm:$0xff]  }
0x267c   :  { %5536 = vrcp.f32 %v2299_v61 }
0x2686   :  { %v5537_v53 = vpop.eup %5536 }
0x2687   :  { %v6426_v57 = vmul.f32 %v5537_v53, %v5535_v49 }
0x2689   :  { %v2312_v33 = vrot.slane %v6426_v57, %v6141_v25  ;;  %v2305_v32 = vrot.slane %v6426_v57, %v6144_v27  ;;  %v2319_v56 = vrot.slane %v6426_v57, %v6153_v8  ;;  %v2326_v62 = vrot.slane %v6426_v57, %v6156_v34 }
0x268a   :  { %v2333_v63 = vrot.slane %v6426_v57, %v6168_v18  ;;  %v2340_v1 = vrot.slane %v6426_v57, %v6171_v20  ;;  %v2347_v58 = vrot.slane %v6426_v57, %v6185_v26  ;;  %v2354_v46 = vrot.slane %v6426_v57, %v6188_v39 }
0x268b   :  { %2314 = vbcast.lane.b32.xlu1 %v2312_v33, 256  ;;  %2307 = vbcast.lane.b32.xlu0 %v2305_v32, 256 }
0x268f   :  { %2321 = vbcast.lane.b32.xlu1 %v2319_v56, 256  ;;  %2328 = vbcast.lane.b32.xlu0 %v2326_v62, 256 }
0x2693   :  { %2335 = vbcast.lane.b32.xlu1 %v2333_v63, 256  ;;  %2342 = vbcast.lane.b32.xlu0 %v2340_v1, 256  ;;  %v6484_v63 = vld [vmem:[%s7249_s9] sm:$0xff]   ;;  %v6493_v1 = vld [vmem:[%s7249_s9 + $0x8] sm:$0xff]  }
0x2697   :  { %2349 = vbcast.lane.b32.xlu1 %v2347_v58, 256  ;;  %2356 = vbcast.lane.b32.xlu0 %v2354_v46, 256  ;;  %v6502_v58 = vld [vmem:[%s7248_s8] sm:$0xff]   ;;  %v6511_v46 = vld [vmem:[%s7248_s8 + $0x8] sm:$0xff]  }
0x269b   :  { %2383 = vrot.lane.b32.xlu1 %v6381_v19, %s5647_s17 }
0x26fd   :  { %v2315_v51 = vpop.permute.xlu1 %2314  ;;  %v2308_v47 = vpop.permute.xlu0 %2307 }
0x26fe   :  { %v2359_v2 = vmul.f32 %v2315_v51, %v6070_v43  ;;  %v2358_v6 = vmul.f32 %v2308_v47, %v6068_v42 }
0x2700   :  { %v2367_v9 = vsel %vm127_vm0, %v2359_v2, 0.0  ;;  %v2366_v10 = vsel %vm127_vm0, %v2358_v6, 0.0 }
0x2701   :  { %v2322_v15 = vpop.permute.xlu1 %2321  ;;  %v2329_v17 = vpop.permute.xlu0 %2328  ;;  %v2368_v30 = vadd.f32 %v2367_v9, %v2366_v10 }
0x2702   :  { %v2360_v21 = vmul.f32 %v2322_v15, %v6078_v54  ;;  %v2361_v23 = vmul.f32 %v2329_v17, %v6080_v55 }
0x2704   :  { %v2369_v5 = vsel %vm127_vm0, %v2360_v21, 0.0  ;;  %v2371_v43 = vsel %vm127_vm0, %v2361_v23, 0.0 }
0x2705   :  { %v2370_v19 = vadd.f32 %v2369_v5, %v2368_v30  ;;  %v2336_v14 = vpop.permute.xlu1 %2335  ;;  %v2343_v16 = vpop.permute.xlu0 %2342 }
0x2706   :  { %v2362_v42 = vmul.f32 %v2336_v14, %v6088_v3  ;;  %v2363_v38 = vmul.f32 %v2343_v16, %v6090_v4 }
0x2707   :  { %v2372_v24 = vadd.f32 %v2371_v43, %v2370_v19 }
0x2708   :  { %v2373_v41 = vsel %vm127_vm0, %v2362_v42, 0.0  ;;  %v2375_v55 = vsel %vm127_vm0, %v2363_v38, 0.0 }
0x2709   :  { %v2374_v44 = vadd.f32 %v2373_v41, %v2372_v24  ;;  %v2350_v28 = vpop.permute.xlu1 %2349  ;;  %v2357_v54 = vpop.permute.xlu0 %2356 }
0x270a   :  { %v2364_v45 = vmul.f32 %v2350_v28, %v6098_v12  ;;  %v2365_v49 = vmul.f32 %v2357_v54, %v6100_v13  ;;  %v6475_v12 = vld [vmem:[%s7250_s11 + $0x8] sm:$0xff]  }
0x270b   :  { %v2376_v50 = vadd.f32 %v2375_v55, %v2374_v44  ;;  %v6538_v54 = vld [vmem:[#allocation2 + $0x8] sm:$0xff] }
0x270c   :  { %v2377_v52 = vsel %vm127_vm0, %v2364_v45, 0.0  ;;  %v2379_v3 = vsel %vm127_vm0, %v2365_v49, 0.0  ;;  %v6542_v45 = vld [vmem:[#allocation2] sm:$0xff] }
0x270d   :  { %v2378_v48 = vadd.f32 %v2377_v52, %v2376_v50  ;;  %v2384_v13 = vpop.permute.xlu1 %2383 }
0x270f   :  { %v2380_v36 = vadd.f32 %v2379_v3, %v2378_v48  ;;  %v6548_v48 = vld [vmem:[#allocation2 + $0x20] sm:$0xff] }
0x2711   :  { %v2381_v4 = vpack.c.bf16 %v2380_v36, %v2380_v36  ;;  %v6552_v36 = vld [vmem:[#allocation2 + $0x10] sm:$0xff] }
0x2713   :  { %5201 = vmatmul.mubr.msk.bf16.vlgmr.msra.gmra.mrb[44].mxu1 %vm127_vm0, %v2381_v4 }
0x2714   :  { %5221 = vmatpush3.bf16.msra.mxu1 %v6466_v60  ;;  %5224 = vmatprep.mubr.msk.bf16.mxu1 %vm5644_vm1, %v5643_v7 }
0x2715   :  { %5222 = vmatprep.subr.bf16.mxu1 %v5643_v7 }
0x2718   :  { %5223 = vmatpush3.bf16.msra.mxu1 %v6475_v12 }
0x2719   :  { %5228 = vmatprep.subr.bf16.mxu1 %v5643_v7 }
0x27e6   :  { %v2423_v59 = vpop.f32.mrb[44].mxu1 }
0x27e7   :  { %v2424_v61 = vadd.f32 %v2423_v59, %v2384_v13  ;;  %v5202_v53 = vpop.f32.mrb[45].mxu1 }
0x27e8   :  { %v2426_v33 = vpop.f32.mrb[46].mxu1 }
0x27e9   :  { %5538 = vtanh.f32 %v2424_v61  ;;  %v5203_v32 = vpop.f32.mrb[47].mxu1  ;;  %v6558_v61 = vld [vmem:[#allocation2 + $0x30] sm:$0xff]  ;;  %v6562_v33 = vld [vmem:[#allocation2 + $0x18] sm:$0xff] }
0x27f3   :  { %v5539_v56 = vpop.eup %5538 }
0x27f4   :  { %2431 = vst.msk [vmem:[#allocation3 + $0x10] sm:$0xff] %vm127_vm0, %v5539_v56  ;;  %v2468_v62 = vpack.c.bf16 %v5539_v56, %v5539_v56 }
0x27f6   :  { %5209 = vmatmul.mubr.msk.bf16.vlgmr.msra.gmra.mrb[36].mxu0 %vm127_vm0, %v2468_v62 }
0x27f7   :  { %5213 = vmatpush3.bf16.msra.mxu0 %v6484_v63  ;;  %5216 = vmatprep.mubr.msk.bf16.mxu0 %vm5644_vm1, %v5643_v7 }
0x27f8   :  { %5214 = vmatprep.subr.bf16.mxu0 %v5643_v7 }
0x27fb   :  { %5215 = vmatpush3.bf16.msra.mxu0 %v6493_v1 }
0x27fc   :  { %5236 = vmatprep.subr.bf16.mxu0 %v5643_v7 }
0x2802   :  { %5217 = vmatmul.mubr.msk.bf16.vlgmr.msra.gmra.mrb[36].mxu0 %vm127_vm0, %v6371_v11  ;;  %v6515_v11 = vld [vmem:[#allocation5 + $0xc] sm:$0xff]  }
0x2803   :  { %5237 = vmatpush3.bf16.msra.mxu0 %v6502_v58  ;;  %5240 = vmatprep.mubr.msk.bf16.mxu0 %vm5644_vm1, %v5643_v7  ;;  %v2512_v51 = vunpack.c.l.bf16 %v6515_v11 }
0x2804   :  { %5238 = vmatprep.subr.bf16.mxu0 %v5643_v7 }
0x2807   :  { %5239 = vmatpush3.bf16.msra.mxu0 %v6511_v46 }
0x2808   :  { %5244 = vmatprep.subr.bf16.mxu0 %v5643_v7 }
0x28d5   :  { %v2548_v47 = vpop.f32.mrb[36].mxu0 }
0x28d6   :  { %v5367_v2 = vadd.f32 %v2548_v47, %v2512_v51  ;;  %v5218_v6 = vpop.f32.mrb[37].mxu0  ;;  %v6568_v51 = vld [vmem:[#allocation2 + $0x28] sm:$0xff] }
0x28d7   :  { %v2551_v9 = vpop.f32.mrb[38].mxu0  ;;  %v6573_v6 = vld [vmem:[#allocation2 + $0x38] sm:$0xff] }
0x28d8   :  { %5540 = vtanh.f32 %v5367_v2  ;;  %v5219_v10 = vpop.f32.mrb[39].mxu0  ;;  %v4812_v17 = vmul.f32 -1.442695, %v5367_v2 }
0x28da   :  { %5542 = vpow2.f32 %v4812_v17 }
0x28e2   :  { %v5541_v15 = vpop.eup %5540 }
0x28e3   :  { %2564 = vrot.lane.b32.xlu0 %v5541_v15, %s5645_s6 }
0x28e4   :  { %v5543_v21 = vpop.eup %5542 }
0x28e5   :  { %v2558_v23 = vadd.f32 1.0, %v5543_v21 }
0x28e7   :  { %5544 = vrcp.f32 %v2558_v23 }
0x28f1   :  { %v5545_v30 = vpop.eup %5544 }
0x28f2   :  { %v2562_v14 = vmul.f32 %v5545_v30, %v6366_v0 }
0x2955   :  { %v2565_v5 = vpop.permute.xlu0 %2564 }
0x2956   :  { %v2567_v19 = vmul.f32 %v5545_v30, %v2565_v5 }
0x2958   :  { %2569 = vrot.lane.b32.xlu1 %v2567_v19, %s5646_s25 }
0x29ca   :  { %v2570_v16 = vpop.permute.xlu1 %2569 }
0x29cb   :  { %v6521_v43 = vadd.f32 %v2570_v16, %v2562_v14 }
0x29cd   :  { %5546 = vtanh.f32 %v6521_v43 }
0x29d7   :  { %v5547_v42 = vpop.eup %5546 }
0x29d8   :  { %2575 = vrot.lane.b32.xlu0 %v5547_v42, %s5645_s6 }
0x2a4a   :  { %v2576_v38 = vpop.permute.xlu0 %2575 }
0x2a4b   :  { %v2578_v24 = vmul.f32 %v5545_v30, %v2576_v38 }
0x2a4d   :  { %v2579_v41 = vpack.c.bf16 %v2578_v24, %v2578_v24 }
0x2a4f   :  { %2581 = vrot.lane.b32.xlu1 %v2579_v41, %s5646_s25 }
0x2ac1   :  { %v6526_v44 = vpop.permute.xlu1 %2581 }
0x2ac2   :  { %5225 = vmatmul.mubr.msk.bf16.vlgmr.msra.gmra.mrb[48].mxu1 %vm127_vm0, %v6526_v44 }
0x2ac3   :  { %5229 = vmatpush3.bf16.msra.mxu1 %v6161_v35  ;;  %5232 = vmatprep.mubr.msk.bf16.mxu1 %vm5644_vm1, %v5643_v7 }
0x2ac4   :  { %5230 = vmatprep.subr.bf16.mxu1 %v5643_v7 }
0x2ac7   :  { %5231 = vmatpush3.bf16.msra.mxu1 %v6177_v37 }
0x2ac8   :  { %5252 = vmatprep.subr.bf16.mxu1 %v5643_v7 }
0x2b95   :  { %v6536_v0 = vpop.f32.mrb[48].mxu1 }
0x2b96   :  { %v5226_v28 = vpop.f32.mrb[49].mxu1  ;;  %v2627_v55 = vmul.f32 %v6538_v54, %v6536_v0  ;;  %v2626_v35 = vmul.f32 %v6542_v45, %v6536_v0  ;;  %v2630_v3 = vmul.f32 %v6548_v48, %v6536_v0  ;;  %v2628_v4 = vmul.f32 %v6552_v36, %v6536_v0 }
0x2b97   :  { %v2623_v49 = vpop.f32.mrb[50].mxu1  ;;  %v2632_v53 = vmul.f32 %v6558_v61, %v6536_v0  ;;  %v2629_v32 = vmul.f32 %v6562_v33, %v6536_v0  ;;  %v2631_v47 = vmul.f32 %v6568_v51, %v6536_v0  ;;  %v2633_v9 = vmul.f32 %v6573_v6, %v6536_v0 }
0x2b98   :  { %v5227_v50 = vpop.f32.mrb[51].mxu1  ;;  %v2637_v52 = vsel %vm127_vm0, %v2627_v55, 0.0  ;;  %v2634_v37 = vsel %vm127_vm0, %v2626_v35, 0.0  ;;  %v2646_v13 = vsel %vm127_vm0, %v2630_v3, 0.0  ;;  %v2640_v59 = vsel %vm127_vm0, %v2628_v4, 0.0 }
0x2b99   :  { %2638 = vadd.xlane.f32.xlu1 %v2637_v52  ;;  %2635 = vadd.xlane.f32.xlu0 %v2634_v37  ;;  %v2652_v56 = vsel %vm127_vm0, %v2632_v53, 0.0  ;;  %v2643_v62 = vsel %vm127_vm0, %v2629_v32, 0.0  ;;  %v2649_v2 = vsel %vm127_vm0, %v2631_v47, 0.0  ;;  %v2655_v10 = vsel %vm127_vm0, %v2633_v9, 0.0 }
0x2b9d   :  { %2647 = vadd.xlane.f32.xlu1 %v2646_v13  ;;  %2641 = vadd.xlane.f32.xlu0 %v2640_v59 }
0x2ba1   :  { %2653 = vadd.xlane.f32.xlu1 %v2652_v56  ;;  %2644 = vadd.xlane.f32.xlu0 %v2643_v62 }
0x2ba5   :  { %2650 = vadd.xlane.f32.xlu0 %v2649_v2 }
0x2ba9   :  { %2656 = vadd.xlane.f32.xlu0 %v2655_v10 }
0x2c26   :  { %v2636_v15 = vpop.xlane.xlu0 %2635  ;;  %v2639_v17 = vpop.xlane.xlu1 %2638 }
0x2c27   :  { %v2673_v23 = vrot.slane %v2639_v17, %v6113_v29  ;;  %v2669_v30 = vrot.slane %v2636_v15, %v6113_v29 }
0x2c29   :  { %v2698_v16 = vsel %vm1408_vm2, %v2673_v23, %v2669_v30 }
0x2c2a   :  { %v2642_v21 = vpop.xlane.xlu0 %2641  ;;  %v2648_v19 = vpop.xlane.xlu1 %2647 }
0x2c2b   :  { %v2677_v5 = vrot.slane %v2642_v21, %v6113_v29  ;;  %v2685_v41 = vrot.slane %v2648_v19, %v6113_v29 }
0x2c2d   :  { %v2699_v38 = vsel %vm1410_vm3, %v2677_v5, %v2698_v16 }
0x2c2e   :  { %v2645_v14 = vpop.xlane.xlu0 %2644  ;;  %v2654_v55 = vpop.xlane.xlu1 %2653 }
0x2c2f   :  { %v2681_v42 = vrot.slane %v2645_v14, %v6113_v29  ;;  %v2693_v52 = vrot.slane %v2654_v55, %v6113_v29 }
0x2c31   :  { %v2700_v24 = vsel %vm1412_vm4, %v2681_v42, %v2699_v38 }
0x2c32   :  { %v2651_v28 = vpop.xlane.xlu0 %2650  ;;  %v2701_v49 = vsel %vm1414_vm5, %v2685_v41, %v2700_v24 }
0x2c33   :  { %v2689_v35 = vrot.slane %v2651_v28, %v6113_v29 }
0x2c35   :  { %v2702_v50 = vsel %vm1416_vm6, %v2689_v35, %v2701_v49 }
0x2c36   :  { %v2657_v37 = vpop.xlane.xlu0 %2656  ;;  %v2703_v4 = vsel %vm1418_vm7, %v2693_v52, %v2702_v50 }
0x2c37   :  { %v2697_v3 = vrot.slane %v2657_v37, %v6113_v29 }
0x2c39   :  { %v2704_v13 = vsel %vm1420_vm8, %v2697_v3, %v2703_v4 }
0x2c3a   :  { %v2706_v59 = vsel %vm1365_vm9, %v2704_v13, -1e+30 }
0x2c3b   :  { %v2707_v53 = vsel %vm1424_vm10, %v2706_v59, -inf }
0x2c3c   :  { %v2708_v32 = vrot.slane %v2707_v53, 4 }
0x2c3e   :  { %v2709_v56 = vmax.f32 %v2707_v53, %v2708_v32 }
0x2c40   :  { %v2710_v62 = vrot.slane %v2709_v56, 2 }
0x2c42   :  { %v2711_v47 = vmax.f32 %v2709_v56, %v2710_v62 }
0x2c44   :  { %v2712_v2 = vrot.slane %v2711_v47, 1 }
0x2c46   :  { %v2713_v9 = vmax.f32 %v2711_v47, %v2712_v2 }
0x2c48   :  { %v2714_v10 = vsub.f32 %v2706_v59, %v2713_v9 }
0x2c4a   :  { %v2715_v15 = vmul.f32 1.442695, %v2714_v10 }
0x2c4c   :  { %5548 = vpow2.f32 %v2715_v15 }
0x2c56   :  { %v5549_v17 = vpop.eup %5548 }
0x2c57   :  { %v2717_v21 = vsel %vm1424_vm10, %v5549_v17, 0.0 }
0x2c58   :  { %v2718_v23 = vrot.slane %v2717_v21, 4 }
0x2c5a   :  { %v2719_v30 = vadd.f32 %v2718_v23, %v2717_v21 }
0x2c5c   :  { %v2720_v5 = vrot.slane %v2719_v30, 2 }
0x2c5e   :  { %v2721_v19 = vadd.f32 %v2720_v5, %v2719_v30 }
0x2c60   :  { %v2722_v14 = vrot.slane %v2721_v19, 1 }
0x2c62   :  { %v2723_v16 = vadd.f32 %v2722_v14, %v2721_v19 }
0x2c64   :  { %5550 = vrcp.f32 %v2723_v16 }
0x2c6e   :  { %v5551_v42 = vpop.eup %5550 }
0x2c6f   :  { %v6597_v38 = vmul.f32 %v5551_v42, %v5549_v17 }
0x2c71   :  { %v2736_v24 = vrot.slane %v6597_v38, %v6141_v25  ;;  %v2729_v41 = vrot.slane %v6597_v38, %v6144_v27  ;;  %v2757_v28 = vrot.slane %v6597_v38, %v6168_v18  ;;  %v2743_v55 = vrot.slane %v6597_v38, %v6153_v8 }
0x2c72   :  { %v2771_v35 = vrot.slane %v6597_v38, %v6185_v26  ;;  %v2750_v49 = vrot.slane %v6597_v38, %v6156_v34  ;;  %v2764_v50 = vrot.slane %v6597_v38, %v6171_v20  ;;  %v2778_v52 = vrot.slane %v6597_v38, %v6188_v39 }
0x2c73   :  { %2738 = vbcast.lane.b32.xlu0 %v2736_v24, 256  ;;  %2731 = vbcast.lane.b32.xlu1 %v2729_v41, 256 }
0x2c77   :  { %2759 = vbcast.lane.b32.xlu0 %v2757_v28, 256  ;;  %2745 = vbcast.lane.b32.xlu1 %v2743_v55, 256 }
0x2c7b   :  { %2773 = vbcast.lane.b32.xlu0 %v2771_v35, 256  ;;  %2752 = vbcast.lane.b32.xlu1 %v2750_v49, 256 }
0x2c7f   :  { %2807 = vrot.lane.b32.xlu0 %v6536_v0, %s5647_s17  ;;  %2766 = vbcast.lane.b32.xlu1 %v2764_v50, 256 }
0x2c83   :  { %2780 = vbcast.lane.b32.xlu1 %v2778_v52, 256 }
0x2ce5   :  { %v2739_v37 = vpop.permute.xlu0 %2738  ;;  %v2732_v3 = vpop.permute.xlu1 %2731 }
0x2ce6   :  { %v2783_v4 = vmul.f32 %v6538_v54, %v2739_v37  ;;  %v2782_v13 = vmul.f32 %v6542_v45, %v2732_v3 }
0x2ce8   :  { %v2791_v32 = vsel %vm127_vm0, %v2783_v4, 0.0  ;;  %v2790_v56 = vsel %vm127_vm0, %v2782_v13, 0.0 }
0x2ce9   :  { %v2760_v59 = vpop.permute.xlu0 %2759  ;;  %v2746_v53 = vpop.permute.xlu1 %2745  ;;  %v2792_v47 = vadd.f32 %v2791_v32, %v2790_v56 }
0x2cea   :  { %v2784_v62 = vmul.f32 %v6552_v36, %v2746_v53  ;;  %v2786_v9 = vmul.f32 %v6548_v48, %v2760_v59 }
0x2cec   :  { %v2793_v0 = vsel %vm127_vm0, %v2784_v62, 0.0  ;;  %v2797_v5 = vsel %vm127_vm0, %v2786_v9, 0.0  ;;  %v2936_v62 = vunpack.c.h.bf16 %v6515_v11 }
0x2ced   :  { %v2753_v2 = vpop.permute.xlu1 %2752  ;;  %v2794_v15 = vadd.f32 %v2793_v0, %v2792_v47  ;;  %v2774_v17 = vpop.permute.xlu0 %2773 }
0x2cee   :  { %v2785_v10 = vmul.f32 %v6562_v33, %v2753_v2  ;;  %v2788_v19 = vmul.f32 %v6558_v61, %v2774_v17 }
0x2cf0   :  { %v2795_v21 = vsel %vm127_vm0, %v2785_v10, 0.0  ;;  %v2801_v28 = vsel %vm127_vm0, %v2788_v19, 0.0 }
0x2cf1   :  { %v2796_v23 = vadd.f32 %v2795_v21, %v2794_v15  ;;  %v2767_v30 = vpop.permute.xlu1 %2766  ;;  %v2808_v37 = vpop.permute.xlu0 %2807 }
0x2cf2   :  { %v2787_v14 = vmul.f32 %v6568_v51, %v2767_v30 }
0x2cf3   :  { %v2798_v16 = vadd.f32 %v2797_v5, %v2796_v23 }
0x2cf4   :  { %v2799_v42 = vsel %vm127_vm0, %v2787_v14, 0.0 }
0x2cf5   :  { %v2800_v24 = vadd.f32 %v2799_v42, %v2798_v16  ;;  %v2781_v41 = vpop.permute.xlu1 %2780 }
0x2cf6   :  { %v2789_v55 = vmul.f32 %v6573_v6, %v2781_v41 }
0x2cf7   :  { %v2802_v35 = vadd.f32 %v2801_v28, %v2800_v24 }
0x2cf8   :  { %v2803_v49 = vsel %vm127_vm0, %v2789_v55, 0.0  ;;  %v6681_v55 = vld [vmem:[%s7252_s12 + $0x8] sm:$0xff]  }
0x2cf9   :  { %v2804_v50 = vadd.f32 %v2803_v49, %v2802_v35 }
0x2cfb   :  { %v2805_v52 = vpack.c.bf16 %v2804_v50, %v2804_v50 }
0x2cfd   :  { %5233 = vmatmul.mubr.msk.bf16.vlgmr.msra.gmra.mrb[52].mxu1 %vm127_vm0, %v2805_v52 }
0x2cfe   :  { %5253 = vmatpush3.bf16.msra.mxu1 %v6466_v60  ;;  %5256 = vmatprep.mubr.msk.bf16.mxu1 %vm5644_vm1, %v5643_v7 }
0x2cff   :  { %5254 = vmatprep.subr.bf16.mxu1 %v5643_v7 }
0x2d02   :  { %5255 = vmatpush3.bf16.msra.mxu1 %v6475_v12 }
0x2d03   :  { %5260 = vmatprep.subr.bf16.mxu1 %v5643_v7 }
0x2dd0   :  { %v2847_v3 = vpop.f32.mrb[52].mxu1 }
0x2dd1   :  { %v2848_v4 = vadd.f32 %v2847_v3, %v2808_v37  ;;  %v5234_v13 = vpop.f32.mrb[53].mxu1 }
0x2dd2   :  { %v2850_v59 = vpop.f32.mrb[54].mxu1 }
0x2dd3   :  { %5552 = vtanh.f32 %v2848_v4  ;;  %v5235_v53 = vpop.f32.mrb[55].mxu1 }
0x2ddd   :  { %v5553_v32 = vpop.eup %5552 }
0x2dde   :  { %2855 = vst.msk [vmem:[#allocation3 + $0x18] sm:$0xff] %vm127_vm0, %v5553_v32  ;;  %v2892_v56 = vpack.c.bf16 %v5553_v32, %v5553_v32 }
0x2de0   :  { %5241 = vmatmul.mubr.msk.bf16.vlgmr.msra.gmra.mrb[40].mxu0 %vm127_vm0, %v2892_v56 }
0x2de1   :  { %5245 = vmatpush3.bf16.msra.mxu0 %v6484_v63  ;;  %5248 = vmatprep.mubr.msk.bf16.mxu0 %vm5644_vm1, %v5643_v7 }
0x2de2   :  { %5246 = vmatprep.subr.bf16.mxu0 %v5643_v7 }
0x2de5   :  { %5247 = vmatpush3.bf16.msra.mxu0 %v6493_v1 }
0x2de6   :  { %5268 = vmatprep.subr.bf16.mxu0 %v5643_v7 }
0x2dec   :  { %5249 = vmatmul.mubr.msk.bf16.vlgmr.msra.gmra.mrb[40].mxu0 %vm127_vm0, %v6526_v44 }
0x2ded   :  { %5269 = vmatpush3.bf16.msra.mxu0 %v6502_v58  ;;  %5272 = vmatprep.mubr.msk.bf16.mxu0 %vm5644_vm1, %v5643_v7 }
0x2dee   :  { %5270 = vmatprep.subr.bf16.mxu0 %v5643_v7 }
0x2df1   :  { %5271 = vmatpush3.bf16.msra.mxu0 %v6511_v46 }
0x2df2   :  { %5276 = vmatprep.subr.bf16.mxu0 %v5643_v7 }
0x2ebf   :  { %v2972_v0 = vpop.f32.mrb[40].mxu0 }
0x2ec0   :  { %v5368_v47 = vadd.f32 %v2972_v0, %v2936_v62  ;;  %v5250_v2 = vpop.f32.mrb[41].mxu0 }
0x2ec1   :  { %v2975_v9 = vpop.f32.mrb[42].mxu0 }
0x2ec2   :  { %5554 = vtanh.f32 %v5368_v47  ;;  %v5251_v10 = vpop.f32.mrb[43].mxu0  ;;  %v4818_v15 = vmul.f32 -1.442695, %v5368_v47 }
0x2ec4   :  { %5556 = vpow2.f32 %v4818_v15 }
0x2ecc   :  { %v5555_v44 = vpop.eup %5554 }
0x2ecd   :  { %2988 = vrot.lane.b32.xlu1 %v5555_v44, %s5645_s6 }
0x2ece   :  { %v5557_v17 = vpop.eup %5556 }
0x2ecf   :  { %v2982_v21 = vadd.f32 1.0, %v5557_v17 }
0x2ed1   :  { %5558 = vrcp.f32 %v2982_v21 }
0x2edb   :  { %v5559_v23 = vpop.eup %5558 }
0x2edc   :  { %v2986_v11 = vmul.f32 %v5559_v23, %v6521_v43  ;;  %v6672_v43 = vld [vmem:[%s7252_s12] sm:$0xff]  }
0x2f3f   :  { %v2989_v30 = vpop.permute.xlu1 %2988 }
0x2f40   :  { %v2991_v5 = vmul.f32 %v5559_v23, %v2989_v30 }
0x2f42   :  { %2993 = vrot.lane.b32.xlu0 %v2991_v5, %s5646_s25 }
0x2fb4   :  { %v2994_v19 = vpop.permute.xlu0 %2993 }
0x2fb5   :  { %v6660_v14 = vadd.f32 %v2994_v19, %v2986_v11 }
0x2fb7   :  { %5560 = vtanh.f32 %v6660_v14 }
0x2fc1   :  { %v5561_v16 = vpop.eup %5560 }
0x2fc2   :  { %2999 = vrot.lane.b32.xlu1 %v5561_v16, %s5645_s6 }
0x3034   :  { %v3000_v42 = vpop.permute.xlu1 %2999 }
0x3035   :  { %v3002_v24 = vmul.f32 %v5559_v23, %v3000_v42 }
0x3037   :  { %v3003_v41 = vpack.c.bf16 %v3002_v24, %v3002_v24 }
0x3039   :  { %3005 = vrot.lane.b32.xlu0 %v3003_v41, %s5646_s25 }
0x30ab   :  { %v6665_v28 = vpop.permute.xlu0 %3005 }
0x30ac   :  { %5257 = vmatmul.mubr.msk.bf16.vlgmr.msra.gmra.mrb[56].mxu1 %vm127_vm0, %v6665_v28 }
0x30ad   :  { %5261 = vmatpush3.bf16.msra.mxu1 %v6672_v43  ;;  %5264 = vmatprep.mubr.msk.bf16.mxu1 %vm5644_vm1, %v5643_v7 }
0x30ae   :  { %5262 = vmatprep.subr.bf16.mxu1 %v5643_v7 }
0x30b1   :  { %5263 = vmatpush3.bf16.msra.mxu1 %v6681_v55 }
0x30b2   :  { %5284 = vmatprep.subr.bf16.mxu1 %v5643_v7 }
0x317f   :  { %v6685_v35 = vpop.f32.mrb[56].mxu1 }
0x3180   :  { %v5258_v49 = vpop.f32.mrb[57].mxu1  ;;  %v3051_v50 = vmul.f32 %v6538_v54, %v6685_v35  ;;  %v3050_v52 = vmul.f32 %v6542_v45, %v6685_v35  ;;  %v3052_v59 = vmul.f32 %v6552_v36, %v6685_v35  ;;  %v3053_v53 = vmul.f32 %v6562_v33, %v6685_v35 }
0x3181   :  { %v3047_v37 = vpop.f32.mrb[58].mxu1  ;;  %v3054_v62 = vmul.f32 %v6548_v48, %v6685_v35  ;;  %v3055_v0 = vmul.f32 %v6568_v51, %v6685_v35  ;;  %v3056_v9 = vmul.f32 %v6558_v61, %v6685_v35  ;;  %v3057_v10 = vmul.f32 %v6573_v6, %v6685_v35 }
0x3182   :  { %v5259_v3 = vpop.f32.mrb[59].mxu1  ;;  %v3061_v4 = vsel %vm127_vm0, %v3051_v50, 0.0  ;;  %v3058_v13 = vsel %vm127_vm0, %v3050_v52, 0.0  ;;  %v3064_v32 = vsel %vm127_vm0, %v3052_v59, 0.0  ;;  %v3067_v56 = vsel %vm127_vm0, %v3053_v53, 0.0 }
0x3183   :  { %3062 = vadd.xlane.f32.xlu0 %v3061_v4  ;;  %3059 = vadd.xlane.f32.xlu1 %v3058_v13  ;;  %v3070_v47 = vsel %vm127_vm0, %v3054_v62, 0.0  ;;  %v3073_v2 = vsel %vm127_vm0, %v3055_v0, 0.0  ;;  %v3076_v44 = vsel %vm127_vm0, %v3056_v9, 0.0  ;;  %v3079_v15 = vsel %vm127_vm0, %v3057_v10, 0.0 }
0x3187   :  { %3065 = vadd.xlane.f32.xlu0 %v3064_v32  ;;  %3068 = vadd.xlane.f32.xlu1 %v3067_v56 }
0x318b   :  { %3071 = vadd.xlane.f32.xlu0 %v3070_v47  ;;  %3074 = vadd.xlane.f32.xlu1 %v3073_v2 }
0x318f   :  { %3077 = vadd.xlane.f32.xlu0 %v3076_v44  ;;  %3080 = vadd.xlane.f32.xlu1 %v3079_v15 }
0x3210   :  { %v3063_v17 = vpop.xlane.xlu0 %3062  ;;  %v3060_v21 = vpop.xlane.xlu1 %3059 }
0x3211   :  { %v3097_v23 = vrot.slane %v3063_v17, %v6113_v29  ;;  %v3093_v30 = vrot.slane %v3060_v21, %v6113_v29 }
0x3213   :  { %v3122_v16 = vsel %vm1408_vm2, %v3097_v23, %v3093_v30 }
0x3214   :  { %v3066_v5 = vpop.xlane.xlu0 %3065  ;;  %v3069_v11 = vpop.xlane.xlu1 %3068 }
0x3215   :  { %v3101_v19 = vrot.slane %v3066_v5, %v6113_v29  ;;  %v3105_v42 = vrot.slane %v3069_v11, %v6113_v29 }
0x3217   :  { %v3123_v24 = vsel %vm1410_vm3, %v3101_v19, %v3122_v16 }
0x3218   :  { %v3072_v41 = vpop.xlane.xlu0 %3071  ;;  %v3075_v49 = vpop.xlane.xlu1 %3074  ;;  %v3124_v52 = vsel %vm1412_vm4, %v3105_v42, %v3123_v24 }
0x3219   :  { %v3109_v50 = vrot.slane %v3072_v41, %v6113_v29  ;;  %v3113_v37 = vrot.slane %v3075_v49, %v6113_v29 }
0x321b   :  { %v3125_v3 = vsel %vm1414_vm5, %v3109_v50, %v3124_v52 }
0x321c   :  { %v3078_v4 = vpop.xlane.xlu0 %3077  ;;  %v3081_v13 = vpop.xlane.xlu1 %3080  ;;  %v3126_v32 = vsel %vm1416_vm6, %v3113_v37, %v3125_v3 }
0x321d   :  { %v3117_v59 = vrot.slane %v3078_v4, %v6113_v29  ;;  %v3121_v53 = vrot.slane %v3081_v13, %v6113_v29 }
0x321f   :  { %v3127_v56 = vsel %vm1418_vm7, %v3117_v59, %v3126_v32 }
0x3220   :  { %v3128_v62 = vsel %vm1420_vm8, %v3121_v53, %v3127_v56 }
0x3221   :  { %v3130_v0 = vsel %vm1365_vm9, %v3128_v62, -1e+30 }
0x3222   :  { %v3131_v47 = vsel %vm1424_vm10, %v3130_v0, -inf }
0x3223   :  { %v3132_v2 = vrot.slane %v3131_v47, 4 }
0x3225   :  { %v3133_v9 = vmax.f32 %v3131_v47, %v3132_v2 }
0x3227   :  { %v3134_v10 = vrot.slane %v3133_v9, 2 }
0x3229   :  { %v3135_v44 = vmax.f32 %v3133_v9, %v3134_v10 }
0x322b   :  { %v3136_v15 = vrot.slane %v3135_v44, 1 }
0x322d   :  { %v3137_v17 = vmax.f32 %v3135_v44, %v3136_v15 }
0x322f   :  { %v3138_v21 = vsub.f32 %v3130_v0, %v3137_v17 }
0x3231   :  { %v3139_v23 = vmul.f32 1.442695, %v3138_v21 }
0x3233   :  { %5562 = vpow2.f32 %v3139_v23 }
0x323d   :  { %v5563_v30 = vpop.eup %5562 }
0x323e   :  { %v3141_v5 = vsel %vm1424_vm10, %v5563_v30, 0.0 }
0x323f   :  { %v3142_v11 = vrot.slane %v3141_v5, 4 }
0x3241   :  { %v3143_v19 = vadd.f32 %v3142_v11, %v3141_v5 }
0x3243   :  { %v3144_v16 = vrot.slane %v3143_v19, 2 }
0x3245   :  { %v3145_v42 = vadd.f32 %v3144_v16, %v3143_v19 }
0x3247   :  { %v3146_v24 = vrot.slane %v3145_v42, 1 }
0x3249   :  { %v3147_v41 = vadd.f32 %v3146_v24, %v3145_v42 }
0x324b   :  { %5564 = vrcp.f32 %v3147_v41 }
0x3255   :  { %v5565_v49 = vpop.eup %5564 }
0x3256   :  { %v6730_v50 = vmul.f32 %v5565_v49, %v5563_v30 }
0x3258   :  { %v3160_v52 = vrot.slane %v6730_v50, %v6141_v25  ;;  %v3153_v37 = vrot.slane %v6730_v50, %v6144_v27  ;;  %v3167_v3 = vrot.slane %v6730_v50, %v6153_v8  ;;  %v3174_v4 = vrot.slane %v6730_v50, %v6156_v34 }
0x3259   :  { %v3181_v13 = vrot.slane %v6730_v50, %v6168_v18  ;;  %v3188_v59 = vrot.slane %v6730_v50, %v6171_v20  ;;  %v3195_v53 = vrot.slane %v6730_v50, %v6185_v26  ;;  %v3202_v32 = vrot.slane %v6730_v50, %v6188_v39 }
0x325a   :  { %3162 = vbcast.lane.b32.xlu1 %v3160_v52, 256  ;;  %3155 = vbcast.lane.b32.xlu0 %v3153_v37, 256 }
0x325e   :  { %3169 = vbcast.lane.b32.xlu1 %v3167_v3, 256  ;;  %3176 = vbcast.lane.b32.xlu0 %v3174_v4, 256 }
0x3262   :  { %3183 = vbcast.lane.b32.xlu1 %v3181_v13, 256  ;;  %3190 = vbcast.lane.b32.xlu0 %v3188_v59, 256 }
0x3266   :  { %3197 = vbcast.lane.b32.xlu1 %v3195_v53, 256  ;;  %3204 = vbcast.lane.b32.xlu0 %v3202_v32, 256 }
0x326a   :  { %3231 = vrot.lane.b32.xlu1 %v6685_v35, %s5647_s17 }
0x32cc   :  { %v3163_v56 = vpop.permute.xlu1 %3162  ;;  %v3156_v62 = vpop.permute.xlu0 %3155 }
0x32cd   :  { %v3207_v0 = vmul.f32 %v6538_v54, %v3163_v56  ;;  %v3206_v47 = vmul.f32 %v6542_v45, %v3156_v62 }
0x32cf   :  { %v3215_v2 = vsel %vm127_vm0, %v3207_v0, 0.0  ;;  %v3214_v9 = vsel %vm127_vm0, %v3206_v47, 0.0 }
0x32d0   :  { %v3170_v10 = vpop.permute.xlu1 %3169  ;;  %v3177_v44 = vpop.permute.xlu0 %3176  ;;  %v3216_v21 = vadd.f32 %v3215_v2, %v3214_v9 }
0x32d1   :  { %v3208_v15 = vmul.f32 %v6552_v36, %v3170_v10  ;;  %v3209_v17 = vmul.f32 %v6562_v33, %v3177_v44 }
0x32d3   :  { %v3217_v23 = vsel %vm127_vm0, %v3208_v15, 0.0  ;;  %v3219_v11 = vsel %vm127_vm0, %v3209_v17, 0.0 }
0x32d4   :  { %v3218_v35 = vadd.f32 %v3217_v23, %v3216_v21  ;;  %v3184_v30 = vpop.permute.xlu1 %3183  ;;  %v3191_v5 = vpop.permute.xlu0 %3190 }
0x32d5   :  { %v3210_v19 = vmul.f32 %v6548_v48, %v3184_v30  ;;  %v3211_v16 = vmul.f32 %v6568_v51, %v3191_v5 }
0x32d6   :  { %v3220_v42 = vadd.f32 %v3219_v11, %v3218_v35 }
0x32d7   :  { %v3221_v24 = vsel %vm127_vm0, %v3210_v19, 0.0  ;;  %v3223_v37 = vsel %vm127_vm0, %v3211_v16, 0.0 }
0x32d8   :  { %v3222_v41 = vadd.f32 %v3221_v24, %v3220_v42  ;;  %v3198_v49 = vpop.permute.xlu1 %3197  ;;  %v3205_v52 = vpop.permute.xlu0 %3204 }
0x32d9   :  { %v3212_v3 = vmul.f32 %v6558_v61, %v3198_v49  ;;  %v3213_v4 = vmul.f32 %v6573_v6, %v3205_v52 }
0x32da   :  { %v3224_v13 = vadd.f32 %v3223_v37, %v3222_v41 }
0x32db   :  { %v3225_v59 = vsel %vm127_vm0, %v3212_v3, 0.0  ;;  %v3227_v32 = vsel %vm127_vm0, %v3213_v4, 0.0 }
0x32dc   :  { %v3226_v53 = vadd.f32 %v3225_v59, %v3224_v13  ;;  %v3232_v0 = vpop.permute.xlu1 %3231 }
0x32de   :  { %v3228_v56 = vadd.f32 %v3227_v32, %v3226_v53 }
0x32e0   :  { %v3229_v62 = vpack.c.bf16 %v3228_v56, %v3228_v56 }
0x32e2   :  { %5265 = vmatmul.mubr.msk.bf16.vlgmr.msra.gmra.mrb[60].mxu1 %vm127_vm0, %v3229_v62 }
0x32e3   :  { %5285 = vmatpush3.bf16.msra.mxu1 %v6466_v60  ;;  %5288 = vmatprep.mubr.msk.bf16.mxu1 %vm5644_vm1, %v5643_v7 }
0x32e4   :  { %5286 = vmatprep.subr.bf16.mxu1 %v5643_v7 }
0x32e7   :  { %5287 = vmatpush3.bf16.msra.mxu1 %v6475_v12  ;;  %v6789_v12 = vld [vmem:[#allocation5 + $0x14] sm:$0xff]  }
0x32e8   :  { %5292 = vmatprep.subr.bf16.mxu1 %v5643_v7 }
0x33b5   :  { %v3271_v47 = vpop.f32.mrb[60].mxu1 }
0x33b6   :  { %v3272_v2 = vadd.f32 %v3271_v47, %v3232_v0  ;;  %v5266_v9 = vpop.f32.mrb[61].mxu1 }
0x33b7   :  { %v3274_v10 = vpop.f32.mrb[62].mxu1 }
0x33b8   :  { %5566 = vtanh.f32 %v3272_v2  ;;  %v5267_v44 = vpop.f32.mrb[63].mxu1 }
0x33c2   :  { %v5567_v15 = vpop.eup %5566 }
0x33c3   :  { %3279 = vst.msk [vmem:[#allocation3 + $0x20] sm:$0xff] %vm127_vm0, %v5567_v15  ;;  %v3316_v60 = vpack.c.bf16 %v5567_v15, %v5567_v15 }
0x33c5   :  { %5273 = vmatmul.mubr.msk.bf16.vlgmr.msra.gmra.mrb[44].mxu0 %vm127_vm0, %v3316_v60 }
0x33c6   :  { %5277 = vmatpush3.bf16.msra.mxu0 %v6484_v63  ;;  %5280 = vmatprep.mubr.msk.bf16.mxu0 %vm5644_vm1, %v5643_v7  ;;  %v3360_v63 = vunpack.c.l.bf16 %v6789_v12 }
0x33c7   :  { %5278 = vmatprep.subr.bf16.mxu0 %v5643_v7 }
0x33ca   :  { %5279 = vmatpush3.bf16.msra.mxu0 %v6493_v1 }
0x33cb   :  { %5300 = vmatprep.subr.bf16.mxu0 %v5643_v7 }
0x33d1   :  { %5281 = vmatmul.mubr.msk.bf16.vlgmr.msra.gmra.mrb[44].mxu0 %vm127_vm0, %v6665_v28 }
0x33d2   :  { %5301 = vmatpush3.bf16.msra.mxu0 %v6502_v58  ;;  %5304 = vmatprep.mubr.msk.bf16.mxu0 %vm5644_vm1, %v5643_v7 }
0x33d3   :  { %5302 = vmatprep.subr.bf16.mxu0 %v5643_v7 }
0x33d6   :  { %5303 = vmatpush3.bf16.msra.mxu0 %v6511_v46 }
0x33d7   :  { %5308 = vmatprep.subr.bf16.mxu0 %v5643_v7 }
0x34a4   :  { %v3396_v1 = vpop.f32.mrb[44].mxu0 }
0x34a5   :  { %v5369_v17 = vadd.f32 %v3396_v1, %v3360_v63  ;;  %v5282_v21 = vpop.f32.mrb[45].mxu0 }
0x34a6   :  { %v3399_v23 = vpop.f32.mrb[46].mxu0 }
0x34a7   :  { %5568 = vtanh.f32 %v5369_v17  ;;  %v5283_v28 = vpop.f32.mrb[47].mxu0  ;;  %v4824_v35 = vmul.f32 -1.442695, %v5369_v17 }
0x34a9   :  { %5570 = vpow2.f32 %v4824_v35 }
0x34b1   :  { %v5569_v58 = vpop.eup %5568 }
0x34b2   :  { %3412 = vrot.lane.b32.xlu0 %v5569_v58, %s5645_s6 }
0x34b3   :  { %v5571_v30 = vpop.eup %5570 }
0x34b4   :  { %v3406_v5 = vadd.f32 1.0, %v5571_v30 }
0x34b6   :  { %5572 = vrcp.f32 %v3406_v5 }
0x34c0   :  { %v5573_v46 = vpop.eup %5572 }
0x34c1   :  { %v3410_v16 = vmul.f32 %v5573_v46, %v6660_v14 }
0x3524   :  { %v3413_v11 = vpop.permute.xlu0 %3412 }
0x3525   :  { %v3415_v19 = vmul.f32 %v5573_v46, %v3413_v11 }
0x3527   :  { %3417 = vrot.lane.b32.xlu1 %v3415_v19, %s5646_s25 }
0x3599   :  { %v3418_v42 = vpop.permute.xlu1 %3417 }
0x359a   :  { %v6795_v24 = vadd.f32 %v3418_v42, %v3410_v16 }
0x359c   :  { %5574 = vtanh.f32 %v6795_v24 }
0x35a6   :  { %v5575_v41 = vpop.eup %5574 }
0x35a7   :  { %3423 = vrot.lane.b32.xlu0 %v5575_v41, %s5645_s6 }
0x3619   :  { %v3424_v49 = vpop.permute.xlu0 %3423 }
0x361a   :  { %v3426_v52 = vmul.f32 %v5573_v46, %v3424_v49 }
0x361c   :  { %v3427_v37 = vpack.c.bf16 %v3426_v52, %v3426_v52 }
0x361e   :  { %3429 = vrot.lane.b32.xlu1 %v3427_v37, %s5646_s25 }
0x3690   :  { %v6800_v3 = vpop.permute.xlu1 %3429 }
0x3691   :  { %5289 = vmatmul.mubr.msk.bf16.vlgmr.msra.gmra.mrb[64].mxu1 %vm127_vm0, %v6800_v3 }
0x3692   :  { %5293 = vmatpush3.bf16.msra.mxu1 %v6672_v43  ;;  %5296 = vmatprep.mubr.msk.bf16.mxu1 %vm5644_vm1, %v5643_v7 }
0x3693   :  { %5294 = vmatprep.subr.bf16.mxu1 %v5643_v7 }
0x3696   :  { %5295 = vmatpush3.bf16.msra.mxu1 %v6681_v55 }
0x3697   :  { %5316 = vmatprep.subr.bf16.mxu1 %v5643_v7 }
0x3764   :  { %v6810_v14 = vpop.f32.mrb[64].mxu1 }
0x3765   :  { %v5290_v4 = vpop.f32.mrb[65].mxu1  ;;  %v3475_v13 = vmul.f32 %v6538_v54, %v6810_v14  ;;  %v3474_v59 = vmul.f32 %v6542_v45, %v6810_v14  ;;  %v3478_v0 = vmul.f32 %v6548_v48, %v6810_v14  ;;  %v3476_v47 = vmul.f32 %v6552_v36, %v6810_v14 }
0x3766   :  { %v3471_v53 = vpop.f32.mrb[66].mxu1  ;;  %v3480_v10 = vmul.f32 %v6558_v61, %v6810_v14  ;;  %v3477_v44 = vmul.f32 %v6562_v33, %v6810_v14  ;;  %v3479_v63 = vmul.f32 %v6568_v51, %v6810_v14  ;;  %v3481_v17 = vmul.f32 %v6573_v6, %v6810_v14 }
0x3767   :  { %v5291_v32 = vpop.f32.mrb[67].mxu1  ;;  %v3485_v56 = vsel %vm127_vm0, %v3475_v13, 0.0  ;;  %v3482_v62 = vsel %vm127_vm0, %v3474_v59, 0.0  ;;  %v3494_v2 = vsel %vm127_vm0, %v3478_v0, 0.0  ;;  %v3488_v9 = vsel %vm127_vm0, %v3476_v47, 0.0 }
0x3768   :  { %3486 = vadd.xlane.f32.xlu1 %v3485_v56  ;;  %3483 = vadd.xlane.f32.xlu0 %v3482_v62  ;;  %v3500_v15 = vsel %vm127_vm0, %v3480_v10, 0.0  ;;  %v3491_v60 = vsel %vm127_vm0, %v3477_v44, 0.0  ;;  %v3497_v1 = vsel %vm127_vm0, %v3479_v63, 0.0  ;;  %v3503_v21 = vsel %vm127_vm0, %v3481_v17, 0.0 }
0x376c   :  { %3495 = vadd.xlane.f32.xlu1 %v3494_v2  ;;  %3489 = vadd.xlane.f32.xlu0 %v3488_v9 }
0x3770   :  { %3501 = vadd.xlane.f32.xlu1 %v3500_v15  ;;  %3492 = vadd.xlane.f32.xlu0 %v3491_v60 }
0x3774   :  { %3498 = vadd.xlane.f32.xlu0 %v3497_v1 }
0x3778   :  { %3504 = vadd.xlane.f32.xlu0 %v3503_v21 }
0x37f5   :  { %v3484_v23 = vpop.xlane.xlu0 %3483  ;;  %v3487_v28 = vpop.xlane.xlu1 %3486 }
0x37f6   :  { %v3521_v35 = vrot.slane %v3487_v28, %v6113_v29  ;;  %v3517_v30 = vrot.slane %v3484_v23, %v6113_v29 }
0x37f8   :  { %v3546_v19 = vsel %vm1408_vm2, %v3521_v35, %v3517_v30 }
0x37f9   :  { %v3490_v58 = vpop.xlane.xlu0 %3489  ;;  %v3496_v46 = vpop.xlane.xlu1 %3495 }
0x37fa   :  { %v3525_v5 = vrot.slane %v3490_v58, %v6113_v29  ;;  %v3533_v49 = vrot.slane %v3496_v46, %v6113_v29 }
0x37fc   :  { %v3547_v42 = vsel %vm1410_vm3, %v3525_v5, %v3546_v19 }
0x37fd   :  { %v3493_v11 = vpop.xlane.xlu0 %3492  ;;  %v3502_v37 = vpop.xlane.xlu1 %3501 }
0x37fe   :  { %v3529_v16 = vrot.slane %v3493_v11, %v6113_v29  ;;  %v3541_v53 = vrot.slane %v3502_v37, %v6113_v29 }
0x3800   :  { %v3548_v41 = vsel %vm1412_vm4, %v3529_v16, %v3547_v42 }
0x3801   :  { %v3499_v52 = vpop.xlane.xlu0 %3498  ;;  %v3549_v13 = vsel %vm1414_vm5, %v3533_v49, %v3548_v41 }
0x3802   :  { %v3537_v4 = vrot.slane %v3499_v52, %v6113_v29 }
0x3804   :  { %v3550_v59 = vsel %vm1416_vm6, %v3537_v4, %v3549_v13 }
0x3805   :  { %v3505_v32 = vpop.xlane.xlu0 %3504  ;;  %v3551_v62 = vsel %vm1418_vm7, %v3541_v53, %v3550_v59 }
0x3806   :  { %v3545_v56 = vrot.slane %v3505_v32, %v6113_v29 }
0x3808   :  { %v3552_v0 = vsel %vm1420_vm8, %v3545_v56, %v3551_v62 }
0x3809   :  { %v3554_v47 = vsel %vm1365_vm9, %v3552_v0, -1e+30 }
0x380a   :  { %v3555_v2 = vsel %vm1424_vm10, %v3554_v47, -inf }
0x380b   :  { %v3556_v9 = vrot.slane %v3555_v2, 4 }
0x380d   :  { %v3557_v10 = vmax.f32 %v3555_v2, %v3556_v9 }
0x380f   :  { %v3558_v44 = vrot.slane %v3557_v10, 2 }
0x3811   :  { %v3559_v15 = vmax.f32 %v3557_v10, %v3558_v44 }
0x3813   :  { %v3560_v60 = vrot.slane %v3559_v15, 1 }
0x3815   :  { %v3561_v63 = vmax.f32 %v3559_v15, %v3560_v60 }
0x3817   :  { %v3562_v1 = vsub.f32 %v3554_v47, %v3561_v63 }
0x3819   :  { %v3563_v17 = vmul.f32 1.442695, %v3562_v1 }
0x381b   :  { %5576 = vpow2.f32 %v3563_v17 }
0x3825   :  { %v5577_v21 = vpop.eup %5576 }
0x3826   :  { %v3565_v23 = vsel %vm1424_vm10, %v5577_v21, 0.0 }
0x3827   :  { %v3566_v28 = vrot.slane %v3565_v23, 4 }
0x3829   :  { %v3567_v58 = vadd.f32 %v3566_v28, %v3565_v23 }
0x382b   :  { %v3568_v35 = vrot.slane %v3567_v58, 2 }
0x382d   :  { %v3569_v30 = vadd.f32 %v3568_v35, %v3567_v58 }
0x382f   :  { %v3570_v5 = vrot.slane %v3569_v30, 1 }
0x3831   :  { %v3571_v46 = vadd.f32 %v3570_v5, %v3569_v30 }
0x3833   :  { %5578 = vrcp.f32 %v3571_v46 }
0x383d   :  { %v5579_v11 = vpop.eup %5578 }
0x383e   :  { %v6855_v19 = vmul.f32 %v5579_v11, %v5577_v21 }
0x3840   :  { %v3584_v16 = vrot.slane %v6855_v19, %v6141_v25  ;;  %v3577_v42 = vrot.slane %v6855_v19, %v6144_v27  ;;  %v3605_v41 = vrot.slane %v6855_v19, %v6168_v18  ;;  %v3591_v49 = vrot.slane %v6855_v19, %v6153_v8 }
0x3841   :  { %v3619_v52 = vrot.slane %v6855_v19, %v6185_v26  ;;  %v3598_v37 = vrot.slane %v6855_v19, %v6156_v34  ;;  %v3612_v4 = vrot.slane %v6855_v19, %v6171_v20  ;;  %v3626_v13 = vrot.slane %v6855_v19, %v6188_v39 }
0x3842   :  { %3586 = vbcast.lane.b32.xlu0 %v3584_v16, 256  ;;  %3579 = vbcast.lane.b32.xlu1 %v3577_v42, 256 }
0x3846   :  { %3607 = vbcast.lane.b32.xlu0 %v3605_v41, 256  ;;  %3593 = vbcast.lane.b32.xlu1 %v3591_v49, 256 }
0x384a   :  { %3621 = vbcast.lane.b32.xlu0 %v3619_v52, 256  ;;  %3600 = vbcast.lane.b32.xlu1 %v3598_v37, 256 }
0x384e   :  { %3655 = vrot.lane.b32.xlu0 %v6810_v14, %s5647_s17  ;;  %3614 = vbcast.lane.b32.xlu1 %v3612_v4, 256 }
0x3852   :  { %3628 = vbcast.lane.b32.xlu1 %v3626_v13, 256 }
0x38b4   :  { %v3587_v59 = vpop.permute.xlu0 %3586  ;;  %v3580_v53 = vpop.permute.xlu1 %3579 }
0x38b5   :  { %v3631_v32 = vmul.f32 %v6538_v54, %v3587_v59  ;;  %v3630_v56 = vmul.f32 %v6542_v45, %v3580_v53  ;;  %v6913_v59 = vld [vmem:[%s7249_s9] sm:$0xff]   ;;  %v6922_v53 = vld [vmem:[%s7249_s9 + $0x8] sm:$0xff]  }
0x38b7   :  { %v3639_v47 = vsel %vm127_vm0, %v3631_v32, 0.0  ;;  %v3638_v2 = vsel %vm127_vm0, %v3630_v56, 0.0  ;;  %v5630_v32 = vld [vmem:[%s7248_s8] sm:$0xff]   ;;  %v5631_v56 = vld [vmem:[%s7248_s8 + $0x8] sm:$0xff]  }
0x38b8   :  { %v3608_v62 = vpop.permute.xlu0 %3607  ;;  %v3594_v0 = vpop.permute.xlu1 %3593  ;;  %v3640_v10 = vadd.f32 %v3639_v47, %v3638_v2 }
0x38b9   :  { %v3632_v9 = vmul.f32 %v6552_v36, %v3594_v0  ;;  %v3634_v15 = vmul.f32 %v6548_v48, %v3608_v62  ;;  %v3784_v62 = vunpack.c.h.bf16 %v6789_v12 }
0x38bb   :  { %v3641_v14 = vsel %vm127_vm0, %v3632_v9, 0.0  ;;  %v3645_v21 = vsel %vm127_vm0, %v3634_v15, 0.0 }
0x38bc   :  { %v3601_v44 = vpop.permute.xlu1 %3600  ;;  %v3642_v63 = vadd.f32 %v3641_v14, %v3640_v10  ;;  %v3622_v54 = vpop.permute.xlu0 %3621 }
0x38bd   :  { %v3633_v60 = vmul.f32 %v6562_v33, %v3601_v44  ;;  %v3636_v23 = vmul.f32 %v6558_v61, %v3622_v54  ;;  %v6895_v61 = vld [vmem:[%s7250_s11] sm:$0xff]  }
0x38bf   :  { %v3643_v45 = vsel %vm127_vm0, %v3633_v60, 0.0  ;;  %v3649_v48 = vsel %vm127_vm0, %v3636_v23, 0.0 }
0x38c0   :  { %v3644_v1 = vadd.f32 %v3643_v45, %v3642_v63  ;;  %v3615_v17 = vpop.permute.xlu1 %3614 }
0x38c1   :  { %v3635_v36 = vmul.f32 %v6568_v51, %v3615_v17  ;;  %v6904_v51 = vld [vmem:[%s7250_s11 + $0x8] sm:$0xff]  }
0x38c2   :  { %v3646_v28 = vadd.f32 %v3645_v21, %v3644_v1 }
0x38c3   :  { %v3647_v58 = vsel %vm127_vm0, %v3635_v36, 0.0 }
0x38c4   :  { %v3648_v35 = vadd.f32 %v3647_v58, %v3646_v28  ;;  %v3629_v30 = vpop.permute.xlu1 %3628 }
0x38c5   :  { %v3637_v33 = vmul.f32 %v6573_v6, %v3629_v30  ;;  %v3656_v6 = vpop.permute.xlu0 %3655 }
0x38c6   :  { %v3650_v5 = vadd.f32 %v3649_v48, %v3648_v35  ;;  %v6959_v35 = vld [vmem:[#allocation2 + $0x8] sm:$0xff]  ;;  %v6963_v48 = vld [vmem:[#allocation2] sm:$0xff] }
0x38c7   :  { %v3651_v46 = vsel %vm127_vm0, %v3637_v33, 0.0 }
0x38c8   :  { %v3652_v11 = vadd.f32 %v3651_v46, %v3650_v5 }
0x38ca   :  { %v3653_v16 = vpack.c.bf16 %v3652_v11, %v3652_v11  ;;  %v6969_v11 = vld [vmem:[#allocation2 + $0x10] sm:$0xff] }
0x38cc   :  { %5297 = vmatmul.mubr.msk.bf16.vlgmr.msra.gmra.mrb[68].mxu1 %vm127_vm0, %v3653_v16 }
0x38cd   :  { %5317 = vmatpush3.bf16.msra.mxu1 %v6895_v61  ;;  %5320 = vmatprep.mubr.msk.bf16.mxu1 %vm5644_vm1, %v5643_v7 }
0x38ce   :  { %5318 = vmatprep.subr.bf16.mxu1 %v5643_v7 }
0x38d1   :  { %5319 = vmatpush3.bf16.msra.mxu1 %v6904_v51 }
0x38d2   :  { %5324 = vmatprep.subr.bf16.mxu1 %v5643_v7 }
0x399f   :  { %v3695_v42 = vpop.f32.mrb[68].mxu1 }
0x39a0   :  { %v3696_v41 = vadd.f32 %v3695_v42, %v3656_v6  ;;  %v5298_v49 = vpop.f32.mrb[69].mxu1  ;;  %v6973_v6 = vld [vmem:[#allocation2 + $0x18] sm:$0xff] }
0x39a1   :  { %v3698_v52 = vpop.f32.mrb[70].mxu1 }
0x39a2   :  { %5580 = vtanh.f32 %v3696_v41  ;;  %v5299_v37 = vpop.f32.mrb[71].mxu1  ;;  %v6979_v52 = vld [vmem:[#allocation2 + $0x20] sm:$0xff] }
0x39ac   :  { %v5581_v4 = vpop.eup %5580 }
0x39ad   :  { %3703 = vst.msk [vmem:[#allocation3 + $0x28] sm:$0xff] %vm127_vm0, %v5581_v4  ;;  %v3740_v13 = vpack.c.bf16 %v5581_v4, %v5581_v4  ;;  %v6983_v4 = vld [vmem:[#allocation2 + $0x28] sm:$0xff] }
0x39af   :  { %5305 = vmatmul.mubr.msk.bf16.vlgmr.msra.gmra.mrb[48].mxu0 %vm127_vm0, %v3740_v13 }
0x39b0   :  { %5309 = vmatpush3.bf16.msra.mxu0 %v6913_v59  ;;  %5312 = vmatprep.mubr.msk.bf16.mxu0 %vm5644_vm1, %v5643_v7 }
0x39b1   :  { %5310 = vmatprep.subr.bf16.mxu0 %v5643_v7 }
0x39b4   :  { %5311 = vmatpush3.bf16.msra.mxu0 %v6922_v53 }
0x39b5   :  { %5332 = vmatprep.subr.bf16.mxu0 %v5643_v7 }
0x39bb   :  { %5313 = vmatmul.mubr.msk.bf16.vlgmr.msra.gmra.mrb[48].mxu0 %vm127_vm0, %v6800_v3 }
0x39bc   :  { %5333 = vmatpush3.bf16.msra.mxu0 %v5630_v32  ;;  %5336 = vmatprep.mubr.msk.bf16.mxu0 %vm5644_vm1, %v5643_v7 }
0x39bd   :  { %5334 = vmatprep.subr.bf16.mxu0 %v5643_v7 }
0x39c0   :  { %5335 = vmatpush3.bf16.msra.mxu0 %v5631_v56 }
0x39c1   :  { %5340 = vmatprep.subr.bf16.mxu0 %v5643_v7 }
0x3a8e   :  { %v3820_v3 = vpop.f32.mrb[48].mxu0 }
0x3a8f   :  { %v5370_v0 = vadd.f32 %v3820_v3, %v3784_v62  ;;  %v5314_v47 = vpop.f32.mrb[49].mxu0  ;;  %v6989_v62 = vld [vmem:[#allocation2 + $0x30] sm:$0xff] }
0x3a90   :  { %v3823_v2 = vpop.f32.mrb[50].mxu0 }
0x3a91   :  { %5582 = vtanh.f32 %v5370_v0  ;;  %v5315_v9 = vpop.f32.mrb[51].mxu0  ;;  %v4830_v10 = vmul.f32 -1.442695, %v5370_v0  ;;  %v6993_v0 = vld [vmem:[#allocation2 + $0x38] sm:$0xff] }
0x3a93   :  { %5584 = vpow2.f32 %v4830_v10 }
0x3a9b   :  { %v5583_v14 = vpop.eup %5582 }
0x3a9c   :  { %3836 = vrot.lane.b32.xlu1 %v5583_v14, %s5645_s6 }
0x3a9d   :  { %v5585_v44 = vpop.eup %5584 }
0x3a9e   :  { %v3830_v15 = vadd.f32 1.0, %v5585_v44 }
0x3aa0   :  { %5586 = vrcp.f32 %v3830_v15 }
0x3aaa   :  { %v5587_v60 = vpop.eup %5586 }
0x3aab   :  { %v3834_v12 = vmul.f32 %v5587_v60, %v6795_v24 }
0x3b0e   :  { %v3837_v63 = vpop.permute.xlu1 %3836 }
0x3b0f   :  { %v3839_v54 = vmul.f32 %v5587_v60, %v3837_v63 }
0x3b11   :  { %3841 = vrot.lane.b32.xlu0 %v3839_v54, %s5646_s25 }
0x3b83   :  { %v3842_v45 = vpop.permute.xlu0 %3841 }
0x3b84   :  { %v6942_v1 = vadd.f32 %v3842_v45, %v3834_v12 }
0x3b86   :  { %5588 = vtanh.f32 %v6942_v1 }
0x3b90   :  { %v5589_v17 = vpop.eup %5588 }
0x3b91   :  { %3847 = vrot.lane.b32.xlu1 %v5589_v17, %s5645_s6 }
0x3c03   :  { %v3848_v21 = vpop.permute.xlu1 %3847 }
0x3c04   :  { %v3850_v23 = vmul.f32 %v5587_v60, %v3848_v21 }
0x3c06   :  { %v3851_v36 = vpack.c.bf16 %v3850_v23, %v3850_v23 }
0x3c08   :  { %3853 = vrot.lane.b32.xlu0 %v3851_v36, %s5646_s25 }
0x3c7a   :  { %v6947_v28 = vpop.permute.xlu0 %3853 }
0x3c7b   :  { %5321 = vmatmul.mubr.msk.bf16.vlgmr.msra.gmra.mrb[72].mxu1 %vm127_vm0, %v6947_v28 }
0x3c7c   :  { %5325 = vmatpush3.bf16.msra.mxu1 %v6672_v43  ;;  %5328 = vmatprep.mubr.msk.bf16.mxu1 %vm5644_vm1, %v5643_v7 }
0x3c7d   :  { %5326 = vmatprep.subr.bf16.mxu1 %v5643_v7 }
0x3c80   :  { %5327 = vmatpush3.bf16.msra.mxu1 %v6681_v55 }
0x3c81   :  { %5348 = vmatprep.subr.bf16.mxu1 %v5643_v7 }
0x3d4e   :  { %v6957_v24 = vpop.f32.mrb[72].mxu1 }
0x3d4f   :  { %v5322_v58 = vpop.f32.mrb[73].mxu1  ;;  %v3899_v30 = vmul.f32 %v6959_v35, %v6957_v24  ;;  %v3898_v43 = vmul.f32 %v6963_v48, %v6957_v24  ;;  %v3900_v16 = vmul.f32 %v6969_v11, %v6957_v24  ;;  %v3901_v42 = vmul.f32 %v6973_v6, %v6957_v24 }
0x3d50   :  { %v3895_v33 = vpop.f32.mrb[74].mxu1  ;;  %v3902_v37 = vmul.f32 %v6979_v52, %v6957_v24  ;;  %v3903_v13 = vmul.f32 %v6983_v4, %v6957_v24  ;;  %v3904_v3 = vmul.f32 %v6989_v62, %v6957_v24  ;;  %v3905_v47 = vmul.f32 %v6993_v0, %v6957_v24 }
0x3d51   :  { %v5323_v5 = vpop.f32.mrb[75].mxu1  ;;  %v3909_v46 = vsel %vm127_vm0, %v3899_v30, 0.0  ;;  %v3906_v55 = vsel %vm127_vm0, %v3898_v43, 0.0  ;;  %v3912_v41 = vsel %vm127_vm0, %v3900_v16, 0.0  ;;  %v3915_v49 = vsel %vm127_vm0, %v3901_v42, 0.0 }
0x3d52   :  { %3910 = vadd.xlane.f32.xlu0 %v3909_v46  ;;  %3907 = vadd.xlane.f32.xlu1 %v3906_v55  ;;  %v3918_v32 = vsel %vm127_vm0, %v3902_v37, 0.0  ;;  %v3921_v56 = vsel %vm127_vm0, %v3903_v13, 0.0  ;;  %v3924_v2 = vsel %vm127_vm0, %v3904_v3, 0.0  ;;  %v3927_v9 = vsel %vm127_vm0, %v3905_v47, 0.0 }
0x3d56   :  { %3913 = vadd.xlane.f32.xlu0 %v3912_v41  ;;  %3916 = vadd.xlane.f32.xlu1 %v3915_v49 }
0x3d5a   :  { %3919 = vadd.xlane.f32.xlu0 %v3918_v32  ;;  %3922 = vadd.xlane.f32.xlu1 %v3921_v56 }
0x3d5e   :  { %3925 = vadd.xlane.f32.xlu0 %v3924_v2  ;;  %3928 = vadd.xlane.f32.xlu1 %v3927_v9 }
0x3ddf   :  { %v3911_v14 = vpop.xlane.xlu0 %3910  ;;  %v3908_v10 = vpop.xlane.xlu1 %3907 }
0x3de0   :  { %v3945_v44 = vrot.slane %v3911_v14, %v6113_v29  ;;  %v3941_v15 = vrot.slane %v3908_v10, %v6113_v29 }
0x3de2   :  { %v3970_v12 = vsel %vm1408_vm2, %v3945_v44, %v3941_v15 }
0x3de3   :  { %v3914_v60 = vpop.xlane.xlu0 %3913  ;;  %v3917_v63 = vpop.xlane.xlu1 %3916 }
0x3de4   :  { %v3949_v54 = vrot.slane %v3914_v60, %v6113_v29  ;;  %v3953_v45 = vrot.slane %v3917_v63, %v6113_v29 }
0x3de6   :  { %v3971_v17 = vsel %vm1410_vm3, %v3949_v54, %v3970_v12 }
0x3de7   :  { %v3920_v21 = vpop.xlane.xlu0 %3919  ;;  %v3923_v23 = vpop.xlane.xlu1 %3922  ;;  %v3972_v58 = vsel %vm1412_vm4, %v3953_v45, %v3971_v17 }
0x3de8   :  { %v3957_v36 = vrot.slane %v3920_v21, %v6113_v29  ;;  %v3961_v30 = vrot.slane %v3923_v23, %v6113_v29 }
0x3dea   :  { %v3973_v43 = vsel %vm1414_vm5, %v3957_v36, %v3972_v58 }
0x3deb   :  { %v3926_v33 = vpop.xlane.xlu0 %3925  ;;  %v3929_v5 = vpop.xlane.xlu1 %3928  ;;  %v3974_v16 = vsel %vm1416_vm6, %v3961_v30, %v3973_v43 }
0x3dec   :  { %v3965_v46 = vrot.slane %v3926_v33, %v6113_v29  ;;  %v3969_v55 = vrot.slane %v3929_v5, %v6113_v29 }
0x3dee   :  { %v3975_v42 = vsel %vm1418_vm7, %v3965_v46, %v3974_v16 }
0x3def   :  { %v3976_v41 = vsel %vm1420_vm8, %v3969_v55, %v3975_v42 }
0x3df0   :  { %v3978_v49 = vsel %vm1365_vm9, %v3976_v41, -1e+30 }
0x3df1   :  { %v3979_v37 = vsel %vm1424_vm10, %v3978_v49, -inf }
0x3df2   :  { %v3980_v13 = vrot.slane %v3979_v37, 4 }
0x3df4   :  { %v3981_v32 = vmax.f32 %v3979_v37, %v3980_v13 }
0x3df6   :  { %v3982_v56 = vrot.slane %v3981_v32, 2 }
0x3df8   :  { %v3983_v3 = vmax.f32 %v3981_v32, %v3982_v56 }
0x3dfa   :  { %v3984_v47 = vrot.slane %v3983_v3, 1 }
0x3dfc   :  { %v3985_v2 = vmax.f32 %v3983_v3, %v3984_v47 }
0x3dfe   :  { %v3986_v9 = vsub.f32 %v3978_v49, %v3985_v2 }
0x3e00   :  { %v3987_v14 = vmul.f32 1.442695, %v3986_v9 }
0x3e02   :  { %5590 = vpow2.f32 %v3987_v14 }
0x3e0c   :  { %v5591_v10 = vpop.eup %5590 }
0x3e0d   :  { %v3989_v44 = vsel %vm1424_vm10, %v5591_v10, 0.0 }
0x3e0e   :  { %v3990_v15 = vrot.slane %v3989_v44, 4 }
0x3e10   :  { %v3991_v60 = vadd.f32 %v3990_v15, %v3989_v44 }
0x3e12   :  { %v3992_v63 = vrot.slane %v3991_v60, 2 }
0x3e14   :  { %v3993_v54 = vadd.f32 %v3992_v63, %v3991_v60 }
0x3e16   :  { %v3994_v12 = vrot.slane %v3993_v54, 1 }
0x3e18   :  { %v3995_v45 = vadd.f32 %v3994_v12, %v3993_v54 }
0x3e1a   :  { %5592 = vrcp.f32 %v3995_v45 }
0x3e24   :  { %v5593_v17 = vpop.eup %5592 }
0x3e25   :  { %v7018_v21 = vmul.f32 %v5593_v17, %v5591_v10 }
0x3e27   :  { %v4008_v23 = vrot.slane %v7018_v21, %v6141_v25  ;;  %v4001_v36 = vrot.slane %v7018_v21, %v6144_v27  ;;  %v4015_v58 = vrot.slane %v7018_v21, %v6153_v8  ;;  %v4022_v30 = vrot.slane %v7018_v21, %v6156_v34 }
0x3e28   :  { %v4029_v43 = vrot.slane %v7018_v21, %v6168_v18  ;;  %v4036_v33 = vrot.slane %v7018_v21, %v6171_v20  ;;  %v4043_v5 = vrot.slane %v7018_v21, %v6185_v26  ;;  %v4050_v46 = vrot.slane %v7018_v21, %v6188_v39 }
0x3e29   :  { %4010 = vbcast.lane.b32.xlu1 %v4008_v23, 256  ;;  %4003 = vbcast.lane.b32.xlu0 %v4001_v36, 256 }
0x3e2d   :  { %4017 = vbcast.lane.b32.xlu1 %v4015_v58, 256  ;;  %4024 = vbcast.lane.b32.xlu0 %v4022_v30, 256 }
0x3e31   :  { %4031 = vbcast.lane.b32.xlu1 %v4029_v43, 256  ;;  %4038 = vbcast.lane.b32.xlu0 %v4036_v33, 256 }
0x3e35   :  { %4045 = vbcast.lane.b32.xlu1 %v4043_v5, 256  ;;  %4052 = vbcast.lane.b32.xlu0 %v4050_v46, 256 }
0x3e39   :  { %4079 = vrot.lane.b32.xlu1 %v6957_v24, %s5647_s17 }
0x3e9b   :  { %v4011_v55 = vpop.permute.xlu1 %4010  ;;  %v4004_v16 = vpop.permute.xlu0 %4003 }
0x3e9c   :  { %v4055_v42 = vmul.f32 %v6959_v35, %v4011_v55  ;;  %v4054_v41 = vmul.f32 %v6963_v48, %v4004_v16 }
0x3e9e   :  { %v4063_v49 = vsel %vm127_vm0, %v4055_v42, 0.0  ;;  %v4062_v37 = vsel %vm127_vm0, %v4054_v41, 0.0 }
0x3e9f   :  { %v4018_v13 = vpop.permute.xlu1 %4017  ;;  %v4025_v32 = vpop.permute.xlu0 %4024  ;;  %v4064_v47 = vadd.f32 %v4063_v49, %v4062_v37 }
0x3ea0   :  { %v4056_v56 = vmul.f32 %v6969_v11, %v4018_v13  ;;  %v4057_v3 = vmul.f32 %v6973_v6, %v4025_v32 }
0x3ea2   :  { %v4065_v2 = vsel %vm127_vm0, %v4056_v56, 0.0  ;;  %v4067_v10 = vsel %vm127_vm0, %v4057_v3, 0.0 }
0x3ea3   :  { %v4066_v24 = vadd.f32 %v4065_v2, %v4064_v47  ;;  %v4032_v9 = vpop.permute.xlu1 %4031  ;;  %v4039_v14 = vpop.permute.xlu0 %4038 }
0x3ea4   :  { %v4058_v44 = vmul.f32 %v6979_v52, %v4032_v9  ;;  %v4059_v15 = vmul.f32 %v6983_v4, %v4039_v14 }
0x3ea5   :  { %v4068_v60 = vadd.f32 %v4067_v10, %v4066_v24 }
0x3ea6   :  { %v4069_v63 = vsel %vm127_vm0, %v4058_v44, 0.0  ;;  %v4071_v17 = vsel %vm127_vm0, %v4059_v15, 0.0 }
0x3ea7   :  { %v4070_v54 = vadd.f32 %v4069_v63, %v4068_v60  ;;  %v4046_v12 = vpop.permute.xlu1 %4045  ;;  %v4053_v45 = vpop.permute.xlu0 %4052 }
0x3ea8   :  { %v4060_v23 = vmul.f32 %v6989_v62, %v4046_v12  ;;  %v4061_v36 = vmul.f32 %v6993_v0, %v4053_v45 }
0x3ea9   :  { %v4072_v58 = vadd.f32 %v4071_v17, %v4070_v54 }
0x3eaa   :  { %v4073_v30 = vsel %vm127_vm0, %v4060_v23, 0.0  ;;  %v4075_v33 = vsel %vm127_vm0, %v4061_v36, 0.0  ;;  %v5640_v36 = vld [vmem:[%s7252_s12] sm:$0xff]  }
0x3eab   :  { %v4074_v43 = vadd.f32 %v4073_v30, %v4072_v58  ;;  %v4080_v55 = vpop.permute.xlu1 %4079 }
0x3ead   :  { %v4076_v5 = vadd.f32 %v4075_v33, %v4074_v43 }
0x3eaf   :  { %v4077_v46 = vpack.c.bf16 %v4076_v5, %v4076_v5 }
0x3eb1   :  { %5329 = vmatmul.mubr.msk.bf16.vlgmr.msra.gmra.mrb[76].mxu1 %vm127_vm0, %v4077_v46 }
0x3eb2   :  { %5349 = vmatpush3.bf16.msra.mxu1 %v6895_v61  ;;  %5352 = vmatprep.mubr.msk.bf16.mxu1 %vm5644_vm1, %v5643_v7 }
0x3eb3   :  { %5350 = vmatprep.subr.bf16.mxu1 %v5643_v7 }
0x3eb6   :  { %5351 = vmatpush3.bf16.msra.mxu1 %v6904_v51  ;;  %v4163_v51 = vld [vmem:[#allocation5 + $0x1c] sm:$0xf] }
0x3eb7   :  { %5356 = vmatprep.subr.bf16.mxu1 %v5643_v7  ;;  %v4208_v32 = vunpack.c.l.bf16 %v4163_v51 }
0x3f84   :  { %v4119_v16 = vpop.f32.mrb[76].mxu1 }
0x3f85   :  { %v4120_v42 = vadd.f32 %v4119_v16, %v4080_v55  ;;  %v5330_v41 = vpop.f32.mrb[77].mxu1 }
0x3f86   :  { %v4122_v49 = vpop.f32.mrb[78].mxu1 }
0x3f87   :  { %5594 = vtanh.f32 %v4120_v42  ;;  %v5331_v37 = vpop.f32.mrb[79].mxu1 }
0x3f91   :  { %v5595_v13 = vpop.eup %5594 }
0x3f92   :  { %4127 = vst.msk [vmem:[#allocation3 + $0x30] sm:$0xff] %vm127_vm0, %v5595_v13  ;;  %v4164_v61 = vpack.c.bf16 %v5595_v13, %v5595_v13 }
0x3f94   :  { %5337 = vmatmul.mubr.msk.bf16.vlgmr.msra.gmra.mrb[52].mxu0 %vm127_vm0, %v4164_v61 }
0x3f95   :  { %5341 = vmatpush3.bf16.msra.mxu0 %v6913_v59  ;;  %5344 = vmatprep.mubr.msk.bf16.mxu0 %vm5644_vm1, %v5643_v7 }
0x3f96   :  { %5342 = vmatprep.subr.bf16.mxu0 %v5643_v7 }
0x3f99   :  { %5343 = vmatpush3.bf16.msra.mxu0 %v6922_v53 }
0x3fa0   :  { %5345 = vmatmul.mubr.msk.bf16.vlgmr.msra.gmra.mrb[52].mxu0 %vm127_vm0, %v6947_v28 }
0x4073   :  { %v4244_v56 = vpop.f32.mrb[52].mxu0 }
0x4074   :  { %v5371_v3 = vadd.f32 %v4244_v56, %v4208_v32  ;;  %v5346_v47 = vpop.f32.mrb[53].mxu0 }
0x4075   :  { %v4247_v2 = vpop.f32.mrb[54].mxu0 }
0x4076   :  { %5596 = vtanh.f32 %v5371_v3  ;;  %v5347_v24 = vpop.f32.mrb[55].mxu0  ;;  %v4836_v59 = vmul.f32 -1.442695, %v5371_v3 }
0x4078   :  { %5598 = vpow2.f32 %v4836_v59 }
0x4080   :  { %v5597_v9 = vpop.eup %5596 }
0x4081   :  { %4260 = vrot.lane.b32.xlu0 %v5597_v9, %s5645_s6 }
0x4082   :  { %v5599_v14 = vpop.eup %5598 }
0x4083   :  { %v4254_v10 = vadd.f32 1.0, %v5599_v14 }
0x4085   :  { %5600 = vrcp.f32 %v4254_v10 }
0x408f   :  { %v5601_v53 = vpop.eup %5600 }
0x4090   :  { %v4258_v28 = vmul.f32 %v5601_v53, %v6942_v1  ;;  %v5641_v1 = vld [vmem:[%s7252_s12 + $0x8] sm:$0xff]  }
0x40f3   :  { %v4261_v44 = vpop.permute.xlu0 %4260 }
0x40f4   :  { %v4263_v15 = vmul.f32 %v5601_v53, %v4261_v44 }
0x40f6   :  { %4265 = vrot.lane.b32.xlu1 %v4263_v15, %s5646_s25 }
0x4168   :  { %v4266_v60 = vpop.permute.xlu1 %4265 }
0x4169   :  { %v4268_v63 = vadd.f32 %v4266_v60, %v4258_v28 }
0x416b   :  { %5602 = vtanh.f32 %v4268_v63 }
0x4175   :  { %v5603_v54 = vpop.eup %5602 }
0x4176   :  { %4271 = vrot.lane.b32.xlu0 %v5603_v54, %s5645_s6 }
0x41e8   :  { %v4272_v12 = vpop.permute.xlu0 %4271 }
0x41e9   :  { %v4274_v45 = vmul.f32 %v5601_v53, %v4272_v12 }
0x41eb   :  { %v4275_v17 = vpack.c.bf16 %v4274_v45, %v4274_v45 }
0x41ed   :  { %4277 = vrot.lane.b32.xlu1 %v4275_v17, %s5646_s25 }
0x425f   :  { %v4278_v23 = vpop.permute.xlu1 %4277 }
0x4260   :  { %5353 = vmatmul.mubr.msk.bf16.vlgmr.msra.gmra.mrb[80].mxu1 %vm127_vm0, %v4278_v23 }
0x4261   :  { %5357 = vmatpush3.bf16.msra.mxu1 %v5640_v36  ;;  %5360 = vmatprep.mubr.msk.bf16.mxu1 %vm5644_vm1, %v5643_v7 }
0x4262   :  { %5358 = vmatprep.subr.bf16.mxu1 %v5643_v7 }
0x4265   :  { %5359 = vmatpush3.bf16.msra.mxu1 %v5641_v1 }
0x4333   :  { %v7085_v58 = vpop.f32.mrb[80].mxu1 }
0x4334   :  { %v5354_v30 = vpop.f32.mrb[81].mxu1  ;;  %v4323_v43 = vmul.f32 %v6959_v35, %v7085_v58  ;;  %v4322_v33 = vmul.f32 %v6963_v48, %v7085_v58  ;;  %v4326_v16 = vmul.f32 %v6979_v52, %v7085_v58  ;;  %v4324_v42 = vmul.f32 %v6969_v11, %v7085_v58 }
0x4335   :  { %v4319_v5 = vpop.f32.mrb[82].mxu1  ;;  %v4328_v37 = vmul.f32 %v6989_v62, %v7085_v58  ;;  %v4325_v13 = vmul.f32 %v6973_v6, %v7085_v58  ;;  %v4327_v32 = vmul.f32 %v6983_v4, %v7085_v58  ;;  %v4329_v3 = vmul.f32 %v6993_v0, %v7085_v58 }
0x4336   :  { %v5355_v46 = vpop.f32.mrb[83].mxu1  ;;  %v4333_v55 = vsel %vm127_vm0, %v4323_v43, 0.0  ;;  %v4330_v7 = vsel %vm127_vm0, %v4322_v33, 0.0  ;;  %v4342_v41 = vsel %vm127_vm0, %v4326_v16, 0.0  ;;  %v4336_v49 = vsel %vm127_vm0, %v4324_v42, 0.0 }
0x4337   :  { %4334 = vadd.xlane.f32.xlu1 %v4333_v55  ;;  %4331 = vadd.xlane.f32.xlu0 %v4330_v7  ;;  %v4348_v61 = vsel %vm127_vm0, %v4328_v37, 0.0  ;;  %v4339_v51 = vsel %vm127_vm0, %v4325_v13, 0.0  ;;  %v4345_v56 = vsel %vm127_vm0, %v4327_v32, 0.0  ;;  %v4351_v47 = vsel %vm127_vm0, %v4329_v3, 0.0 }
0x433b   :  { %4343 = vadd.xlane.f32.xlu1 %v4342_v41  ;;  %4337 = vadd.xlane.f32.xlu0 %v4336_v49 }
0x433f   :  { %4349 = vadd.xlane.f32.xlu1 %v4348_v61  ;;  %4340 = vadd.xlane.f32.xlu0 %v4339_v51 }
0x4343   :  { %4346 = vadd.xlane.f32.xlu0 %v4345_v56 }
0x4347   :  { %4352 = vadd.xlane.f32.xlu0 %v4351_v47 }
0x43c4   :  { %v4332_v2 = vpop.xlane.xlu0 %4331  ;;  %v4335_v24 = vpop.xlane.xlu1 %4334 }
0x43c5   :  { %v4369_v59 = vrot.slane %v4335_v24, %v6113_v29  ;;  %v4365_v14 = vrot.slane %v4332_v2, %v6113_v29 }
0x43c7   :  { %v4394_v15 = vsel %vm1408_vm2, %v4369_v59, %v4365_v14 }
0x43c8   :  { %v4338_v9 = vpop.xlane.xlu0 %4337  ;;  %v4344_v53 = vpop.xlane.xlu1 %4343 }
0x43c9   :  { %v4373_v10 = vrot.slane %v4338_v9, %v6113_v29  ;;  %v4381_v54 = vrot.slane %v4344_v53, %v6113_v29 }
0x43cb   :  { %v4395_v60 = vsel %vm1410_vm3, %v4373_v10, %v4394_v15 }
0x43cc   :  { %v4341_v44 = vpop.xlane.xlu0 %4340  ;;  %v4350_v45 = vpop.xlane.xlu1 %4349 }
0x43cd   :  { %v4377_v28 = vrot.slane %v4341_v44, %v6113_v29  ;;  %v4389_v1 = vrot.slane %v4350_v45, %v6113_v29  ;;  %v4592_v45 = vld [vmem:[#allocation3 + $0x28] sm:$0xff] }
0x43cf   :  { %v4396_v63 = vsel %vm1412_vm4, %v4377_v28, %v4395_v60 }
0x43d0   :  { %v4347_v12 = vpop.xlane.xlu0 %4346  ;;  %v4397_v23 = vsel %vm1414_vm5, %v4381_v54, %v4396_v63 }
0x43d1   :  { %v4385_v17 = vrot.slane %v4347_v12, %v6113_v29 }
0x43d3   :  { %v4398_v36 = vsel %vm1416_vm6, %v4385_v17, %v4397_v23 }
0x43d4   :  { %v4353_v30 = vpop.xlane.xlu0 %4352  ;;  %v4399_v33 = vsel %vm1418_vm7, %v4389_v1, %v4398_v36 }
0x43d5   :  { %v4393_v43 = vrot.slane %v4353_v30, %v6113_v29 }
0x43d7   :  { %v4400_v5 = vsel %vm1420_vm8, %v4393_v43, %v4399_v33  ;;  %v4593_v33 = vld [vmem:[#allocation3 + $0x30] sm:$0xff] }
0x43d8   :  { %v4402_v46 = vsel %vm1365_vm9, %v4400_v5, -1e+30 }
0x43d9   :  { %v4403_v55 = vsel %vm1424_vm10, %v4402_v46, -inf }
0x43da   :  { %v4404_v7 = vrot.slane %v4403_v55, 4 }
0x43dc   :  { %v4405_v16 = vmax.f32 %v4403_v55, %v4404_v7 }
0x43de   :  { %v4406_v42 = vrot.slane %v4405_v16, 2 }
0x43e0   :  { %v4407_v41 = vmax.f32 %v4405_v16, %v4406_v42 }
0x43e2   :  { %v4408_v49 = vrot.slane %v4407_v41, 1 }
0x43e4   :  { %v4409_v37 = vmax.f32 %v4407_v41, %v4408_v49 }
0x43e6   :  { %v4410_v13 = vsub.f32 %v4402_v46, %v4409_v37 }
0x43e8   :  { %v4411_v61 = vmul.f32 1.442695, %v4410_v13 }
0x43ea   :  { %5604 = vpow2.f32 %v4411_v61 }
0x43f4   :  { %v5605_v51 = vpop.eup %5604 }
0x43f5   :  { %v4413_v32 = vsel %vm1424_vm10, %v5605_v51, 0.0 }
0x43f6   :  { %v4414_v56 = vrot.slane %v4413_v32, 4 }
0x43f8   :  { %v4415_v3 = vadd.f32 %v4414_v56, %v4413_v32 }
0x43fa   :  { %v4416_v47 = vrot.slane %v4415_v3, 2 }
0x43fc   :  { %v4417_v2 = vadd.f32 %v4416_v47, %v4415_v3 }
0x43fe   :  { %v4418_v40 = vrot.slane %v4417_v2, 1 }
0x4400   :  { %v4419_v24 = vadd.f32 %v4418_v40, %v4417_v2 }
0x4402   :  { %5606 = vrcp.f32 %v4419_v24 }
0x440c   :  { %v5607_v9 = vpop.eup %5606 }
0x440d   :  { %v4421_v59 = vmul.f32 %v5607_v9, %v5605_v51 }
0x440f   :  { %v4432_v14 = vrot.slane %v4421_v59, %v6141_v25  ;;  %v4425_v10 = vrot.slane %v4421_v59, %v6144_v27  ;;  %v4453_v53 = vrot.slane %v4421_v59, %v6168_v18  ;;  %v4439_v44 = vrot.slane %v4421_v59, %v6153_v8  ;;  %v4588_v8 = vld [vmem:[#allocation3 + $0x8] sm:$0xff] }
0x4410   :  { %v4467_v15 = vrot.slane %v4421_v59, %v6185_v26  ;;  %v4446_v28 = vrot.slane %v4421_v59, %v6156_v34  ;;  %v22_v25 = vstv %s7253_s14  ;;  %v4460_v27 = vrot.slane %v4421_v59, %v6171_v20  ;;  %v7150_v34 = vld [vmem:[%s7254_s13] ss:$0 sm:$0xff] }
0x4411   :  { %4434 = vbcast.lane.b32.xlu0 %v4432_v14, 256  ;;  %4427 = vbcast.lane.b32.xlu1 %v4425_v10, 256  ;;  %23 = vst [vmem:[#allocation6] sm:$0x1] %v22_v25  ;;  %v4474_v18 = vrot.slane %v4421_v59, %v6188_v39  ;;  %v4602_v20 = vmul.f32 %v7150_v34, %v4588_v8 }
0x4412   :  { %v4606_v1 = vmul.f32 %v7150_v34, %v4592_v45  ;;  %v4607_v7 = vmul.f32 %v7150_v34, %v4593_v33 }
0x4413   :  { %v4612_v26 = vsel %vm127_vm0, %v4602_v20, 0.0 }
0x4414   :  { %v4624_v55 = vsel %vm127_vm0, %v4606_v1, 0.0 }
0x4415   :  { %4455 = vbcast.lane.b32.xlu0 %v4453_v53, 256  ;;  %4441 = vbcast.lane.b32.xlu1 %v4439_v44, 256 }
0x4419   :  { %4469 = vbcast.lane.b32.xlu0 %v4467_v15, 256  ;;  %4448 = vbcast.lane.b32.xlu1 %v4446_v28, 256  ;;  %v4841_v28 = vld [vmem:[#allocation6] ss:$0 sm:$0xff] }
0x441d   :  { %4462 = vbcast.lane.b32.xlu1 %v4460_v27, 256 }
0x4421   :  { %4476 = vbcast.lane.b32.xlu1 %v4474_v18, 256 }
0x4425   :  { %4503 = vrot.lane.b32.xlu1 %v7085_v58, %s5647_s17  ;;  %v4590_v58 = vld [vmem:[#allocation3 + $0x18] sm:$0xff] }
0x4426   :  { %v4604_v63 = vmul.f32 %v7150_v34, %v4590_v58 }
0x4428   :  { %v4618_v54 = vsel %vm127_vm0, %v4604_v63, 0.0 }
0x4437   :  { %1585 = vxpose.xlu0.b32.start.end [1/1] (short) (narrow) %v6146_v31, 8  ;;  %v4587_v31 = vld [vmem:[#allocation3] sm:$0xff] }
0x4438   :  { %v4601_v39 = vmul.f32 %v7150_v34, %v4587_v31 }
0x443b   :  { %2432 = vxpose.xlu0.b32.start.end [1/1] (short) (narrow) %v6426_v57, 8  ;;  %v4589_v57 = vld [vmem:[#allocation3 + $0x10] sm:$0xff] }
0x443f   :  { %2856 = vxpose.xlu0.b32.start.end [1/1] (short) (narrow) %v6597_v38, 8  ;;  %v4609_v38 = vsel %vm127_vm0, %v4601_v39, 0.0 }
0x4443   :  { %3280 = vxpose.xlu0.b32.start.end [1/1] (short) (narrow) %v6730_v50, 8  ;;  %v4603_v50 = vmul.f32 %v7150_v34, %v4589_v57 }
0x4445   :  { %v4615_v60 = vsel %vm127_vm0, %v4603_v50, 0.0 }
0x4447   :  { %4128 = vxpose.xlu0.b32.start.end [1/1] (short) (narrow) %v7018_v21, 8  ;;  %v4591_v21 = vld [vmem:[#allocation3 + $0x20] sm:$0xff] }
0x4448   :  { %v4605_v12 = vmul.f32 %v7150_v34, %v4591_v21 }
0x4449   :  { %4613 = vadd.xlane.f32.xlu1 %v4612_v26 }
0x444a   :  { %v4621_v36 = vsel %vm127_vm0, %v4605_v12, 0.0 }
0x444b   :  { %4552 = vxpose.xlu0.b32.start.end [1/1] (short) (narrow) %v4421_v59, 8 }
0x4478   :  { %4610 = vadd.xlane.f32.xlu0 %v4609_v38 }
0x447c   :  { %4616 = vadd.xlane.f32.xlu0 %v4615_v60 }
0x4480   :  { %4619 = vadd.xlane.f32.xlu0 %v4618_v54 }
0x4483   :  { %v4435_v17 = vpop.permute.xlu0 %4434  ;;  %v4428_v23 = vpop.permute.xlu1 %4427 }
0x4484   :  { %v4479_v30 = vmul.f32 %v6959_v35, %v4435_v17  ;;  %v4478_v43 = vmul.f32 %v6963_v48, %v4428_v23  ;;  %4622 = vadd.xlane.f32.xlu0 %v4621_v36  ;;  %v4627_v48 = vsel %vm127_vm0, %v4607_v7, 0.0 }
0x4486   :  { %v4487_v16 = vsel %vm127_vm0, %v4479_v30, 0.0  ;;  %v4486_v42 = vsel %vm127_vm0, %v4478_v43, 0.0 }
0x4487   :  { %v4456_v5 = vpop.permute.xlu0 %4455  ;;  %v4442_v46 = vpop.permute.xlu1 %4441  ;;  %v4488_v35 = vadd.f32 %v4487_v16, %v4486_v42 }
0x4488   :  { %v4480_v41 = vmul.f32 %v6969_v11, %v4442_v46  ;;  %4625 = vadd.xlane.f32.xlu0 %v4624_v55  ;;  %v4482_v13 = vmul.f32 %v6979_v52, %v4456_v5 }
0x448a   :  { %v4489_v49 = vsel %vm127_vm0, %v4480_v41, 0.0  ;;  %v4493_v11 = vsel %vm127_vm0, %v4482_v13, 0.0 }
0x448b   :  { %v4449_v37 = vpop.permute.xlu1 %4448  ;;  %v4490_v51 = vadd.f32 %v4489_v49, %v4488_v35  ;;  %v4470_v32 = vpop.permute.xlu0 %4469 }
0x448c   :  { %v4481_v61 = vmul.f32 %v6973_v6, %v4449_v37  ;;  %4628 = vadd.xlane.f32.xlu0 %v4627_v48  ;;  %v4484_v2 = vmul.f32 %v6989_v62, %v4470_v32 }
0x448e   :  { %v4491_v56 = vsel %vm127_vm0, %v4481_v61, 0.0  ;;  %v4497_v6 = vsel %vm127_vm0, %v4484_v2, 0.0 }
0x448f   :  { %v4492_v3 = vadd.f32 %v4491_v56, %v4490_v51  ;;  %v4463_v47 = vpop.permute.xlu1 %4462 }
0x4490   :  { %v4483_v40 = vmul.f32 %v6983_v4, %v4463_v47 }
0x4491   :  { %v4494_v24 = vadd.f32 %v4493_v11, %v4492_v3 }
0x4492   :  { %v4495_v9 = vsel %vm127_vm0, %v4483_v40, 0.0 }
0x4493   :  { %v4496_v59 = vadd.f32 %v4495_v9, %v4494_v24  ;;  %v4477_v52 = vpop.permute.xlu1 %4476 }
0x4494   :  { %v4485_v14 = vmul.f32 %v6993_v0, %v4477_v52 }
0x4495   :  { %v4498_v10 = vadd.f32 %v4497_v6, %v4496_v59 }
0x4496   :  { %v4499_v53 = vsel %vm127_vm0, %v4485_v14, 0.0 }
0x4497   :  { %v4500_v44 = vadd.f32 %v4499_v53, %v4498_v10  ;;  %v4504_v8 = vpop.permute.xlu1 %4503 }
0x4499   :  { %v4501_v15 = vpack.c.bf16 %v4500_v44, %v4500_v44 }
0x449b   :  { %5361 = vmatmul.mubr.msk.bf16.vlgmr.msra.gmra.mrb[84].mxu1 %vm127_vm0, %v4501_v15 }
0x44a2   :  { %4640 = vperm.xlu0 %5411, %v4841_v28  }
0x44b7   :  { %v1601_v62 = vpop.trf.xlu0 }
0x44b8   :  { %1617 = vst.msk [vmem:[%s7255_s16] sm:$0xff] %vm1424_vm10, %v1601_v62 }
0x44bb   :  { %v2448_v4 = vpop.trf.xlu0 }
0x44bc   :  { %4809 = vst.msk [vmem:[%s7255_s16 + $0x10] sm:$0xff] %vm1424_vm10, %v2448_v4 }
0x44bf   :  { %v2872_v0 = vpop.trf.xlu0 }
0x44c0   :  { %4815 = vst.msk [vmem:[%s7255_s16 + $0x18] sm:$0xff] %vm1424_vm10, %v2872_v0 }
0x44c3   :  { %v3296_v25 = vpop.trf.xlu0 }
0x44c4   :  { %4821 = vst.msk [vmem:[%s7255_s16 + $0x20] sm:$0xff] %vm1424_vm10, %v3296_v25 }
0x44c7   :  { %v4144_v27 = vpop.trf.xlu0 }
0x44c8   :  { %4833 = vst.msk [vmem:[%s7255_s16 + $0x30] sm:$0xff] %vm1424_vm10, %v4144_v27 }
0x44cb   :  { %v4568_v18 = vpop.trf.xlu0 }
0x44cc   :  { %4839 = vst.msk [vmem:[%s7255_s16 + $0x38] sm:$0xff] %vm1424_vm10, %v4568_v18 }
0x44d6   :  { %v4614_v36 = vpop.xlane.xlu1 %4613 }
0x4505   :  { %v4611_v63 = vpop.xlane.xlu0 %4610 }
0x4509   :  { %v4617_v21 = vpop.xlane.xlu0 %4616 }
0x450d   :  { %v4620_v54 = vpop.xlane.xlu0 %4619 }
0x4511   :  { %v4623_v12 = vpop.xlane.xlu0 %4622 }
0x4515   :  { %v4626_v45 = vpop.xlane.xlu0 %4625 }
0x4519   :  { %v4629_v17 = vpop.xlane.xlu0 %4628 }
0x4521   :  { %v4641_v23 = vpop.permute.xlu0 %4640 }
0x4522   :  { %v4643_v1 = vadd.f32 %v4641_v23, %v4611_v63  ;;  %v4644_v30 = vadd.f32 %v4641_v23, %v4614_v36  ;;  %v4645_v43 = vadd.f32 %v4641_v23, %v4617_v21  ;;  %v4647_v46 = vadd.f32 %v4641_v23, %v4623_v12 }
0x4523   :  { %v4648_v16 = vadd.f32 %v4641_v23, %v4626_v45  ;;  %v4649_v49 = vadd.f32 %v4641_v23, %v4629_v17 }
0x4524   :  { %v4666_v33 = vrot.slane %v4644_v30, %v6113_v29  ;;  %v4670_v5 = vrot.slane %v4645_v43, %v6113_v29  ;;  %v4678_v41 = vrot.slane %v4647_v46, %v6113_v29 }
0x4525   :  { %v4682_v37 = vrot.slane %v4648_v16, %v6113_v29  ;;  %v4686_v51 = vrot.slane %v4649_v49, %v6113_v29 }
0x456e   :  { %v4543_v20 = vpop.f32.mrb[84].mxu1 }
0x456f   :  { %v4544_v26 = vadd.f32 %v4543_v20, %v4504_v8  ;;  %v5362_v31 = vpop.f32.mrb[85].mxu1 }
0x4570   :  { %v4546_v39 = vpop.f32.mrb[86].mxu1 }
0x4571   :  { %5608 = vtanh.f32 %v4544_v26  ;;  %v5363_v57 = vpop.f32.mrb[87].mxu1 }
0x457b   :  { %v5609_v38 = vpop.eup %5608 }
0x457c   :  { %4551 = vst.msk [vmem:[#allocation3 + $0x38] sm:$0xff] %vm127_vm0, %v5609_v38 }
0x4583   :  { %v4594_v50 = vld [vmem:[#allocation3 + $0x38] sm:$0xff] }
0x4584   :  { %v4608_v58 = vmul.f32 %v7150_v34, %v4594_v50  ;;  %v4662_v34 = vrot.slane %v4643_v1, %v6113_v29 }
0x4586   :  { %v4630_v60 = vsel %vm127_vm0, %v4608_v58, 0.0 }
0x4587   :  { %4631 = vadd.xlane.f32.xlu1 %v4630_v60 }
0x45ba   :  { %2008 = vxpose.xlu1.b32.start.end [1/1] (short) (narrow) %v6303_v22, 8  ;;  %v4646_v22 = vadd.f32 %v4641_v23, %v4620_v54 }
0x45bc   :  { %v4674_v7 = vrot.slane %v4646_v22, %v6113_v29 }
0x45be   :  { %3704 = vxpose.xlu1.b32.start.end [1/1] (short) (narrow) %v6855_v19, 8  ;;  %v4691_v19 = vsel %vm1408_vm2, %v4666_v33, %v4662_v34 }
0x45bf   :  { %v4692_v55 = vsel %vm1410_vm3, %v4670_v5, %v4691_v19 }
0x45c0   :  { %v4693_v42 = vsel %vm1412_vm4, %v4674_v7, %v4692_v55 }
0x45c1   :  { %v4694_v35 = vsel %vm1414_vm5, %v4678_v41, %v4693_v42 }
0x45c2   :  { %v4695_v61 = vsel %vm1416_vm6, %v4682_v37, %v4694_v35 }
0x45c3   :  { %v4696_v56 = vsel %vm1418_vm7, %v4686_v51, %v4695_v61 }
0x4614   :  { %v4632_v48 = vpop.xlane.xlu1 %4631 }
0x4615   :  { %v4650_v13 = vadd.f32 %v4641_v23, %v4632_v48 }
0x4617   :  { %v4690_v32 = vrot.slane %v4650_v13, %v6113_v29 }
0x4619   :  { %v4697_v3 = vsel %vm1420_vm8, %v4690_v32, %v4696_v56 }
0x461a   :  { %4699 = vxpose.xlu1.b32.start.end [1/1] (short) (narrow) %v4697_v3, 8 }
0x463a   :  { %v2024_v47 = vpop.trf.xlu1 }
0x463b   :  { %4803 = vst.msk [vmem:[%s7255_s16 + $0x8] sm:$0xff] %vm1424_vm10, %v2024_v47 }
0x463e   :  { %v3720_v11 = vpop.trf.xlu1 }
0x463f   :  { %4827 = vst.msk [vmem:[%s7255_s16 + $0x28] sm:$0xff] %vm1424_vm10, %v3720_v11 }
0x469a   :  { %v4715_v2 = vpop.trf.xlu1 }
0x469b   :  { %4731 = vst.msk [vmem:[%s7256_s15] sm:$0xff] %vm1424_vm10, %v4715_v2 }

</bundles_post_ra>
